<compile_context>
chip_gen: v5e
topology: v5e:2x2
jax: 0.10.0
libtpu: 0.0.40
codegen_flags: <defaults>
</compile_context>

<pallas_src>
import jax
import jax.numpy as jnp
from jax import lax
from jax.experimental import pallas as pl
from jax.experimental.pallas import tpu as pltpu


def lstm_recurrence_kernel(pg_ref, whh_ref, wfc_ref, bfc_ref, out_ref,
                           h_ref, c_ref):
    # pg_ref : (T, Bt, 4*Hp) f32  pre-gates (x @ W_ih^T + bias), gate-padded
    # whh_ref: (Hp, 4*Hp)    bf16 recurrent weights W_hh^T, gate-padded
    # wfc_ref: (1, Hp)       f32  fc weight row (zero beyond H)
    # bfc_ref: (1, 1)        f32  fc bias
    # out_ref: (Bt, 1)       f32
    # h_ref/c_ref: (Bt, Hp)  f32  scratch state
    T = pg_ref.shape[0]
    Hp = h_ref.shape[1]

    # fresh state for this (independent) batch tile
    h_ref[...] = jnp.zeros_like(h_ref)
    c_ref[...] = jnp.zeros_like(c_ref)

    def step(t, carry):
        # only the serial part: recurrent matmul (bf16 operands, f32 accumulate)
        rec = jnp.dot(h_ref[...].astype(jnp.bfloat16), whh_ref[...],
                      preferred_element_type=jnp.float32)
        gates = pg_ref[t] + rec                       # (Bt, 4*Hp) f32

        # lane-aligned PyTorch gate order [i | f | g | o]
        i_g = jax.nn.sigmoid(gates[:, 0 * Hp:1 * Hp])
        f_g = jax.nn.sigmoid(gates[:, 1 * Hp:2 * Hp])
        g_g = jnp.tanh(gates[:, 2 * Hp:3 * Hp])
        o_g = jax.nn.sigmoid(gates[:, 3 * Hp:4 * Hp])

        c_new = f_g * c_ref[...] + i_g * g_g
        c_ref[...] = c_new
        h_ref[...] = o_g * jnp.tanh(c_new)
        return carry

    # short, static trip count -> fully unrolled in-kernel loop
    lax.fori_loop(0, T, step, 0, unroll=True)

    # dropout(p=0.3) is identity at inference.
    # FC (H -> 1) as a VPU multiply + lane reduction (avoids a degenerate N=1 MXU dot).
    h = h_ref[...]                                            # (Bt, Hp) f32, cols >= H are 0
    out_ref[...] = (jnp.sum(h * wfc_ref[...], axis=-1, keepdims=True)
                    + bfc_ref[...])


def _round_up(n, m):
    return ((n + m - 1) // m) * m


def lstm_regressor(x, w_ih, w_hh, b_ih, b_hh, w_fc, b_fc):
    """x: (B, T, D) batch-first, like PyTorch. Returns (B, 1) float32."""
    B, T, D = x.shape
    H = w_hh.shape[1]                       # w_hh: (4H, H)
    assert w_ih.shape == (4 * H, D)

    Hp = _round_up(H, 128)                  # lane-aligned per-gate width
    Bp = _round_up(B, 8)                    # sublane-aligned batch
    if Bp > 128:                            # tile big batches at 128 rows
        Bp = _round_up(Bp, 128)
        b_tile = 128
    else:
        b_tile = Bp

    f32, bf16 = jnp.float32, jnp.bfloat16

    # ---- hoisted input projection: ONE big matmul over all (B*T) timesteps ----
    x_p = jnp.zeros((Bp, T, D), f32).at[:B].set(x.astype(f32))
    bias = (b_ih + b_hh).astype(f32)                                  # (4H,)
    pre = jnp.einsum('btd,dg->btg', x_p.astype(bf16),
                     jnp.transpose(w_ih).astype(bf16),
                     preferred_element_type=f32) + bias               # (Bp, T, 4H) f32
    # pad each gate block H -> Hp (lane alignment) and go time-major
    pre = pre.reshape(Bp, T, 4, H)
    pre = jnp.zeros((Bp, T, 4, Hp), f32).at[..., :H].set(pre)
    pre_tm = jnp.transpose(pre.reshape(Bp, T, 4 * Hp), (1, 0, 2))     # (T, Bp, 4*Hp)

    # ---- gate-padded recurrent weights, resident in bf16 (MXU operand) ----
    whh_t = jnp.transpose(w_hh).astype(f32).reshape(H, 4, H)          # (H_in, gate, H_out)
    whh_p = jnp.zeros((Hp, 4, Hp), f32).at[:H, :, :H].set(whh_t)
    whh_p = whh_p.reshape(Hp, 4 * Hp).astype(bf16)                    # (Hp, 4*Hp)

    wfc_p = jnp.zeros((1, Hp), f32).at[:, :H].set(w_fc.reshape(1, H).astype(f32))
    bfc = b_fc.reshape(1, 1).astype(f32)

    grid = (Bp // b_tile,)
    grid_spec = pltpu.PrefetchScalarGridSpec(
        num_scalar_prefetch=0,
        grid=grid,
        in_specs=[
            pl.BlockSpec((T, b_tile, 4 * Hp), lambda b: (0, b, 0)),   # pre-gates
            pl.BlockSpec((Hp, 4 * Hp), lambda b: (0, 0)),             # W_hh^T (padded, bf16)
            pl.BlockSpec((1, Hp), lambda b: (0, 0)),                  # W_fc (padded)
            pl.BlockSpec((1, 1), lambda b: (0, 0)),                   # b_fc
        ],
        out_specs=pl.BlockSpec((b_tile, 1), lambda b: (b, 0)),
        scratch_shapes=[
            pltpu.VMEM((b_tile, Hp), f32),   # h state
            pltpu.VMEM((b_tile, Hp), f32),   # c state
        ],
    )

    out = pl.pallas_call(
        lstm_recurrence_kernel,
        out_shape=jax.ShapeDtypeStruct((Bp, 1), f32),
        grid_spec=grid_spec,
        compiler_params=pltpu.CompilerParams(
            # batch tiles are independent -> megacore-shardable on v7x;
            # (VMEM use is tiny here, so the default scoped limit is fine.)
            dimension_semantics=("parallel",)),
    )(pre_tm, whh_p, wfc_p, bfc)

    return out[:B]


def _reference(x, w_ih, w_hh, b_ih, b_hh, w_fc, b_fc):
    """Pure-JAX f32 reference mimicking torch.nn.LSTM (1 layer, batch_first)."""
    B, T, D = x.shape
    H = w_hh.shape[1]
    h = jnp.zeros((B, H), jnp.float32)
    c = jnp.zeros((B, H), jnp.float32)
    for t in range(T):
        gates = x[:, t, :] @ w_ih.T + h @ w_hh.T + b_ih + b_hh
        i_g = jax.nn.sigmoid(gates[:, 0 * H:1 * H])
        f_g = jax.nn.sigmoid(gates[:, 1 * H:2 * H])
        g_g = jnp.tanh(gates[:, 2 * H:3 * H])
        o_g = jax.nn.sigmoid(gates[:, 3 * H:4 * H])
        c = f_g * c + i_g * g_g
        h = o_g * jnp.tanh(c)
    return h @ w_fc.T + b_fc


if __name__ == "__main__":
    # small shapes consistent with the module
    B, T, D, H = 2, 8, 16, 32

    key = jax.random.PRNGKey(0)
    k = jax.random.split(key, 7)
    scale = 1.0 / (H ** 0.5)
    x = jax.random.normal(k[0], (B, T, D), jnp.float32)
    w_ih = jax.random.uniform(k[1], (4 * H, D), jnp.float32, -scale, scale)
    w_hh = jax.random.uniform(k[2], (4 * H, H), jnp.float32, -scale, scale)
    b_ih = jax.random.uniform(k[3], (4 * H,), jnp.float32, -scale, scale)
    b_hh = jax.random.uniform(k[4], (4 * H,), jnp.float32, -scale, scale)
    w_fc = jax.random.uniform(k[5], (1, H), jnp.float32, -scale, scale)
    b_fc = jax.random.uniform(k[6], (1,), jnp.float32, -scale, scale)

    out = lstm_regressor(x, w_ih, w_hh, b_ih, b_hh, w_fc, b_fc)
    out = jax.block_until_ready(out)

    ref = _reference(x, w_ih, w_hh, b_ih, b_hh, w_fc, b_fc)
    assert out.shape == (B, 1)
    # bf16 MXU operands (f32 accumulation / f32 state) -> looser tolerance vs f32 ref
    assert jnp.allclose(out, ref, atol=5e-2, rtol=5e-2), (out, ref)

    print("KERNEL_OK")
</pallas_src>

<mosaic_0001>
module attributes {stable_mosaic.version = 11 : i64} {
  func.func @lstm_recurrence_kernel(%arg0: i32, %arg1: memref<8x8x512xf32, #tpu.memory_space<vmem>>, %arg2: memref<128x512xbf16, #tpu.memory_space<vmem>>, %arg3: memref<1x128xf32, #tpu.memory_space<vmem>>, %arg4: memref<1x1xf32, #tpu.memory_space<vmem>>, %arg5: memref<8x1xf32, #tpu.memory_space<vmem>>, %arg6: memref<8x128xf32, #tpu.memory_space<vmem>>, %arg7: memref<8x128xf32, #tpu.memory_space<vmem>>) attributes {dimension_semantics = [#tpu.dimension_semantics<parallel>], iteration_bounds = array<i64: 1>, scalar_prefetch = 0 : i64, scratch_operands = 2 : i64, tpu.core_type = #tpu.core_type<tc>, window_params = [{transform_indices = @transform_0, window_bounds = array<i64: 8, 8, 512>}, {pipeline_mode = #tpu.pipeline_mode<synchronous>, transform_indices = @transform_1, window_bounds = array<i64: 128, 512>}, {pipeline_mode = #tpu.pipeline_mode<synchronous>, transform_indices = @transform_2, window_bounds = array<i64: 1, 128>}, {pipeline_mode = #tpu.pipeline_mode<synchronous>, transform_indices = @transform_3, window_bounds = array<i64: 1, 1>}, {transform_indices = @transform_4, window_bounds = array<i64: 8, 1>}]} {
    %cst = arith.constant 0.000000e+00 : f32
    %0 = vector.broadcast %cst : f32 to vector<8x128xf32>
    %c0 = arith.constant 0 : index
    %c0_0 = arith.constant 0 : index
    %1 = vector.load %arg6[%c0, %c0_0] : memref<8x128xf32, #tpu.memory_space<vmem>>, vector<8x128xf32>
    tpu.vector_store %arg6[%c0, %c0_0], %0 {strides = array<i32>} : memref<8x128xf32, #tpu.memory_space<vmem>>, vector<8x128xf32>,
    %cst_1 = arith.constant 0.000000e+00 : f32
    %2 = vector.broadcast %cst_1 : f32 to vector<8x128xf32>
    %c0_2 = arith.constant 0 : index
    %c0_3 = arith.constant 0 : index
    %3 = vector.load %arg7[%c0_2, %c0_3] : memref<8x128xf32, #tpu.memory_space<vmem>>, vector<8x128xf32>
    tpu.vector_store %arg7[%c0_2, %c0_3], %2 {strides = array<i32>} : memref<8x128xf32, #tpu.memory_space<vmem>>, vector<8x128xf32>,
    %c0_i32 = arith.constant 0 : i32
    %c0_4 = arith.constant 0 : index
    %c0_5 = arith.constant 0 : index
    %4 = vector.load %arg6[%c0_4, %c0_5] : memref<8x128xf32, #tpu.memory_space<vmem>>, vector<8x128xf32>
    %5 = arith.truncf %4 : vector<8x128xf32> to vector<8x128xbf16>
    %c0_6 = arith.constant 0 : index
    %c0_7 = arith.constant 0 : index
    %6 = vector.load %arg2[%c0_6, %c0_7] : memref<128x512xbf16, #tpu.memory_space<vmem>>, vector<128x512xbf16>
    %cst_8 = arith.constant dense<0.000000e+00> : vector<8x512xf32>
    %7 = tpu.matmul %5, %6, %cst_8 {dimension_numbers = #tpu.dot_dimension_numbers<[1], [0], [0], [1], [0, 0, 1, 1], [], []>} : vector<8x128xbf16>, vector<128x512xbf16>, vector<8x512xf32> -> vector<8x512xf32>
    %8 = arith.index_cast %c0_i32 : i32 to index
    %c0_9 = arith.constant 0 : index
    %c0_10 = arith.constant 0 : index
    %9 = vector.load %arg1[%8, %c0_9, %c0_10] : memref<8x8x512xf32, #tpu.memory_space<vmem>>, vector<1x8x512xf32>
    %10 = vector.shape_cast %9 : vector<1x8x512xf32> to vector<8x512xf32>
    %11 = arith.addf %10, %7 : vector<8x512xf32>
    %12 = vector.extract_strided_slice %11 {offsets = [0, 0], sizes = [8, 128], strides = [1, 1]} : vector<8x512xf32> to vector<8x128xf32>
    %13 = arith.negf %12 : vector<8x128xf32>
    %14 = math.exp %13 : vector<8x128xf32>
    %cst_11 = arith.constant 1.000000e+00 : f32
    %15 = vector.broadcast %cst_11 : f32 to vector<8x128xf32>
    %16 = arith.addf %15, %14 : vector<8x128xf32>
    %17 = arith.divf %15, %16 : vector<8x128xf32>
    %18 = vector.extract_strided_slice %11 {offsets = [0, 128], sizes = [8, 128], strides = [1, 1]} : vector<8x512xf32> to vector<8x128xf32>
    %19 = arith.negf %18 : vector<8x128xf32>
    %20 = math.exp %19 : vector<8x128xf32>
    %cst_12 = arith.constant 1.000000e+00 : f32
    %21 = vector.broadcast %cst_12 : f32 to vector<8x128xf32>
    %22 = arith.addf %21, %20 : vector<8x128xf32>
    %23 = arith.divf %21, %22 : vector<8x128xf32>
    %24 = vector.extract_strided_slice %11 {offsets = [0, 256], sizes = [8, 128], strides = [1, 1]} : vector<8x512xf32> to vector<8x128xf32>
    %25 = math.tanh %24 : vector<8x128xf32>
    %26 = vector.extract_strided_slice %11 {offsets = [0, 384], sizes = [8, 128], strides = [1, 1]} : vector<8x512xf32> to vector<8x128xf32>
    %27 = arith.negf %26 : vector<8x128xf32>
    %28 = math.exp %27 : vector<8x128xf32>
    %cst_13 = arith.constant 1.000000e+00 : f32
    %29 = vector.broadcast %cst_13 : f32 to vector<8x128xf32>
    %30 = arith.addf %29, %28 : vector<8x128xf32>
    %31 = arith.divf %29, %30 : vector<8x128xf32>
    %c0_14 = arith.constant 0 : index
    %c0_15 = arith.constant 0 : index
    %32 = vector.load %arg7[%c0_14, %c0_15] : memref<8x128xf32, #tpu.memory_space<vmem>>, vector<8x128xf32>
    %33 = arith.mulf %23, %32 : vector<8x128xf32>
    %34 = arith.mulf %17, %25 : vector<8x128xf32>
    %35 = arith.addf %33, %34 : vector<8x128xf32>
    %c0_16 = arith.constant 0 : index
    %c0_17 = arith.constant 0 : index
    %36 = vector.load %arg7[%c0_16, %c0_17] : memref<8x128xf32, #tpu.memory_space<vmem>>, vector<8x128xf32>
    tpu.vector_store %arg7[%c0_16, %c0_17], %35 {strides = array<i32>} : memref<8x128xf32, #tpu.memory_space<vmem>>, vector<8x128xf32>,
    %37 = math.tanh %35 : vector<8x128xf32>
    %38 = arith.mulf %31, %37 : vector<8x128xf32>
    %c0_18 = arith.constant 0 : index
    %c0_19 = arith.constant 0 : index
    %39 = vector.load %arg6[%c0_18, %c0_19] : memref<8x128xf32, #tpu.memory_space<vmem>>, vector<8x128xf32>
    tpu.vector_store %arg6[%c0_18, %c0_19], %38 {strides = array<i32>} : memref<8x128xf32, #tpu.memory_space<vmem>>, vector<8x128xf32>,
    %c1_i32 = arith.constant 1 : i32
    %c0_20 = arith.constant 0 : index
    %c0_21 = arith.constant 0 : index
    %40 = vector.load %arg6[%c0_20, %c0_21] : memref<8x128xf32, #tpu.memory_space<vmem>>, vector<8x128xf32>
    %41 = arith.truncf %40 : vector<8x128xf32> to vector<8x128xbf16>
    %c0_22 = arith.constant 0 : index
    %c0_23 = arith.constant 0 : index
    %42 = vector.load %arg2[%c0_22, %c0_23] : memref<128x512xbf16, #tpu.memory_space<vmem>>, vector<128x512xbf16>
    %cst_24 = arith.constant dense<0.000000e+00> : vector<8x512xf32>
    %43 = tpu.matmul %41, %42, %cst_24 {dimension_numbers = #tpu.dot_dimension_numbers<[1], [0], [0], [1], [0, 0, 1, 1], [], []>} : vector<8x128xbf16>, vector<128x512xbf16>, vector<8x512xf32> -> vector<8x512xf32>
    %44 = arith.index_cast %c1_i32 : i32 to index
    %c0_25 = arith.constant 0 : index
    %c0_26 = arith.constant 0 : index
    %45 = vector.load %arg1[%44, %c0_25, %c0_26] : memref<8x8x512xf32, #tpu.memory_space<vmem>>, vector<1x8x512xf32>
    %46 = vector.shape_cast %45 : vector<1x8x512xf32> to vector<8x512xf32>
    %47 = arith.addf %46, %43 : vector<8x512xf32>
    %48 = vector.extract_strided_slice %47 {offsets = [0, 0], sizes = [8, 128], strides = [1, 1]} : vector<8x512xf32> to vector<8x128xf32>
    %49 = arith.negf %48 : vector<8x128xf32>
    %50 = math.exp %49 : vector<8x128xf32>
    %cst_27 = arith.constant 1.000000e+00 : f32
    %51 = vector.broadcast %cst_27 : f32 to vector<8x128xf32>
    %52 = arith.addf %51, %50 : vector<8x128xf32>
    %53 = arith.divf %51, %52 : vector<8x128xf32>
    %54 = vector.extract_strided_slice %47 {offsets = [0, 128], sizes = [8, 128], strides = [1, 1]} : vector<8x512xf32> to vector<8x128xf32>
    %55 = arith.negf %54 : vector<8x128xf32>
    %56 = math.exp %55 : vector<8x128xf32>
    %cst_28 = arith.constant 1.000000e+00 : f32
    %57 = vector.broadcast %cst_28 : f32 to vector<8x128xf32>
    %58 = arith.addf %57, %56 : vector<8x128xf32>
    %59 = arith.divf %57, %58 : vector<8x128xf32>
    %60 = vector.extract_strided_slice %47 {offsets = [0, 256], sizes = [8, 128], strides = [1, 1]} : vector<8x512xf32> to vector<8x128xf32>
    %61 = math.tanh %60 : vector<8x128xf32>
    %62 = vector.extract_strided_slice %47 {offsets = [0, 384], sizes = [8, 128], strides = [1, 1]} : vector<8x512xf32> to vector<8x128xf32>
    %63 = arith.negf %62 : vector<8x128xf32>
    %64 = math.exp %63 : vector<8x128xf32>
    %cst_29 = arith.constant 1.000000e+00 : f32
    %65 = vector.broadcast %cst_29 : f32 to vector<8x128xf32>
    %66 = arith.addf %65, %64 : vector<8x128xf32>
    %67 = arith.divf %65, %66 : vector<8x128xf32>
    %c0_30 = arith.constant 0 : index
    %c0_31 = arith.constant 0 : index
    %68 = vector.load %arg7[%c0_30, %c0_31] : memref<8x128xf32, #tpu.memory_space<vmem>>, vector<8x128xf32>
    %69 = arith.mulf %59, %68 : vector<8x128xf32>
    %70 = arith.mulf %53, %61 : vector<8x128xf32>
    %71 = arith.addf %69, %70 : vector<8x128xf32>
    %c0_32 = arith.constant 0 : index
    %c0_33 = arith.constant 0 : index
    %72 = vector.load %arg7[%c0_32, %c0_33] : memref<8x128xf32, #tpu.memory_space<vmem>>, vector<8x128xf32>
    tpu.vector_store %arg7[%c0_32, %c0_33], %71 {strides = array<i32>} : memref<8x128xf32, #tpu.memory_space<vmem>>, vector<8x128xf32>,
    %73 = math.tanh %71 : vector<8x128xf32>
    %74 = arith.mulf %67, %73 : vector<8x128xf32>
    %c0_34 = arith.constant 0 : index
    %c0_35 = arith.constant 0 : index
    %75 = vector.load %arg6[%c0_34, %c0_35] : memref<8x128xf32, #tpu.memory_space<vmem>>, vector<8x128xf32>
    tpu.vector_store %arg6[%c0_34, %c0_35], %74 {strides = array<i32>} : memref<8x128xf32, #tpu.memory_space<vmem>>, vector<8x128xf32>,
    %c2_i32 = arith.constant 2 : i32
    %c0_36 = arith.constant 0 : index
    %c0_37 = arith.constant 0 : index
    %76 = vector.load %arg6[%c0_36, %c0_37] : memref<8x128xf32, #tpu.memory_space<vmem>>, vector<8x128xf32>
    %77 = arith.truncf %76 : vector<8x128xf32> to vector<8x128xbf16>
    %c0_38 = arith.constant 0 : index
    %c0_39 = arith.constant 0 : index
    %78 = vector.load %arg2[%c0_38, %c0_39] : memref<128x512xbf16, #tpu.memory_space<vmem>>, vector<128x512xbf16>
    %cst_40 = arith.constant dense<0.000000e+00> : vector<8x512xf32>
    %79 = tpu.matmul %77, %78, %cst_40 {dimension_numbers = #tpu.dot_dimension_numbers<[1], [0], [0], [1], [0, 0, 1, 1], [], []>} : vector<8x128xbf16>, vector<128x512xbf16>, vector<8x512xf32> -> vector<8x512xf32>
    %80 = arith.index_cast %c2_i32 : i32 to index
    %c0_41 = arith.constant 0 : index
    %c0_42 = arith.constant 0 : index
    %81 = vector.load %arg1[%80, %c0_41, %c0_42] : memref<8x8x512xf32, #tpu.memory_space<vmem>>, vector<1x8x512xf32>
    %82 = vector.shape_cast %81 : vector<1x8x512xf32> to vector<8x512xf32>
    %83 = arith.addf %82, %79 : vector<8x512xf32>
    %84 = vector.extract_strided_slice %83 {offsets = [0, 0], sizes = [8, 128], strides = [1, 1]} : vector<8x512xf32> to vector<8x128xf32>
    %85 = arith.negf %84 : vector<8x128xf32>
    %86 = math.exp %85 : vector<8x128xf32>
    %cst_43 = arith.constant 1.000000e+00 : f32
    %87 = vector.broadcast %cst_43 : f32 to vector<8x128xf32>
    %88 = arith.addf %87, %86 : vector<8x128xf32>
    %89 = arith.divf %87, %88 : vector<8x128xf32>
    %90 = vector.extract_strided_slice %83 {offsets = [0, 128], sizes = [8, 128], strides = [1, 1]} : vector<8x512xf32> to vector<8x128xf32>
    %91 = arith.negf %90 : vector<8x128xf32>
    %92 = math.exp %91 : vector<8x128xf32>
    %cst_44 = arith.constant 1.000000e+00 : f32
    %93 = vector.broadcast %cst_44 : f32 to vector<8x128xf32>
    %94 = arith.addf %93, %92 : vector<8x128xf32>
    %95 = arith.divf %93, %94 : vector<8x128xf32>
    %96 = vector.extract_strided_slice %83 {offsets = [0, 256], sizes = [8, 128], strides = [1, 1]} : vector<8x512xf32> to vector<8x128xf32>
    %97 = math.tanh %96 : vector<8x128xf32>
    %98 = vector.extract_strided_slice %83 {offsets = [0, 384], sizes = [8, 128], strides = [1, 1]} : vector<8x512xf32> to vector<8x128xf32>
    %99 = arith.negf %98 : vector<8x128xf32>
    %100 = math.exp %99 : vector<8x128xf32>
    %cst_45 = arith.constant 1.000000e+00 : f32
    %101 = vector.broadcast %cst_45 : f32 to vector<8x128xf32>
    %102 = arith.addf %101, %100 : vector<8x128xf32>
    %103 = arith.divf %101, %102 : vector<8x128xf32>
    %c0_46 = arith.constant 0 : index
    %c0_47 = arith.constant 0 : index
    %104 = vector.load %arg7[%c0_46, %c0_47] : memref<8x128xf32, #tpu.memory_space<vmem>>, vector<8x128xf32>
    %105 = arith.mulf %95, %104 : vector<8x128xf32>
    %106 = arith.mulf %89, %97 : vector<8x128xf32>
    %107 = arith.addf %105, %106 : vector<8x128xf32>
    %c0_48 = arith.constant 0 : index
    %c0_49 = arith.constant 0 : index
    %108 = vector.load %arg7[%c0_48, %c0_49] : memref<8x128xf32, #tpu.memory_space<vmem>>, vector<8x128xf32>
    tpu.vector_store %arg7[%c0_48, %c0_49], %107 {strides = array<i32>} : memref<8x128xf32, #tpu.memory_space<vmem>>, vector<8x128xf32>,
    %109 = math.tanh %107 : vector<8x128xf32>
    %110 = arith.mulf %103, %109 : vector<8x128xf32>
    %c0_50 = arith.constant 0 : index
    %c0_51 = arith.constant 0 : index
    %111 = vector.load %arg6[%c0_50, %c0_51] : memref<8x128xf32, #tpu.memory_space<vmem>>, vector<8x128xf32>
    tpu.vector_store %arg6[%c0_50, %c0_51], %110 {strides = array<i32>} : memref<8x128xf32, #tpu.memory_space<vmem>>, vector<8x128xf32>,
    %c3_i32 = arith.constant 3 : i32
    %c0_52 = arith.constant 0 : index
    %c0_53 = arith.constant 0 : index
    %112 = vector.load %arg6[%c0_52, %c0_53] : memref<8x128xf32, #tpu.memory_space<vmem>>, vector<8x128xf32>
    %113 = arith.truncf %112 : vector<8x128xf32> to vector<8x128xbf16>
    %c0_54 = arith.constant 0 : index
    %c0_55 = arith.constant 0 : index
    %114 = vector.load %arg2[%c0_54, %c0_55] : memref<128x512xbf16, #tpu.memory_space<vmem>>, vector<128x512xbf16>
    %cst_56 = arith.constant dense<0.000000e+00> : vector<8x512xf32>
    %115 = tpu.matmul %113, %114, %cst_56 {dimension_numbers = #tpu.dot_dimension_numbers<[1], [0], [0], [1], [0, 0, 1, 1], [], []>} : vector<8x128xbf16>, vector<128x512xbf16>, vector<8x512xf32> -> vector<8x512xf32>
    %116 = arith.index_cast %c3_i32 : i32 to index
    %c0_57 = arith.constant 0 : index
    %c0_58 = arith.constant 0 : index
    %117 = vector.load %arg1[%116, %c0_57, %c0_58] : memref<8x8x512xf32, #tpu.memory_space<vmem>>, vector<1x8x512xf32>
    %118 = vector.shape_cast %117 : vector<1x8x512xf32> to vector<8x512xf32>
    %119 = arith.addf %118, %115 : vector<8x512xf32>
    %120 = vector.extract_strided_slice %119 {offsets = [0, 0], sizes = [8, 128], strides = [1, 1]} : vector<8x512xf32> to vector<8x128xf32>
    %121 = arith.negf %120 : vector<8x128xf32>
    %122 = math.exp %121 : vector<8x128xf32>
    %cst_59 = arith.constant 1.000000e+00 : f32
    %123 = vector.broadcast %cst_59 : f32 to vector<8x128xf32>
    %124 = arith.addf %123, %122 : vector<8x128xf32>
    %125 = arith.divf %123, %124 : vector<8x128xf32>
    %126 = vector.extract_strided_slice %119 {offsets = [0, 128], sizes = [8, 128], strides = [1, 1]} : vector<8x512xf32> to vector<8x128xf32>
    %127 = arith.negf %126 : vector<8x128xf32>
    %128 = math.exp %127 : vector<8x128xf32>
    %cst_60 = arith.constant 1.000000e+00 : f32
    %129 = vector.broadcast %cst_60 : f32 to vector<8x128xf32>
    %130 = arith.addf %129, %128 : vector<8x128xf32>
    %131 = arith.divf %129, %130 : vector<8x128xf32>
    %132 = vector.extract_strided_slice %119 {offsets = [0, 256], sizes = [8, 128], strides = [1, 1]} : vector<8x512xf32> to vector<8x128xf32>
    %133 = math.tanh %132 : vector<8x128xf32>
    %134 = vector.extract_strided_slice %119 {offsets = [0, 384], sizes = [8, 128], strides = [1, 1]} : vector<8x512xf32> to vector<8x128xf32>
    %135 = arith.negf %134 : vector<8x128xf32>
    %136 = math.exp %135 : vector<8x128xf32>
    %cst_61 = arith.constant 1.000000e+00 : f32
    %137 = vector.broadcast %cst_61 : f32 to vector<8x128xf32>
    %138 = arith.addf %137, %136 : vector<8x128xf32>
    %139 = arith.divf %137, %138 : vector<8x128xf32>
    %c0_62 = arith.constant 0 : index
    %c0_63 = arith.constant 0 : index
    %140 = vector.load %arg7[%c0_62, %c0_63] : memref<8x128xf32, #tpu.memory_space<vmem>>, vector<8x128xf32>
    %141 = arith.mulf %131, %140 : vector<8x128xf32>
    %142 = arith.mulf %125, %133 : vector<8x128xf32>
    %143 = arith.addf %141, %142 : vector<8x128xf32>
    %c0_64 = arith.constant 0 : index
    %c0_65 = arith.constant 0 : index
    %144 = vector.load %arg7[%c0_64, %c0_65] : memref<8x128xf32, #tpu.memory_space<vmem>>, vector<8x128xf32>
    tpu.vector_store %arg7[%c0_64, %c0_65], %143 {strides = array<i32>} : memref<8x128xf32, #tpu.memory_space<vmem>>, vector<8x128xf32>,
    %145 = math.tanh %143 : vector<8x128xf32>
    %146 = arith.mulf %139, %145 : vector<8x128xf32>
    %c0_66 = arith.constant 0 : index
    %c0_67 = arith.constant 0 : index
    %147 = vector.load %arg6[%c0_66, %c0_67] : memref<8x128xf32, #tpu.memory_space<vmem>>, vector<8x128xf32>
    tpu.vector_store %arg6[%c0_66, %c0_67], %146 {strides = array<i32>} : memref<8x128xf32, #tpu.memory_space<vmem>>, vector<8x128xf32>,
    %c4_i32 = arith.constant 4 : i32
    %c0_68 = arith.constant 0 : index
    %c0_69 = arith.constant 0 : index
    %148 = vector.load %arg6[%c0_68, %c0_69] : memref<8x128xf32, #tpu.memory_space<vmem>>, vector<8x128xf32>
    %149 = arith.truncf %148 : vector<8x128xf32> to vector<8x128xbf16>
    %c0_70 = arith.constant 0 : index
    %c0_71 = arith.constant 0 : index
    %150 = vector.load %arg2[%c0_70, %c0_71] : memref<128x512xbf16, #tpu.memory_space<vmem>>, vector<128x512xbf16>
    %cst_72 = arith.constant dense<0.000000e+00> : vector<8x512xf32>
    %151 = tpu.matmul %149, %150, %cst_72 {dimension_numbers = #tpu.dot_dimension_numbers<[1], [0], [0], [1], [0, 0, 1, 1], [], []>} : vector<8x128xbf16>, vector<128x512xbf16>, vector<8x512xf32> -> vector<8x512xf32>
    %152 = arith.index_cast %c4_i32 : i32 to index
    %c0_73 = arith.constant 0 : index
    %c0_74 = arith.constant 0 : index
    %153 = vector.load %arg1[%152, %c0_73, %c0_74] : memref<8x8x512xf32, #tpu.memory_space<vmem>>, vector<1x8x512xf32>
    %154 = vector.shape_cast %153 : vector<1x8x512xf32> to vector<8x512xf32>
    %155 = arith.addf %154, %151 : vector<8x512xf32>
    %156 = vector.extract_strided_slice %155 {offsets = [0, 0], sizes = [8, 128], strides = [1, 1]} : vector<8x512xf32> to vector<8x128xf32>
    %157 = arith.negf %156 : vector<8x128xf32>
    %158 = math.exp %157 : vector<8x128xf32>
    %cst_75 = arith.constant 1.000000e+00 : f32
    %159 = vector.broadcast %cst_75 : f32 to vector<8x128xf32>
    %160 = arith.addf %159, %158 : vector<8x128xf32>
    %161 = arith.divf %159, %160 : vector<8x128xf32>
    %162 = vector.extract_strided_slice %155 {offsets = [0, 128], sizes = [8, 128], strides = [1, 1]} : vector<8x512xf32> to vector<8x128xf32>
    %163 = arith.negf %162 : vector<8x128xf32>
    %164 = math.exp %163 : vector<8x128xf32>
    %cst_76 = arith.constant 1.000000e+00 : f32
    %165 = vector.broadcast %cst_76 : f32 to vector<8x128xf32>
    %166 = arith.addf %165, %164 : vector<8x128xf32>
    %167 = arith.divf %165, %166 : vector<8x128xf32>
    %168 = vector.extract_strided_slice %155 {offsets = [0, 256], sizes = [8, 128], strides = [1, 1]} : vector<8x512xf32> to vector<8x128xf32>
    %169 = math.tanh %168 : vector<8x128xf32>
    %170 = vector.extract_strided_slice %155 {offsets = [0, 384], sizes = [8, 128], strides = [1, 1]} : vector<8x512xf32> to vector<8x128xf32>
    %171 = arith.negf %170 : vector<8x128xf32>
    %172 = math.exp %171 : vector<8x128xf32>
    %cst_77 = arith.constant 1.000000e+00 : f32
    %173 = vector.broadcast %cst_77 : f32 to vector<8x128xf32>
    %174 = arith.addf %173, %172 : vector<8x128xf32>
    %175 = arith.divf %173, %174 : vector<8x128xf32>
    %c0_78 = arith.constant 0 : index
    %c0_79 = arith.constant 0 : index
    %176 = vector.load %arg7[%c0_78, %c0_79] : memref<8x128xf32, #tpu.memory_space<vmem>>, vector<8x128xf32>
    %177 = arith.mulf %167, %176 : vector<8x128xf32>
    %178 = arith.mulf %161, %169 : vector<8x128xf32>
    %179 = arith.addf %177, %178 : vector<8x128xf32>
    %c0_80 = arith.constant 0 : index
    %c0_81 = arith.constant 0 : index
    %180 = vector.load %arg7[%c0_80, %c0_81] : memref<8x128xf32, #tpu.memory_space<vmem>>, vector<8x128xf32>
    tpu.vector_store %arg7[%c0_80, %c0_81], %179 {strides = array<i32>} : memref<8x128xf32, #tpu.memory_space<vmem>>, vector<8x128xf32>,
    %181 = math.tanh %179 : vector<8x128xf32>
    %182 = arith.mulf %175, %181 : vector<8x128xf32>
    %c0_82 = arith.constant 0 : index
    %c0_83 = arith.constant 0 : index
    %183 = vector.load %arg6[%c0_82, %c0_83] : memref<8x128xf32, #tpu.memory_space<vmem>>, vector<8x128xf32>
    tpu.vector_store %arg6[%c0_82, %c0_83], %182 {strides = array<i32>} : memref<8x128xf32, #tpu.memory_space<vmem>>, vector<8x128xf32>,
    %c5_i32 = arith.constant 5 : i32
    %c0_84 = arith.constant 0 : index
    %c0_85 = arith.constant 0 : index
    %184 = vector.load %arg6[%c0_84, %c0_85] : memref<8x128xf32, #tpu.memory_space<vmem>>, vector<8x128xf32>
    %185 = arith.truncf %184 : vector<8x128xf32> to vector<8x128xbf16>
    %c0_86 = arith.constant 0 : index
    %c0_87 = arith.constant 0 : index
    %186 = vector.load %arg2[%c0_86, %c0_87] : memref<128x512xbf16, #tpu.memory_space<vmem>>, vector<128x512xbf16>
    %cst_88 = arith.constant dense<0.000000e+00> : vector<8x512xf32>
    %187 = tpu.matmul %185, %186, %cst_88 {dimension_numbers = #tpu.dot_dimension_numbers<[1], [0], [0], [1], [0, 0, 1, 1], [], []>} : vector<8x128xbf16>, vector<128x512xbf16>, vector<8x512xf32> -> vector<8x512xf32>
    %188 = arith.index_cast %c5_i32 : i32 to index
    %c0_89 = arith.constant 0 : index
    %c0_90 = arith.constant 0 : index
    %189 = vector.load %arg1[%188, %c0_89, %c0_90] : memref<8x8x512xf32, #tpu.memory_space<vmem>>, vector<1x8x512xf32>
    %190 = vector.shape_cast %189 : vector<1x8x512xf32> to vector<8x512xf32>
    %191 = arith.addf %190, %187 : vector<8x512xf32>
    %192 = vector.extract_strided_slice %191 {offsets = [0, 0], sizes = [8, 128], strides = [1, 1]} : vector<8x512xf32> to vector<8x128xf32>
    %193 = arith.negf %192 : vector<8x128xf32>
    %194 = math.exp %193 : vector<8x128xf32>
    %cst_91 = arith.constant 1.000000e+00 : f32
    %195 = vector.broadcast %cst_91 : f32 to vector<8x128xf32>
    %196 = arith.addf %195, %194 : vector<8x128xf32>
    %197 = arith.divf %195, %196 : vector<8x128xf32>
    %198 = vector.extract_strided_slice %191 {offsets = [0, 128], sizes = [8, 128], strides = [1, 1]} : vector<8x512xf32> to vector<8x128xf32>
    %199 = arith.negf %198 : vector<8x128xf32>
    %200 = math.exp %199 : vector<8x128xf32>
    %cst_92 = arith.constant 1.000000e+00 : f32
    %201 = vector.broadcast %cst_92 : f32 to vector<8x128xf32>
    %202 = arith.addf %201, %200 : vector<8x128xf32>
    %203 = arith.divf %201, %202 : vector<8x128xf32>
    %204 = vector.extract_strided_slice %191 {offsets = [0, 256], sizes = [8, 128], strides = [1, 1]} : vector<8x512xf32> to vector<8x128xf32>
    %205 = math.tanh %204 : vector<8x128xf32>
    %206 = vector.extract_strided_slice %191 {offsets = [0, 384], sizes = [8, 128], strides = [1, 1]} : vector<8x512xf32> to vector<8x128xf32>
    %207 = arith.negf %206 : vector<8x128xf32>
    %208 = math.exp %207 : vector<8x128xf32>
    %cst_93 = arith.constant 1.000000e+00 : f32
    %209 = vector.broadcast %cst_93 : f32 to vector<8x128xf32>
    %210 = arith.addf %209, %208 : vector<8x128xf32>
    %211 = arith.divf %209, %210 : vector<8x128xf32>
    %c0_94 = arith.constant 0 : index
    %c0_95 = arith.constant 0 : index
    %212 = vector.load %arg7[%c0_94, %c0_95] : memref<8x128xf32, #tpu.memory_space<vmem>>, vector<8x128xf32>
    %213 = arith.mulf %203, %212 : vector<8x128xf32>
    %214 = arith.mulf %197, %205 : vector<8x128xf32>
    %215 = arith.addf %213, %214 : vector<8x128xf32>
    %c0_96 = arith.constant 0 : index
    %c0_97 = arith.constant 0 : index
    %216 = vector.load %arg7[%c0_96, %c0_97] : memref<8x128xf32, #tpu.memory_space<vmem>>, vector<8x128xf32>
    tpu.vector_store %arg7[%c0_96, %c0_97], %215 {strides = array<i32>} : memref<8x128xf32, #tpu.memory_space<vmem>>, vector<8x128xf32>,
    %217 = math.tanh %215 : vector<8x128xf32>
    %218 = arith.mulf %211, %217 : vector<8x128xf32>
    %c0_98 = arith.constant 0 : index
    %c0_99 = arith.constant 0 : index
    %219 = vector.load %arg6[%c0_98, %c0_99] : memref<8x128xf32, #tpu.memory_space<vmem>>, vector<8x128xf32>
    tpu.vector_store %arg6[%c0_98, %c0_99], %218 {strides = array<i32>} : memref<8x128xf32, #tpu.memory_space<vmem>>, vector<8x128xf32>,
    %c6_i32 = arith.constant 6 : i32
    %c0_100 = arith.constant 0 : index
    %c0_101 = arith.constant 0 : index
    %220 = vector.load %arg6[%c0_100, %c0_101] : memref<8x128xf32, #tpu.memory_space<vmem>>, vector<8x128xf32>
    %221 = arith.truncf %220 : vector<8x128xf32> to vector<8x128xbf16>
    %c0_102 = arith.constant 0 : index
    %c0_103 = arith.constant 0 : index
    %222 = vector.load %arg2[%c0_102, %c0_103] : memref<128x512xbf16, #tpu.memory_space<vmem>>, vector<128x512xbf16>
    %cst_104 = arith.constant dense<0.000000e+00> : vector<8x512xf32>
    %223 = tpu.matmul %221, %222, %cst_104 {dimension_numbers = #tpu.dot_dimension_numbers<[1], [0], [0], [1], [0, 0, 1, 1], [], []>} : vector<8x128xbf16>, vector<128x512xbf16>, vector<8x512xf32> -> vector<8x512xf32>
    %224 = arith.index_cast %c6_i32 : i32 to index
    %c0_105 = arith.constant 0 : index
    %c0_106 = arith.constant 0 : index
    %225 = vector.load %arg1[%224, %c0_105, %c0_106] : memref<8x8x512xf32, #tpu.memory_space<vmem>>, vector<1x8x512xf32>
    %226 = vector.shape_cast %225 : vector<1x8x512xf32> to vector<8x512xf32>
    %227 = arith.addf %226, %223 : vector<8x512xf32>
    %228 = vector.extract_strided_slice %227 {offsets = [0, 0], sizes = [8, 128], strides = [1, 1]} : vector<8x512xf32> to vector<8x128xf32>
    %229 = arith.negf %228 : vector<8x128xf32>
    %230 = math.exp %229 : vector<8x128xf32>
    %cst_107 = arith.constant 1.000000e+00 : f32
    %231 = vector.broadcast %cst_107 : f32 to vector<8x128xf32>
    %232 = arith.addf %231, %230 : vector<8x128xf32>
    %233 = arith.divf %231, %232 : vector<8x128xf32>
    %234 = vector.extract_strided_slice %227 {offsets = [0, 128], sizes = [8, 128], strides = [1, 1]} : vector<8x512xf32> to vector<8x128xf32>
    %235 = arith.negf %234 : vector<8x128xf32>
    %236 = math.exp %235 : vector<8x128xf32>
    %cst_108 = arith.constant 1.000000e+00 : f32
    %237 = vector.broadcast %cst_108 : f32 to vector<8x128xf32>
    %238 = arith.addf %237, %236 : vector<8x128xf32>
    %239 = arith.divf %237, %238 : vector<8x128xf32>
    %240 = vector.extract_strided_slice %227 {offsets = [0, 256], sizes = [8, 128], strides = [1, 1]} : vector<8x512xf32> to vector<8x128xf32>
    %241 = math.tanh %240 : vector<8x128xf32>
    %242 = vector.extract_strided_slice %227 {offsets = [0, 384], sizes = [8, 128], strides = [1, 1]} : vector<8x512xf32> to vector<8x128xf32>
    %243 = arith.negf %242 : vector<8x128xf32>
    %244 = math.exp %243 : vector<8x128xf32>
    %cst_109 = arith.constant 1.000000e+00 : f32
    %245 = vector.broadcast %cst_109 : f32 to vector<8x128xf32>
    %246 = arith.addf %245, %244 : vector<8x128xf32>
    %247 = arith.divf %245, %246 : vector<8x128xf32>
    %c0_110 = arith.constant 0 : index
    %c0_111 = arith.constant 0 : index
    %248 = vector.load %arg7[%c0_110, %c0_111] : memref<8x128xf32, #tpu.memory_space<vmem>>, vector<8x128xf32>
    %249 = arith.mulf %239, %248 : vector<8x128xf32>
    %250 = arith.mulf %233, %241 : vector<8x128xf32>
    %251 = arith.addf %249, %250 : vector<8x128xf32>
    %c0_112 = arith.constant 0 : index
    %c0_113 = arith.constant 0 : index
    %252 = vector.load %arg7[%c0_112, %c0_113] : memref<8x128xf32, #tpu.memory_space<vmem>>, vector<8x128xf32>
    tpu.vector_store %arg7[%c0_112, %c0_113], %251 {strides = array<i32>} : memref<8x128xf32, #tpu.memory_space<vmem>>, vector<8x128xf32>,
    %253 = math.tanh %251 : vector<8x128xf32>
    %254 = arith.mulf %247, %253 : vector<8x128xf32>
    %c0_114 = arith.constant 0 : index
    %c0_115 = arith.constant 0 : index
    %255 = vector.load %arg6[%c0_114, %c0_115] : memref<8x128xf32, #tpu.memory_space<vmem>>, vector<8x128xf32>
    tpu.vector_store %arg6[%c0_114, %c0_115], %254 {strides = array<i32>} : memref<8x128xf32, #tpu.memory_space<vmem>>, vector<8x128xf32>,
    %c7_i32 = arith.constant 7 : i32
    %c0_116 = arith.constant 0 : index
    %c0_117 = arith.constant 0 : index
    %256 = vector.load %arg6[%c0_116, %c0_117] : memref<8x128xf32, #tpu.memory_space<vmem>>, vector<8x128xf32>
    %257 = arith.truncf %256 : vector<8x128xf32> to vector<8x128xbf16>
    %c0_118 = arith.constant 0 : index
    %c0_119 = arith.constant 0 : index
    %258 = vector.load %arg2[%c0_118, %c0_119] : memref<128x512xbf16, #tpu.memory_space<vmem>>, vector<128x512xbf16>
    %cst_120 = arith.constant dense<0.000000e+00> : vector<8x512xf32>
    %259 = tpu.matmul %257, %258, %cst_120 {dimension_numbers = #tpu.dot_dimension_numbers<[1], [0], [0], [1], [0, 0, 1, 1], [], []>} : vector<8x128xbf16>, vector<128x512xbf16>, vector<8x512xf32> -> vector<8x512xf32>
    %260 = arith.index_cast %c7_i32 : i32 to index
    %c0_121 = arith.constant 0 : index
    %c0_122 = arith.constant 0 : index
    %261 = vector.load %arg1[%260, %c0_121, %c0_122] : memref<8x8x512xf32, #tpu.memory_space<vmem>>, vector<1x8x512xf32>
    %262 = vector.shape_cast %261 : vector<1x8x512xf32> to vector<8x512xf32>
    %263 = arith.addf %262, %259 : vector<8x512xf32>
    %264 = vector.extract_strided_slice %263 {offsets = [0, 0], sizes = [8, 128], strides = [1, 1]} : vector<8x512xf32> to vector<8x128xf32>
    %265 = arith.negf %264 : vector<8x128xf32>
    %266 = math.exp %265 : vector<8x128xf32>
    %cst_123 = arith.constant 1.000000e+00 : f32
    %267 = vector.broadcast %cst_123 : f32 to vector<8x128xf32>
    %268 = arith.addf %267, %266 : vector<8x128xf32>
    %269 = arith.divf %267, %268 : vector<8x128xf32>
    %270 = vector.extract_strided_slice %263 {offsets = [0, 128], sizes = [8, 128], strides = [1, 1]} : vector<8x512xf32> to vector<8x128xf32>
    %271 = arith.negf %270 : vector<8x128xf32>
    %272 = math.exp %271 : vector<8x128xf32>
    %cst_124 = arith.constant 1.000000e+00 : f32
    %273 = vector.broadcast %cst_124 : f32 to vector<8x128xf32>
    %274 = arith.addf %273, %272 : vector<8x128xf32>
    %275 = arith.divf %273, %274 : vector<8x128xf32>
    %276 = vector.extract_strided_slice %263 {offsets = [0, 256], sizes = [8, 128], strides = [1, 1]} : vector<8x512xf32> to vector<8x128xf32>
    %277 = math.tanh %276 : vector<8x128xf32>
    %278 = vector.extract_strided_slice %263 {offsets = [0, 384], sizes = [8, 128], strides = [1, 1]} : vector<8x512xf32> to vector<8x128xf32>
    %279 = arith.negf %278 : vector<8x128xf32>
    %280 = math.exp %279 : vector<8x128xf32>
    %cst_125 = arith.constant 1.000000e+00 : f32
    %281 = vector.broadcast %cst_125 : f32 to vector<8x128xf32>
    %282 = arith.addf %281, %280 : vector<8x128xf32>
    %283 = arith.divf %281, %282 : vector<8x128xf32>
    %c0_126 = arith.constant 0 : index
    %c0_127 = arith.constant 0 : index
    %284 = vector.load %arg7[%c0_126, %c0_127] : memref<8x128xf32, #tpu.memory_space<vmem>>, vector<8x128xf32>
    %285 = arith.mulf %275, %284 : vector<8x128xf32>
    %286 = arith.mulf %269, %277 : vector<8x128xf32>
    %287 = arith.addf %285, %286 : vector<8x128xf32>
    %c0_128 = arith.constant 0 : index
    %c0_129 = arith.constant 0 : index
    %288 = vector.load %arg7[%c0_128, %c0_129] : memref<8x128xf32, #tpu.memory_space<vmem>>, vector<8x128xf32>
    tpu.vector_store %arg7[%c0_128, %c0_129], %287 {strides = array<i32>} : memref<8x128xf32, #tpu.memory_space<vmem>>, vector<8x128xf32>,
    %289 = math.tanh %287 : vector<8x128xf32>
    %290 = arith.mulf %283, %289 : vector<8x128xf32>
    %c0_130 = arith.constant 0 : index
    %c0_131 = arith.constant 0 : index
    %291 = vector.load %arg6[%c0_130, %c0_131] : memref<8x128xf32, #tpu.memory_space<vmem>>, vector<8x128xf32>
    tpu.vector_store %arg6[%c0_130, %c0_131], %290 {strides = array<i32>} : memref<8x128xf32, #tpu.memory_space<vmem>>, vector<8x128xf32>,
    %c8_i32 = arith.constant 8 : i32
    %c0_132 = arith.constant 0 : index
    %c0_133 = arith.constant 0 : index
    %292 = vector.load %arg6[%c0_132, %c0_133] : memref<8x128xf32, #tpu.memory_space<vmem>>, vector<8x128xf32>
    %c0_134 = arith.constant 0 : index
    %c0_135 = arith.constant 0 : index
    %293 = vector.load %arg3[%c0_134, %c0_135] : memref<1x128xf32, #tpu.memory_space<vmem>>, vector<1x128xf32>
    %294 = vector.broadcast %293 : vector<1x128xf32> to vector<8x128xf32>
    %295 = arith.mulf %292, %294 : vector<8x128xf32>
    %cst_136 = arith.constant dense<0.000000e+00> : vector<8xf32>
    %296 = vector.multi_reduction <add>, %295, %cst_136 [1] : vector<8x128xf32> to vector<8xf32>
    %297 = vector.shape_cast %296 : vector<8xf32> to vector<8x1xf32>
    %c0_137 = arith.constant 0 : index
    %c0_138 = arith.constant 0 : index
    %298 = vector.load %arg4[%c0_137, %c0_138] : memref<1x1xf32, #tpu.memory_space<vmem>>, vector<1x1xf32>
    %299 = vector.broadcast %298 : vector<1x1xf32> to vector<8x1xf32>
    %300 = arith.addf %297, %299 : vector<8x1xf32>
    %c0_139 = arith.constant 0 : index
    %c0_140 = arith.constant 0 : index
    %301 = vector.load %arg5[%c0_139, %c0_140] : memref<8x1xf32, #tpu.memory_space<vmem>>, vector<8x1xf32>
    tpu.vector_store %arg5[%c0_139, %c0_140], %300 {strides = array<i32>} : memref<8x1xf32, #tpu.memory_space<vmem>>, vector<8x1xf32>,
    return
  }
  func.func @transform_0(%arg0: i32) -> (i32, i32, i32) {
    %c0_i32 = arith.constant 0 : i32
    %c0_i32_0 = arith.constant 0 : i32
    %c0_i32_1 = arith.constant 0 : i32
    return %c0_i32, %arg0, %c0_i32_0 : i32, i32, i32
  }
  func.func @transform_1(%arg0: i32) -> (i32, i32) {
    %c0_i32 = arith.constant 0 : i32
    %c0_i32_0 = arith.constant 0 : i32
    %c0_i32_1 = arith.constant 0 : i32
    return %c0_i32, %c0_i32_0 : i32, i32
  }
  func.func @transform_2(%arg0: i32) -> (i32, i32) {
    %c0_i32 = arith.constant 0 : i32
    %c0_i32_0 = arith.constant 0 : i32
    %c0_i32_1 = arith.constant 0 : i32
    return %c0_i32, %c0_i32_0 : i32, i32
  }
  func.func @transform_3(%arg0: i32) -> (i32, i32) {
    %c0_i32 = arith.constant 0 : i32
    %c0_i32_0 = arith.constant 0 : i32
    %c0_i32_1 = arith.constant 0 : i32
    return %c0_i32, %c0_i32_0 : i32, i32
  }
  func.func @transform_4(%arg0: i32) -> (i32, i32) {
    %c0_i32 = arith.constant 0 : i32
    %c0_i32_0 = arith.constant 0 : i32
    return %arg0, %c0_i32 : i32, i32
  }
}

</mosaic_0001>

<bundles_post_ra>
// kernel: tpu_custom_call.1
= control target key start
LH: loop header
LB: loop body
LE: loop exit
PB: predicated region body
PF: predicated region fallthrough
CT: control target
= control target key end

     0   :  { %s4209_s0 = inlined_call_operand.hbm [shape: f32[8,8,512], index: 0, kind: input, shape index: {}]   ;;  %s4210_s1 = inlined_call_operand.hbm [shape: bf16[128,512], index: 1, kind: input, shape index: {}]   ;;  %s4211_s2 = inlined_call_operand.vmem [shape: f32[1,128], index: 2, kind: input, shape index: {}]   ;;  %s4212_s3 = inlined_call_operand.<no memory space> [shape: f32[1,1], index: 3, kind: input, shape index: {}]   ;;  %s4213_s4 = inlined_call_operand.vmem [shape: f32[8,1], index: 4, kind: output, shape index: {}]  }
   0x1   :  { %v9_v0 = vstv %s4212_s3 }
   0x2   :  { %10 = vst [vmem:[#allocation4] sm:$0x1] %v9_v0 }
   0x3   :  { %11 = vsyncpa [#allocation6], 0  ;;  %s17_s19 = sshll.u32 %s4209_s0, 4  ;;  %s18_s19 = int_to_ptr.hbm [resolvable:$true] %s17_s19 }
   0x4   :  { %12 = vsyncpa [#allocation8], 0  ;;  %s4134_s20 = smov [#allocation5]   ;;  %s30_s24 = sshll.u32 %s4210_s1, 4  ;;  %s31_s24 = int_to_ptr.hbm [resolvable:$true] %s30_s24 }
   0x5   :  { %s19_s21 = sshll.u32 %s4134_s20, 4  ;;  %s4135_s25 = smov 512   ;;  %s20_s21 = int_to_ptr.vmem [resolvable:$true] %s19_s21 }
   0x6   :  { %s4136_s26 = smov 32   ;;  %s4137_s3 = smov [#allocation7]  }
   0x7   :  { %25 = dma.hbm_to_vmem [thread:$0]  %s18_s19, 4096, %s20_s21, [#allocation6], %s4135_s25, %s4135_s25, %s4136_s26  }
   0x8   :  { %s32_s27 = sshll.u32 %s4137_s3, 4  ;;  %s4138_s28 = smov 256   ;;  %s33_s27 = int_to_ptr.vmem [resolvable:$true] %s32_s27 }
   0x9   :  { %s4139_s29 = smov 16  }
   0xa   :  { %38 = dma.hbm_to_vmem [thread:$0]  %s31_s24, 4096, %s33_s27, [#allocation8], %s4138_s28, %s4138_s28, %s4139_s29  }
   0xb   :  { %4130 = dma.done.wait [#allocation6], 4096  }
   0xc   :  { %4131 = vsyncadd [#allocation6], 4294963200 }
   0xd   :  { %4132 = dma.done.wait [#allocation8], 4096  }
   0xe   :  { %4133 = vsyncadd [#allocation8], 4294963200  ;;  %v2755_v1 = vld [vmem:[#allocation7 + $0xe0] sm:$0xf]  ;;  %v3719_v2 = vld [vmem:[#allocation7 + $0xec] sm:$0xf0] }
   0xf   :  { %v3717_v3 = vld [vmem:[#allocation7 + $0xe4] sm:$0xf]  ;;  %v2756_v4 = vor.u32 %v3719_v2, %v2755_v1  ;;  %v2757_v5 = vld [vmem:[#allocation7 + $0xf0] sm:$0xf0]  ;;  %v3718_v6 = vld [vmem:[#allocation7 + $0xec] sm:$0xf] }
  0x10   :  { %v2765_v7 = vld [vmem:[#allocation7 + $0xf8] sm:$0xf0]  ;;  %v2760_v8 = vor.u32 %v3717_v3, %v2757_v5  ;;  %v2739_v10 = vld [vmem:[#allocation7 + $0xc0] sm:$0xf]  ;;  %v3715_v11 = vld [vmem:[#allocation7 + $0xcc] sm:$0xf0] }
  0x11   :  { %v2768_v9 = vor.u32 %v3718_v6, %v2765_v7  ;;  %v3713_v12 = vld [vmem:[#allocation7 + $0xc4] sm:$0xf]  ;;  %247 = vmatpush.bf16.msra.mxu0 %v2756_v4  ;;  %v2740_v13 = vor.u32 %v3715_v11, %v2739_v10  ;;  %v2741_v14 = vld [vmem:[#allocation7 + $0xd0] sm:$0xf0]  ;;  %v3714_v15 = vld [vmem:[#allocation7 + $0xcc] sm:$0xf] }
  0x12   :  { %v2749_v16 = vld [vmem:[#allocation7 + $0xd8] sm:$0xf0]  ;;  %260 = vmatpush.bf16.msra.mxu1 %v2760_v8  ;;  %v2744_v17 = vor.u32 %v3713_v12, %v2741_v14  ;;  %v2763_v19 = vld [vmem:[#allocation7 + $0xe8] sm:$0xf]  ;;  %v3720_v20 = vld [vmem:[#allocation7 + $0xf4] sm:$0xf0] }
  0x13   :  { %286 = vmatpush.bf16.msra.mxu3 %v2768_v9  ;;  %v2752_v18 = vor.u32 %v3714_v15, %v2749_v16  ;;  %v2723_v21 = vld [vmem:[#allocation7 + $0xa0] sm:$0xf]  ;;  %v2764_v22 = vor.u32 %v3720_v20, %v2763_v19  ;;  %v3711_v23 = vld [vmem:[#allocation7 + $0xac] sm:$0xf0]  ;;  %v3709_v24 = vld [vmem:[#allocation7 + $0xa4] sm:$0xf] }
  0x14   :  { %v2725_v25 = vld [vmem:[#allocation7 + $0xb0] sm:$0xf0]  ;;  %v3710_v26 = vld [vmem:[#allocation7 + $0xac] sm:$0xf]  ;;  %v2733_v27 = vld [vmem:[#allocation7 + $0xb8] sm:$0xf0]  ;;  %v2724_v29 = vor.u32 %v3711_v23, %v2723_v21 }
  0x15   :  { %v2747_v28 = vld [vmem:[#allocation7 + $0xc8] sm:$0xf]  ;;  %248 = vmatpush.bf16.msra.mxu0 %v2740_v13  ;;  %273 = vmatpush.bf16.msra.mxu2 %v2764_v22  ;;  %v3716_v30 = vld [vmem:[#allocation7 + $0xd4] sm:$0xf0]  ;;  %v2707_v31 = vld [vmem:[#allocation7 + $0x80] sm:$0xf]  ;;  %v2728_v33 = vor.u32 %v3709_v24, %v2725_v25  ;;  %v2736_v34 = vor.u32 %v3710_v26, %v2733_v27 }
  0x16   :  { %v3707_v32 = vld [vmem:[#allocation7 + $0x8c] sm:$0xf0]  ;;  %261 = vmatpush.bf16.msra.mxu1 %v2744_v17  ;;  %v2748_v35 = vor.u32 %v3716_v30, %v2747_v28  ;;  %v3705_v36 = vld [vmem:[#allocation7 + $0x84] sm:$0xf]  ;;  %v2709_v37 = vld [vmem:[#allocation7 + $0x90] sm:$0xf0] }
  0x17   :  { %287 = vmatpush.bf16.msra.mxu3 %v2752_v18  ;;  %v3706_v38 = vld [vmem:[#allocation7 + $0x8c] sm:$0xf]  ;;  %v2717_v39 = vld [vmem:[#allocation7 + $0x98] sm:$0xf0]  ;;  %v2731_v40 = vld [vmem:[#allocation7 + $0xa8] sm:$0xf]  ;;  %v2708_v42 = vor.u32 %v3707_v32, %v2707_v31  ;;  %v2712_v46 = vor.u32 %v3705_v36, %v2709_v37 }
  0x18   :  { %v3712_v41 = vld [vmem:[#allocation7 + $0xb4] sm:$0xf0]  ;;  %v2691_v44 = vld [vmem:[#allocation7 + $0x60] sm:$0xf]  ;;  %v3703_v45 = vld [vmem:[#allocation7 + $0x6c] sm:$0xf0]  ;;  %v2720_v47 = vor.u32 %v3706_v38, %v2717_v39 }
  0x19   :  { %249 = vmatpush.bf16.msra.mxu0 %v2724_v29  ;;  %274 = vmatpush.bf16.msra.mxu2 %v2748_v35  ;;  %v2732_v43 = vor.u32 %v3712_v41, %v2731_v40  ;;  %v3701_v48 = vld [vmem:[#allocation7 + $0x64] sm:$0xf]  ;;  %v2715_v49 = vld [vmem:[#allocation7 + $0x88] sm:$0xf]  ;;  %v3708_v50 = vld [vmem:[#allocation7 + $0x94] sm:$0xf0]  ;;  %v2692_v54 = vor.u32 %v3703_v45, %v2691_v44 }
  0x1a   :  { %262 = vmatpush.bf16.msra.mxu1 %v2728_v33  ;;  %v2693_v51 = vld [vmem:[#allocation7 + $0x70] sm:$0xf0]  ;;  %v3702_v52 = vld [vmem:[#allocation7 + $0x6c] sm:$0xf]  ;;  %v2701_v53 = vld [vmem:[#allocation7 + $0x78] sm:$0xf0]  ;;  %v2716_v55 = vor.u32 %v3708_v50, %v2715_v49 }
  0x1b   :  { %288 = vmatpush.bf16.msra.mxu3 %v2736_v34  ;;  %v2675_v56 = vld [vmem:[#allocation7 + $0x40] sm:$0xf]  ;;  %v3699_v57 = vld [vmem:[#allocation7 + $0x4c] sm:$0xf0]  ;;  %v2696_v58 = vor.u32 %v3701_v48, %v2693_v51  ;;  %v2704_v59 = vor.u32 %v3702_v52, %v2701_v53  ;;  %v3697_v60 = vld [vmem:[#allocation7 + $0x44] sm:$0xf] }
  0x1c   :  { %v2699_v61 = vld [vmem:[#allocation7 + $0x68] sm:$0xf]  ;;  %v3704_v62 = vld [vmem:[#allocation7 + $0x74] sm:$0xf0]  ;;  %v2677_v63 = vld [vmem:[#allocation7 + $0x50] sm:$0xf0]  ;;  %v2676_v2 = vor.u32 %v3699_v57, %v2675_v56 }
  0x1d   :  { %250 = vmatpush.bf16.msra.mxu0 %v2708_v42  ;;  %275 = vmatpush.bf16.msra.mxu2 %v2732_v43  ;;  %v3698_v0 = vld [vmem:[#allocation7 + $0x4c] sm:$0xf]  ;;  %v2685_v1 = vld [vmem:[#allocation7 + $0x58] sm:$0xf0]  ;;  %v2700_v3 = vor.u32 %v3704_v62, %v2699_v61  ;;  %v2659_v4 = vld [vmem:[#allocation7 + $0x20] sm:$0xf]  ;;  %v2680_v7 = vor.u32 %v3697_v60, %v2677_v63 }
  0x1e   :  { %263 = vmatpush.bf16.msra.mxu1 %v2712_v46  ;;  %v3695_v5 = vld [vmem:[#allocation7 + $0x2c] sm:$0xf0]  ;;  %v3693_v6 = vld [vmem:[#allocation7 + $0x24] sm:$0xf]  ;;  %v2688_v8 = vor.u32 %v3698_v0, %v2685_v1  ;;  %v2661_v9 = vld [vmem:[#allocation7 + $0x30] sm:$0xf0] }
  0x1f   :  { %289 = vmatpush.bf16.msra.mxu3 %v2720_v47  ;;  %v2683_v10 = vld [vmem:[#allocation7 + $0x48] sm:$0xf]  ;;  %v3700_v11 = vld [vmem:[#allocation7 + $0x54] sm:$0xf0]  ;;  %v3694_v12 = vld [vmem:[#allocation7 + $0x2c] sm:$0xf]  ;;  %v2660_v14 = vor.u32 %v3695_v5, %v2659_v4  ;;  %v2664_v18 = vor.u32 %v3693_v6, %v2661_v9 }
  0x20   :  { %v2669_v13 = vld [vmem:[#allocation7 + $0x38] sm:$0xf0]  ;;  %v2684_v15 = vor.u32 %v3700_v11, %v2683_v10  ;;  %v2643_v16 = vld [vmem:[#allocation7] sm:$0xf]  ;;  %v3691_v17 = vld [vmem:[#allocation7 + $0xc] sm:$0xf0] }
  0x21   :  { %251 = vmatpush.bf16.msra.mxu0 %v2692_v54  ;;  %276 = vmatpush.bf16.msra.mxu2 %v2716_v55  ;;  %v2672_v19 = vor.u32 %v3694_v12, %v2669_v13  ;;  %v3689_v20 = vld [vmem:[#allocation7 + $0x4] sm:$0xf]  ;;  %v2667_v21 = vld [vmem:[#allocation7 + $0x28] sm:$0xf]  ;;  %v3696_v22 = vld [vmem:[#allocation7 + $0x34] sm:$0xf0]  ;;  %v2644_v26 = vor.u32 %v3691_v17, %v2643_v16 }
  0x22   :  { %264 = vmatpush.bf16.msra.mxu1 %v2696_v58  ;;  %v2645_v23 = vld [vmem:[#allocation7 + $0x10] sm:$0xf0]  ;;  %v3690_v24 = vld [vmem:[#allocation7 + $0xc] sm:$0xf]  ;;  %v2653_v25 = vld [vmem:[#allocation7 + $0x18] sm:$0xf0]  ;;  %v2668_v27 = vor.u32 %v3696_v22, %v2667_v21 }
  0x23   :  { %290 = vmatpush.bf16.msra.mxu3 %v2704_v59  ;;  %v2648_v28 = vor.u32 %v3689_v20, %v2645_v23  ;;  %v2656_v29 = vor.u32 %v3690_v24, %v2653_v25  ;;  %v2651_v30 = vld [vmem:[#allocation7 + $0x8] sm:$0xf]  ;;  %v3692_v31 = vld [vmem:[#allocation7 + $0x14] sm:$0xf0]  ;;  %v4140_v33 = vmov 0.0|0.0   ;;  %v299_v17 = vld [vmem:[#allocation5] sm:$0xff] }
  0x24   :  { %v2652_v32 = vor.u32 %v3692_v31, %v2651_v30  ;;  %v2886_v34 = vld [vmem:[#allocation7 + $0xe0] sm:$0xf]  ;;  %v3751_v35 = vld [vmem:[#allocation7 + $0xec] sm:$0xf0]  ;;  %v3749_v36 = vld [vmem:[#allocation7 + $0xe4] sm:$0xf] }
  0x25   :  { %252 = vmatpush.bf16.msra.mxu0 %v2676_v2  ;;  %277 = vmatpush.bf16.msra.mxu2 %v2700_v3  ;;  %v2887_v37 = vor.u32 %v3751_v35, %v2886_v34  ;;  %v2888_v38 = vld [vmem:[#allocation7 + $0xf0] sm:$0xf0]  ;;  %v2894_v39 = vld [vmem:[#allocation7 + $0xe8] sm:$0xf]  ;;  %v3752_v40 = vld [vmem:[#allocation7 + $0xf4] sm:$0xf0] }
  0x26   :  { %265 = vmatpush.bf16.msra.mxu1 %v2680_v7  ;;  %v2891_v41 = vor.u32 %v3749_v36, %v2888_v38  ;;  %v2895_v42 = vor.u32 %v3752_v40, %v2894_v39  ;;  %v3750_v43 = vld [vmem:[#allocation7 + $0xec] sm:$0xf]  ;;  %v2896_v44 = vld [vmem:[#allocation7 + $0xf8] sm:$0xf0]  ;;  %v2870_v46 = vld [vmem:[#allocation7 + $0xc0] sm:$0xf] }
  0x27   :  { %291 = vmatpush.bf16.msra.mxu3 %v2688_v8  ;;  %v2899_v45 = vor.u32 %v3750_v43, %v2896_v44  ;;  %v3747_v47 = vld [vmem:[#allocation7 + $0xcc] sm:$0xf0]  ;;  %v3745_v48 = vld [vmem:[#allocation7 + $0xc4] sm:$0xf]  ;;  %v2872_v50 = vld [vmem:[#allocation7 + $0xd0] sm:$0xf0] }
  0x28   :  { %v2871_v49 = vor.u32 %v3747_v47, %v2870_v46  ;;  %v2878_v51 = vld [vmem:[#allocation7 + $0xc8] sm:$0xf]  ;;  %v3748_v52 = vld [vmem:[#allocation7 + $0xd4] sm:$0xf0]  ;;  %v2875_v53 = vor.u32 %v3745_v48, %v2872_v50  ;;  %v3746_v55 = vld [vmem:[#allocation7 + $0xcc] sm:$0xf] }
  0x29   :  { %253 = vmatpush.bf16.msra.mxu0 %v2660_v14  ;;  %278 = vmatpush.bf16.msra.mxu2 %v2684_v15  ;;  %v2879_v54 = vor.u32 %v3748_v52, %v2878_v51  ;;  %v2880_v56 = vld [vmem:[#allocation7 + $0xd8] sm:$0xf0]  ;;  %v2854_v58 = vld [vmem:[#allocation7 + $0xa0] sm:$0xf]  ;;  %v3743_v59 = vld [vmem:[#allocation7 + $0xac] sm:$0xf0] }
  0x2a   :  { %266 = vmatpush.bf16.msra.mxu1 %v2664_v18  ;;  %v2883_v57 = vor.u32 %v3746_v55, %v2880_v56  ;;  %v3741_v60 = vld [vmem:[#allocation7 + $0xa4] sm:$0xf]  ;;  %v2855_v61 = vor.u32 %v3743_v59, %v2854_v58  ;;  %v2856_v62 = vld [vmem:[#allocation7 + $0xb0] sm:$0xf0]  ;;  %v2862_v63 = vld [vmem:[#allocation7 + $0xa8] sm:$0xf] }
  0x2b   :  { %292 = vmatpush.bf16.msra.mxu3 %v2672_v19  ;;  %v2859_v0 = vor.u32 %v3741_v60, %v2856_v62  ;;  %v3744_v1 = vld [vmem:[#allocation7 + $0xb4] sm:$0xf0]  ;;  %v3742_v2 = vld [vmem:[#allocation7 + $0xac] sm:$0xf]  ;;  %v2864_v3 = vld [vmem:[#allocation7 + $0xb8] sm:$0xf0] }
  0x2c   :  { %v2863_v4 = vor.u32 %v3744_v1, %v2862_v63  ;;  %v2867_v5 = vor.u32 %v3742_v2, %v2864_v3  ;;  %v2838_v6 = vld [vmem:[#allocation7 + $0x80] sm:$0xf]  ;;  %v3739_v7 = vld [vmem:[#allocation7 + $0x8c] sm:$0xf0]  ;;  %v3737_v8 = vld [vmem:[#allocation7 + $0x84] sm:$0xf] }
  0x2d   :  { %254 = vmatpush.bf16.msra.mxu0 %v2644_v26  ;;  %279 = vmatpush.bf16.msra.mxu2 %v2668_v27  ;;  %v2839_v9 = vor.u32 %v3739_v7, %v2838_v6  ;;  %v2840_v10 = vld [vmem:[#allocation7 + $0x90] sm:$0xf0]  ;;  %v2846_v11 = vld [vmem:[#allocation7 + $0x88] sm:$0xf]  ;;  %v3740_v12 = vld [vmem:[#allocation7 + $0x94] sm:$0xf0] }
  0x2e   :  { %267 = vmatpush.bf16.msra.mxu1 %v2648_v28  ;;  %v2843_v13 = vor.u32 %v3737_v8, %v2840_v10  ;;  %v2847_v14 = vor.u32 %v3740_v12, %v2846_v11  ;;  %v3738_v15 = vld [vmem:[#allocation7 + $0x8c] sm:$0xf]  ;;  %v2848_v16 = vld [vmem:[#allocation7 + $0x98] sm:$0xf0]  ;;  %v2822_v19 = vld [vmem:[#allocation7 + $0x60] sm:$0xf] }
  0x2f   :  { %293 = vmatpush.bf16.msra.mxu3 %v2656_v29  ;;  %v2851_v18 = vor.u32 %v3738_v15, %v2848_v16  ;;  %v3735_v20 = vld [vmem:[#allocation7 + $0x6c] sm:$0xf0]  ;;  %v3733_v21 = vld [vmem:[#allocation7 + $0x64] sm:$0xf]  ;;  %v2824_v23 = vld [vmem:[#allocation7 + $0x70] sm:$0xf0] }
  0x30   :  { %255 = vmatmul.bf16.vlgmr.msra.gmra.mxu0 %v4140_v33  ;;  %v2823_v22 = vor.u32 %v3735_v20, %v2822_v19  ;;  %v2830_v24 = vld [vmem:[#allocation7 + $0x68] sm:$0xf]  ;;  %v3736_v25 = vld [vmem:[#allocation7 + $0x74] sm:$0xf0]  ;;  %v2827_v27 = vor.u32 %v3733_v21, %v2824_v23  ;;  %v3734_v29 = vld [vmem:[#allocation7 + $0x6c] sm:$0xf] }
  0x31   :  { %268 = vmatmul.bf16.vlgmr.msra.gmra.mxu1 %v4140_v33  ;;  %280 = vmatpush.bf16.msra.mxu2 %v2652_v32  ;;  %v300_v26 = vld [vmem:[#allocation5 + $0x8] sm:$0xff]  ;;  %v2831_v28 = vor.u32 %v3736_v25, %v2830_v24  ;;  %v2832_v30 = vld [vmem:[#allocation7 + $0x78] sm:$0xf0]  ;;  %v2806_v35 = vld [vmem:[#allocation7 + $0x40] sm:$0xf] }
  0x32   :  { %294 = vmatmul.bf16.vlgmr.msra.gmra.mxu3 %v4140_v33  ;;  %567 = vmatpush.bf16.msrb.mxu0 %v2887_v37  ;;  %v2835_v32 = vor.u32 %v3734_v29, %v2832_v30  ;;  %v3731_v36 = vld [vmem:[#allocation7 + $0x4c] sm:$0xf0]  ;;  %v3729_v37 = vld [vmem:[#allocation7 + $0x44] sm:$0xf]  ;;  %v2808_v40 = vld [vmem:[#allocation7 + $0x50] sm:$0xf0] }
  0x33   :  { %580 = vmatpush.bf16.msrb.mxu1 %v2891_v41  ;;  %606 = vmatpush.bf16.msrb.mxu3 %v2899_v45  ;;  %v2807_v39 = vor.u32 %v3731_v36, %v2806_v35  ;;  %v2814_v41 = vld [vmem:[#allocation7 + $0x48] sm:$0xf]  ;;  %v302_v44 = vld [vmem:[#allocation5 + $0x18] sm:$0xff]  ;;  %v2811_v45 = vor.u32 %v3729_v37, %v2808_v40  ;;  %v3730_v47 = vld [vmem:[#allocation7 + $0x4c] sm:$0xf] }
  0x34   :  { %281 = vmatmul.bf16.vlgmr.msra.gmra.mxu2 %v4140_v33  ;;  %v2816_v48 = vld [vmem:[#allocation7 + $0x58] sm:$0xf0]  ;;  %v2790_v51 = vld [vmem:[#allocation7 + $0x20] sm:$0xf]  ;;  %v3727_v52 = vld [vmem:[#allocation7 + $0x2c] sm:$0xf0] }
  0x35   :  { %593 = vmatpush.bf16.msrb.mxu2 %v2895_v42  ;;  %v3732_v42 = vld [vmem:[#allocation7 + $0x54] sm:$0xf0]  ;;  %v2819_v50 = vor.u32 %v3730_v47, %v2816_v48  ;;  %v2792_v55 = vld [vmem:[#allocation7 + $0x30] sm:$0xf0]  ;;  %v2798_v56 = vld [vmem:[#allocation7 + $0x28] sm:$0xf] }
  0x36   :  { %568 = vmatpush.bf16.msrb.mxu0 %v2871_v49  ;;  %v2815_v46 = vor.u32 %v3732_v42, %v2814_v41  ;;  %v3728_v58 = vld [vmem:[#allocation7 + $0x34] sm:$0xf0]  ;;  %v3726_v59 = vld [vmem:[#allocation7 + $0x2c] sm:$0xf]  ;;  %v2800_v60 = vld [vmem:[#allocation7 + $0x38] sm:$0xf0] }
  0x37   :  { %581 = vmatpush.bf16.msrb.mxu1 %v2875_v53  ;;  %607 = vmatpush.bf16.msrb.mxu3 %v2883_v57  ;;  %v2791_v53 = vor.u32 %v3727_v52, %v2790_v51  ;;  %v2799_v62 = vor.u32 %v3728_v58, %v2798_v56  ;;  %v2803_v63 = vor.u32 %v3726_v59, %v2800_v60  ;;  %v3723_v1 = vld [vmem:[#allocation7 + $0xc] sm:$0xf0]  ;;  %v3721_v2 = vld [vmem:[#allocation7 + $0x4] sm:$0xf]  ;;  %v2776_v6 = vld [vmem:[#allocation7 + $0x10] sm:$0xf0] }
  0x38   :  { %v2782_v7 = vld [vmem:[#allocation7 + $0x8] sm:$0xf]  ;;  %v3724_v8 = vld [vmem:[#allocation7 + $0x14] sm:$0xf0]  ;;  %v2779_v10 = vor.u32 %v3721_v2, %v2776_v6  ;;  %v3722_v11 = vld [vmem:[#allocation7 + $0xc] sm:$0xf] }
  0x39   :  { %594 = vmatpush.bf16.msrb.mxu2 %v2879_v54  ;;  %v3725_v54 = vld [vmem:[#allocation7 + $0x24] sm:$0xf]  ;;  %v2784_v12 = vld [vmem:[#allocation7 + $0x18] sm:$0xf0]  ;;  %v301_v21 = vld [vmem:[#allocation5 + $0x10] sm:$0xff] }
  0x3a   :  { %569 = vmatpush.bf16.msrb.mxu0 %v2855_v61  ;;  %v2795_v57 = vor.u32 %v3725_v54, %v2792_v55  ;;  %v2787_v15 = vor.u32 %v3722_v11, %v2784_v12  ;;  %v3781_v2 = vld [vmem:[#allocation7 + $0xe4] sm:$0xf]  ;;  %v3784_v6 = vld [vmem:[#allocation7 + $0xf4] sm:$0xf0]  ;;  %v3001_v12 = vld [vmem:[#allocation7 + $0xc0] sm:$0xf] }
  0x3b   :  { %582 = vmatpush.bf16.msrb.mxu1 %v2859_v0  ;;  %608 = vmatpush.bf16.msrb.mxu3 %v2867_v5  ;;  %v2774_v0 = vld [vmem:[#allocation7] sm:$0xf] }
  0x3c   :  { %v2775_v5 = vor.u32 %v3723_v1, %v2774_v0  ;;  %v3017_v0 = vld [vmem:[#allocation7 + $0xe0] sm:$0xf]  ;;  %v3783_v1 = vld [vmem:[#allocation7 + $0xec] sm:$0xf0] }
  0x3d   :  { %595 = vmatpush.bf16.msrb.mxu2 %v2863_v4 }
  0x3e   :  { %570 = vmatpush.bf16.msrb.mxu0 %v2839_v9 }
  0x3f   :  { %583 = vmatpush.bf16.msrb.mxu1 %v2843_v13  ;;  %609 = vmatpush.bf16.msrb.mxu3 %v2851_v18 }
  0x41   :  { %596 = vmatpush.bf16.msrb.mxu2 %v2847_v14  ;;  %v2783_v14 = vor.u32 %v3724_v8, %v2782_v7 }
  0x42   :  { %571 = vmatpush.bf16.msrb.mxu0 %v2823_v22 }
  0x43   :  { %584 = vmatpush.bf16.msrb.mxu1 %v2827_v27  ;;  %610 = vmatpush.bf16.msrb.mxu3 %v2835_v32 }
  0x45   :  { %597 = vmatpush.bf16.msrb.mxu2 %v2831_v28 }
  0x46   :  { %572 = vmatpush.bf16.msrb.mxu0 %v2807_v39 }
  0x47   :  { %585 = vmatpush.bf16.msrb.mxu1 %v2811_v45  ;;  %611 = vmatpush.bf16.msrb.mxu3 %v2819_v50 }
  0x49   :  { %598 = vmatpush.bf16.msrb.mxu2 %v2815_v46 }
  0x4a   :  { %573 = vmatpush.bf16.msrb.mxu0 %v2791_v53 }
  0x4b   :  { %586 = vmatpush.bf16.msrb.mxu1 %v2795_v57  ;;  %612 = vmatpush.bf16.msrb.mxu3 %v2803_v63 }
  0x4d   :  { %599 = vmatpush.bf16.msrb.mxu2 %v2799_v62 }
  0x4e   :  { %574 = vmatpush.bf16.msrb.mxu0 %v2775_v5  ;;  %v3025_v5 = vld [vmem:[#allocation7 + $0xe8] sm:$0xf] }
  0x4f   :  { %587 = vmatpush.bf16.msrb.mxu1 %v2779_v10  ;;  %613 = vmatpush.bf16.msrb.mxu3 %v2787_v15  ;;  %v3026_v8 = vor.u32 %v3784_v6, %v3025_v5  ;;  %v3027_v10 = vld [vmem:[#allocation7 + $0xf8] sm:$0xf0]  ;;  %v3761_v5 = vld [vmem:[#allocation7 + $0x44] sm:$0xf] }
  0x51   :  { %600 = vmatpush.bf16.msrb.mxu2 %v2783_v14  ;;  %v3777_v14 = vld [vmem:[#allocation7 + $0xc4] sm:$0xf] }
  0x55   :  { %914 = vmatpush.bf16.msra.mxu2 %v3026_v8  ;;  %v2945_v8 = vld [vmem:[#allocation7 + $0x48] sm:$0xf] }
  0xad   :  { %v256_v31 = vpop.f32.mrf.mxu0 }
  0xae   :  { %v303_v33 = vadd.f32 %v299_v17, %v256_v31  ;;  %v269_v34 = vpop.f32.mrf.mxu1 }
  0xaf   :  { %v304_v38 = vadd.f32 %v300_v26, %v269_v34 }
  0xb0   :  { %v2769_v43 = vmul.f32 -1.442695, %v303_v33 }
  0xb1   :  { %v2770_v49 = vmul.f32 -1.442695, %v304_v38 }
  0xb2   :  { %3954 = vpow2.f32 %v2769_v43 }
  0xb3   :  { %3956 = vpow2.f32 %v2770_v49 }
  0xb5   :  { %v295_v61 = vpop.f32.mrf.mxu3  ;;  %v258_v4 = vpop.f32.mrf.mxu0 }
  0xb6   :  { %v306_v3 = vadd.f32 %v302_v44, %v295_v61  ;;  %v271_v9 = vpop.f32.mrf.mxu1  ;;  %v3019_v4 = vld [vmem:[#allocation7 + $0xf0] sm:$0xf0] }
  0xb7   :  { %v282_v17 = vpop.f32.mrf.mxu2  ;;  %v3022_v7 = vor.u32 %v3781_v2, %v3019_v4  ;;  %v3782_v9 = vld [vmem:[#allocation7 + $0xec] sm:$0xf]  ;;  %v3763_v4 = vld [vmem:[#allocation7 + $0x4c] sm:$0xf0] }
  0xb8   :  { %v2771_v13 = vmul.f32 -1.442695, %v306_v3  ;;  %v3955_v16 = vpop.eup %3954  ;;  %v305_v24 = vadd.f32 %v301_v21, %v282_v17  ;;  %v3018_v3 = vor.u32 %v3783_v1, %v3017_v0  ;;  %v3030_v11 = vor.u32 %v3782_v9, %v3027_v10  ;;  %v3009_v17 = vld [vmem:[#allocation7 + $0xc8] sm:$0xf]  ;;  %v3778_v21 = vld [vmem:[#allocation7 + $0xcc] sm:$0xf] }
  0xb9   :  { %v3957_v18 = vpop.eup %3956  ;;  %v310_v19 = vadd.f32 1.0, %v3955_v16  ;;  %901 = vmatpush.bf16.msra.mxu1 %v3022_v7  ;;  %v3003_v16 = vld [vmem:[#allocation7 + $0xd0] sm:$0xf0]  ;;  %v3764_v9 = vld [vmem:[#allocation7 + $0x54] sm:$0xf0] }
  0xba   :  { %3958 = vpow2.f32 %v2771_v13  ;;  %v329_v20 = vadd.f32 1.0, %v3957_v18  ;;  %888 = vmatpush.bf16.msra.mxu0 %v3018_v3  ;;  %v3779_v13 = vld [vmem:[#allocation7 + $0xcc] sm:$0xf0]  ;;  %927 = vmatpush.bf16.msra.mxu3 %v3030_v11  ;;  %v3780_v18 = vld [vmem:[#allocation7 + $0xd4] sm:$0xf0] }
  0xbb   :  { %3960 = vrcp.f32 %v310_v19  ;;  %v322_v33 = vand.u32 2147483648, %v310_v19  ;;  %v320_v36 = vand.u32 2147483647, %v310_v19  ;;  %vm316_vm2 = vweird.f32 %v310_v19  ;;  %v2937_v3 = vld [vmem:[#allocation7 + $0x40] sm:$0xf] }
  0xbc   :  { %3962 = vrcp.f32 %v329_v20  ;;  %v341_v34 = vand.u32 2147483648, %v329_v20  ;;  %v339_v38 = vand.u32 2147483647, %v329_v20  ;;  %vm335_vm3 = vweird.f32 %v329_v20  ;;  %v2939_v7 = vld [vmem:[#allocation7 + $0x50] sm:$0xf0] }
  0xbd   :  { %v297_v22 = vpop.f32.mrf.mxu3  ;;  %v323_v43 = vor.u32 1.1754944e-38, %v322_v33  ;;  %vm321_vm5 = vcmp.eq.f32.partialorder %v320_v36, 8.507059e+37  ;;  %v3002_v15 = vor.u32 %v3779_v13, %v3001_v12  ;;  %v3774_v33 = vld [vmem:[#allocation7 + $0xac] sm:$0xf]  ;;  %v2969_v36 = vld [vmem:[#allocation7 + $0x80] sm:$0xf]  ;;  %v2938_v6 = vor.u32 %v3763_v4, %v2937_v3 }
  0xbe   :  { %v342_v45 = vor.u32 1.1754944e-38, %v341_v34  ;;  %vm340_vm7 = vcmp.eq.f32.partialorder %v339_v38, 8.507059e+37  ;;  %v3011_v22 = vld [vmem:[#allocation7 + $0xd8] sm:$0xf0]  ;;  %v3769_v38 = vld [vmem:[#allocation7 + $0x84] sm:$0xf]  ;;  %v2942_v13 = vor.u32 %v3761_v5, %v2939_v7 }
  0xbf   :  { %v284_v26 = vpop.f32.mrf.mxu2  ;;  %889 = vmatpush.bf16.msra.mxu0 %v3002_v15  ;;  %v2995_v34 = vld [vmem:[#allocation7 + $0xb8] sm:$0xf0]  ;;  %v3762_v15 = vld [vmem:[#allocation7 + $0x4c] sm:$0xf] }
  0xc0   :  { %v3959_v23 = vpop.eup %3958  ;;  %v3773_v26 = vld [vmem:[#allocation7 + $0xa4] sm:$0xf]  ;;  %v623_v12 = vld [vmem:[#allocation5 + $0x38] sm:$0xff] }
  0xc1   :  { %v349_v25 = vadd.f32 1.0, %v3959_v23  ;;  %v3961_v27 = vpop.eup %3960  ;;  %v3014_v23 = vor.u32 %v3778_v21, %v3011_v22  ;;  %v3757_v21 = vld [vmem:[#allocation7 + $0x24] sm:$0xf]  ;;  %v2923_v22 = vld [vmem:[#allocation7 + $0x30] sm:$0xf0] }
  0xc2   :  { %v3963_v28 = vpop.eup %3962  ;;  %v312_v29 = vmul.f32 %v3961_v27, %v310_v19  ;;  %vm317_vm0 = vweird.f32 %v3961_v27  ;;  %v3006_v19 = vor.u32 %v3777_v14, %v3003_v16  ;;  %v2946_v14 = vor.u32 %v3764_v9, %v2945_v8  ;;  %v2947_v16 = vld [vmem:[#allocation7 + $0x58] sm:$0xf0] }
  0xc3   :  { %3964 = vrcp.f32 %v349_v25  ;;  %v331_v30 = vmul.f32 %v3963_v28, %v329_v20  ;;  %vm336_vm1 = vweird.f32 %v3963_v28  ;;  %vm318_vm4 = vmor %vm316_vm2, %vm317_vm0  ;;  %v361_v56 = vand.u32 2147483648, %v349_v25  ;;  %928 = vmatpush.bf16.msra.mxu3 %v3014_v23  ;;  %v2929_v23 = vld [vmem:[#allocation7 + $0x28] sm:$0xf] }
  0xc4   :  { %3966 = vtanh.f32 %v305_v24  ;;  %v313_v31 = vsub.f32 1.0, %v312_v29  ;;  %vm337_vm6 = vmor %vm335_vm3, %vm336_vm1  ;;  %vm355_vm9 = vweird.f32 %v349_v25  ;;  %v359_v57 = vand.u32 2147483647, %v349_v25  ;;  %902 = vmatpush.bf16.msra.mxu1 %v3006_v19  ;;  %v2985_v24 = vld [vmem:[#allocation7 + $0xa0] sm:$0xf] }
  0xc5   :  { %v332_v32 = vsub.f32 1.0, %v331_v30  ;;  %v362_v59 = vor.u32 1.1754944e-38, %v361_v56  ;;  %v3010_v20 = vor.u32 %v3780_v18, %v3009_v17  ;;  %v2993_v29 = vld [vmem:[#allocation7 + $0xa8] sm:$0xf]  ;;  %v3776_v30 = vld [vmem:[#allocation7 + $0xb4] sm:$0xf0]  ;;  %v2950_v19 = vor.u32 %v3762_v15, %v2947_v16 }
  0xc6   :  { %v314_v35 = vmul.f32 %v3961_v27, %v313_v31  ;;  %vm360_vm11 = vcmp.eq.f32.partialorder %v359_v57, 8.507059e+37  ;;  %v2961_v56 = vld [vmem:[#allocation7 + $0x68] sm:$0xf]  ;;  %v3768_v57 = vld [vmem:[#allocation7 + $0x74] sm:$0xf0] }
  0xc7   :  { %v333_v37 = vmul.f32 %v3963_v28, %v332_v32  ;;  %915 = vmatpush.bf16.msra.mxu2 %v3010_v20  ;;  %v2994_v32 = vor.u32 %v3776_v30, %v2993_v29  ;;  %v2921_v17 = vld [vmem:[#allocation7 + $0x20] sm:$0xf]  ;;  %v3759_v18 = vld [vmem:[#allocation7 + $0x2c] sm:$0xf0] }
  0xc8   :  { %v315_v40 = vadd.f32 %v3961_v27, %v314_v35  ;;  %v2998_v35 = vor.u32 %v3774_v33, %v2995_v34  ;;  %v2922_v20 = vor.u32 %v3759_v18, %v2921_v17  ;;  %v3755_v33 = vld [vmem:[#allocation7 + $0xc] sm:$0xf0]  ;;  %v3753_v34 = vld [vmem:[#allocation7 + $0x4] sm:$0xf] }
  0xc9   :  { %v3965_v39 = vpop.eup %3964  ;;  %v334_v44 = vadd.f32 %v3963_v28, %v333_v37  ;;  %v3771_v37 = vld [vmem:[#allocation7 + $0x8c] sm:$0xf0] }
  0xca   :  { %v3967_v41 = vpop.eup %3966  ;;  %v351_v42 = vmul.f32 %v3965_v39, %v349_v25  ;;  %v319_v46 = vsel %vm318_vm4, %v3961_v27, %v315_v40  ;;  %vm356_vm8 = vweird.f32 %v3965_v39  ;;  %v3775_v25 = vld [vmem:[#allocation7 + $0xac] sm:$0xf0]  ;;  %929 = vmatpush.bf16.msra.mxu3 %v2998_v35  ;;  %v2971_v40 = vld [vmem:[#allocation7 + $0x90] sm:$0xf0] }
  0xcb   :  { %v324_v48 = vsel %vm321_vm5, %v323_v43, %v319_v46  ;;  %v338_v49 = vsel %vm337_vm6, %v3963_v28, %v334_v44  ;;  %vm357_vm10 = vmor %vm355_vm9, %vm356_vm8  ;;  %v2986_v27 = vor.u32 %v3775_v25, %v2985_v24  ;;  %v2987_v28 = vld [vmem:[#allocation7 + $0xb0] sm:$0xf0]  ;;  %916 = vmatpush.bf16.msra.mxu2 %v2994_v32  ;;  %v2974_v43 = vor.u32 %v3769_v38, %v2971_v40  ;;  %v2979_v46 = vld [vmem:[#allocation7 + $0x98] sm:$0xf0] }
  0xcc   :  { %v352_v47 = vsub.f32 1.0, %v351_v42  ;;  %v343_v50 = vsel %vm340_vm7, %v342_v45, %v338_v49  ;;  %v367_v51 = vmul.f32 %v3967_v41, %v324_v48  ;;  %v2990_v31 = vor.u32 %v3773_v26, %v2987_v28  ;;  %v2977_v41 = vld [vmem:[#allocation7 + $0x88] sm:$0xf]  ;;  %v3772_v42 = vld [vmem:[#allocation7 + $0x94] sm:$0xf0] }
  0xcd   :  { %v366_v52 = vmul.f32 0.0, %v343_v50  ;;  %890 = vmatpush.bf16.msra.mxu0 %v2986_v27  ;;  %v2978_v44 = vor.u32 %v3772_v42, %v2977_v41  ;;  %v3770_v45 = vld [vmem:[#allocation7 + $0x8c] sm:$0xf]  ;;  %v2953_v50 = vld [vmem:[#allocation7 + $0x60] sm:$0xf]  ;;  %v2926_v24 = vor.u32 %v3757_v21, %v2923_v22 }
  0xce   :  { %v353_v53 = vmul.f32 %v3965_v39, %v352_v47  ;;  %903 = vmatpush.bf16.msra.mxu1 %v2990_v31  ;;  %v620_v47 = vld [vmem:[#allocation5 + $0x20] sm:$0xff]  ;;  %v621_v48 = vld [vmem:[#allocation5 + $0x28] sm:$0xff]  ;;  %v2982_v49 = vor.u32 %v3770_v45, %v2979_v46  ;;  %v3760_v25 = vld [vmem:[#allocation7 + $0x34] sm:$0xf0] }
  0xcf   :  { %v4175_v54 = vadd.f32 %v367_v51, %v366_v52  ;;  %917 = vmatpush.bf16.msra.mxu2 %v2978_v44  ;;  %v3767_v51 = vld [vmem:[#allocation7 + $0x6c] sm:$0xf0]  ;;  %v3765_v52 = vld [vmem:[#allocation7 + $0x64] sm:$0xf]  ;;  %v3758_v26 = vld [vmem:[#allocation7 + $0x2c] sm:$0xf]  ;;  %v2930_v30 = vor.u32 %v3760_v25, %v2929_v23 }
  0xd0   :  { %v354_v55 = vadd.f32 %v3965_v39, %v353_v53  ;;  %930 = vmatpush.bf16.msra.mxu3 %v2982_v49  ;;  %v2954_v53 = vor.u32 %v3767_v51, %v2953_v50  ;;  %v2931_v27 = vld [vmem:[#allocation7 + $0x38] sm:$0xf0]  ;;  %v2905_v32 = vld [vmem:[#allocation7] sm:$0xf]  ;;  %v2913_v40 = vld [vmem:[#allocation7 + $0x8] sm:$0xf] }
  0xd1   :  { %3968 = vtanh.f32 %v4175_v54  ;;  %v2934_v31 = vor.u32 %v3758_v26, %v2931_v27  ;;  %v2906_v38 = vor.u32 %v3755_v33, %v2905_v32  ;;  %v3756_v41 = vld [vmem:[#allocation7 + $0x14] sm:$0xf0]  ;;  %v3754_v44 = vld [vmem:[#allocation7 + $0xc] sm:$0xf]  ;;  %v2915_v45 = vld [vmem:[#allocation7 + $0x18] sm:$0xf0] }
  0xd2   :  { %v358_v58 = vsel %vm357_vm10, %v3965_v39, %v354_v55  ;;  %v2970_v39 = vor.u32 %v3771_v37, %v2969_v36  ;;  %904 = vmatpush.bf16.msra.mxu1 %v2974_v43  ;;  %v2955_v55 = vld [vmem:[#allocation7 + $0x70] sm:$0xf0]  ;;  %v2914_v43 = vor.u32 %v3756_v41, %v2913_v40  ;;  %v3815_v32 = vld [vmem:[#allocation7 + $0xec] sm:$0xf0]  ;;  %v3813_v33 = vld [vmem:[#allocation7 + $0xe4] sm:$0xf] }
  0xd3   :  { %v363_v61 = vsel %vm360_vm11, %v362_v59, %v358_v58  ;;  %v2958_v58 = vor.u32 %v3765_v52, %v2955_v55  ;;  %v2962_v59 = vor.u32 %v3768_v57, %v2961_v56  ;;  %v622_v55 = vld [vmem:[#allocation5 + $0x30] sm:$0xff]  ;;  %v3814_v40 = vld [vmem:[#allocation7 + $0xec] sm:$0xf]  ;;  %v3158_v41 = vld [vmem:[#allocation7 + $0xf8] sm:$0xf0] }
  0xd4   :  { %891 = vmatpush.bf16.msra.mxu0 %v2970_v39  ;;  %v2907_v39 = vld [vmem:[#allocation7 + $0x10] sm:$0xf0] }
  0xd5   :  { %918 = vmatpush.bf16.msra.mxu2 %v2962_v59  ;;  %v2910_v42 = vor.u32 %v3753_v34, %v2907_v39 }
  0xd6   :  { %905 = vmatpush.bf16.msra.mxu1 %v2958_v58 }
  0xd7   :  { %v3969_v60 = vpop.eup %3968 }
  0xd8   :  { %v371_v62 = vmul.f32 %v3969_v60, %v363_v61  ;;  %v3766_v60 = vld [vmem:[#allocation7 + $0x6c] sm:$0xf]  ;;  %v2963_v61 = vld [vmem:[#allocation7 + $0x78] sm:$0xf0]  ;;  %892 = vmatpush.bf16.msra.mxu0 %v2954_v53 }
  0xd9   :  { %v2966_v0 = vor.u32 %v3766_v60, %v2963_v61  ;;  %919 = vmatpush.bf16.msra.mxu2 %v2946_v14 }
  0xda   :  { %v374_v63 = vpack.c.bf16 %v371_v62, %v371_v62  ;;  %906 = vmatpush.bf16.msra.mxu1 %v2942_v13 }
  0xdb   :  { %931 = vmatpush.bf16.msra.mxu3 %v2966_v0 }
  0xdc   :  { %575 = vmatmul.bf16.vlgmr.msrb.gmra.mxu0 %v374_v63  ;;  %588 = vmatmul.bf16.vlgmr.msrb.gmra.mxu1 %v374_v63 }
  0xdd   :  { %601 = vmatmul.bf16.vlgmr.msrb.gmra.mxu2 %v374_v63  ;;  %614 = vmatmul.bf16.vlgmr.msrb.gmra.mxu3 %v374_v63 }
  0xde   :  { %893 = vmatpush.bf16.msra.mxu0 %v2938_v6  ;;  %907 = vmatpush.bf16.msra.mxu1 %v2926_v24 }
  0xdf   :  { %932 = vmatpush.bf16.msra.mxu3 %v2950_v19  ;;  %920 = vmatpush.bf16.msra.mxu2 %v2930_v30 }
  0xe2   :  { %894 = vmatpush.bf16.msra.mxu0 %v2922_v20  ;;  %908 = vmatpush.bf16.msra.mxu1 %v2910_v42  ;;  %v3161_v42 = vor.u32 %v3814_v40, %v3158_v41  ;;  %v3796_v40 = vld [vmem:[#allocation7 + $0x54] sm:$0xf0] }
  0xe3   :  { %933 = vmatpush.bf16.msra.mxu3 %v2934_v31  ;;  %921 = vmatpush.bf16.msra.mxu2 %v2914_v43  ;;  %v3132_v43 = vld [vmem:[#allocation7 + $0xc0] sm:$0xf] }
  0xe6   :  { %895 = vmatpush.bf16.msra.mxu0 %v2906_v38 }
 0x159   :  { %v576_v62 = vpop.f32.mrf.mxu0  ;;  %v589_v63 = vpop.f32.mrf.mxu1 }
 0x15a   :  { %v624_v1 = vadd.f32 %v620_v47, %v576_v62  ;;  %v625_v2 = vadd.f32 %v621_v48, %v589_v63  ;;  %v2918_v48 = vor.u32 %v3754_v44, %v2915_v45  ;;  %v3811_v44 = vld [vmem:[#allocation7 + $0xcc] sm:$0xf0]  ;;  %v3809_v45 = vld [vmem:[#allocation7 + $0xc4] sm:$0xf] }
 0x15c   :  { %v2900_v10 = vmul.f32 -1.442695, %v624_v1  ;;  %v2901_v11 = vmul.f32 -1.442695, %v625_v2  ;;  %934 = vmatpush.bf16.msra.mxu3 %v2918_v48  ;;  %v3140_v48 = vld [vmem:[#allocation7 + $0xc8] sm:$0xf] }
 0x15e   :  { %3970 = vpow2.f32 %v2900_v10 }
 0x15f   :  { %3972 = vpow2.f32 %v2901_v11 }
 0x160   :  { %v602_v28 = vpop.f32.mrf.mxu2  ;;  %v615_v29 = vpop.f32.mrf.mxu3  ;;  %1248 = vmatpush.bf16.msrb.mxu3 %v3161_v42 }
 0x161   :  { %v627_v35 = vadd.f32 %v623_v12, %v615_v29  ;;  %v578_v36 = vpop.f32.mrf.mxu0  ;;  %v591_v37 = vpop.f32.mrf.mxu1  ;;  %v626_v59 = vadd.f32 %v622_v55, %v602_v28 }
 0x162   :  { %v3156_v36 = vld [vmem:[#allocation7 + $0xe8] sm:$0xf]  ;;  %v3816_v37 = vld [vmem:[#allocation7 + $0xf4] sm:$0xf0] }
 0x163   :  { %v2902_v46 = vmul.f32 -1.442695, %v627_v35  ;;  %v3150_v35 = vld [vmem:[#allocation7 + $0xf0] sm:$0xf0]  ;;  %v3157_v39 = vor.u32 %v3816_v37, %v3156_v36  ;;  %v3793_v36 = vld [vmem:[#allocation7 + $0x44] sm:$0xf] }
 0x164   :  { %v3971_v47 = vpop.eup %3970  ;;  %v3153_v38 = vor.u32 %v3813_v33, %v3150_v35  ;;  %v3795_v35 = vld [vmem:[#allocation7 + $0x4c] sm:$0xf0] }
 0x165   :  { %v3973_v49 = vpop.eup %3972  ;;  %v631_v50 = vadd.f32 1.0, %v3971_v47  ;;  %3974 = vpow2.f32 %v2902_v46  ;;  %1235 = vmatpush.bf16.msrb.mxu2 %v3157_v39  ;;  %v3133_v46 = vor.u32 %v3811_v44, %v3132_v43  ;;  %v3134_v47 = vld [vmem:[#allocation7 + $0xd0] sm:$0xf0]  ;;  %v3076_v39 = vld [vmem:[#allocation7 + $0x48] sm:$0xf]  ;;  %v944_v43 = vld [vmem:[#allocation5 + $0x58] sm:$0xff] }
 0x166   :  { %v650_v51 = vadd.f32 1.0, %v3973_v49  ;;  %1222 = vmatpush.bf16.msrb.mxu1 %v3153_v38  ;;  %v3812_v49 = vld [vmem:[#allocation7 + $0xd4] sm:$0xf0]  ;;  %v3070_v38 = vld [vmem:[#allocation7 + $0x50] sm:$0xf0] }
 0x167   :  { %3976 = vrcp.f32 %v631_v50  ;;  %v643_v1 = vand.u32 2147483648, %v631_v50  ;;  %v641_v4 = vand.u32 2147483647, %v631_v50  ;;  %vm637_vm14 = vweird.f32 %v631_v50 }
 0x168   :  { %3978 = vrcp.f32 %v650_v51  ;;  %v604_v52 = vpop.f32.mrf.mxu2  ;;  %v617_v53 = vpop.f32.mrf.mxu3  ;;  %v662_v2 = vand.u32 2147483648, %v650_v51  ;;  %v660_v6 = vand.u32 2147483647, %v650_v51  ;;  %vm656_vm15 = vweird.f32 %v650_v51 }
 0x169   :  { %v644_v9 = vor.u32 1.1754944e-38, %v643_v1  ;;  %vm642_vm2 = vcmp.eq.f32.partialorder %v641_v4, 8.507059e+37  ;;  %v3810_v52 = vld [vmem:[#allocation7 + $0xcc] sm:$0xf]  ;;  %v3142_v53 = vld [vmem:[#allocation7 + $0xd8] sm:$0xf0]  ;;  %v3073_v44 = vor.u32 %v3793_v36, %v3070_v38 }
 0x16a   :  { %v663_v12 = vor.u32 1.1754944e-38, %v662_v2  ;;  %vm661_vm3 = vcmp.eq.f32.partialorder %v660_v6, 8.507059e+37  ;;  %v3145_v55 = vor.u32 %v3810_v52, %v3142_v53  ;;  %v3806_v1 = vld [vmem:[#allocation7 + $0xac] sm:$0xf]  ;;  %v3126_v2 = vld [vmem:[#allocation7 + $0xb8] sm:$0xf0] }
 0x16b   :  { %v3975_v56 = vpop.eup %3974  ;;  %v3100_v4 = vld [vmem:[#allocation7 + $0x80] sm:$0xf]  ;;  %v3801_v6 = vld [vmem:[#allocation7 + $0x84] sm:$0xf]  ;;  %v3054_v53 = vld [vmem:[#allocation7 + $0x30] sm:$0xf0] }
 0x16c   :  { %v670_v57 = vadd.f32 1.0, %v3975_v56  ;;  %v3116_v56 = vld [vmem:[#allocation7 + $0xa0] sm:$0xf]  ;;  %1249 = vmatpush.bf16.msrb.mxu3 %v3145_v55  ;;  %v3789_v52 = vld [vmem:[#allocation7 + $0x24] sm:$0xf] }
 0x16d   :  { %v3977_v58 = vpop.eup %3976  ;;  %v3060_v55 = vld [vmem:[#allocation7 + $0x28] sm:$0xf] }
 0x16e   :  { %v3979_v60 = vpop.eup %3978  ;;  %v633_v61 = vmul.f32 %v3977_v58, %v631_v50  ;;  %3980 = vrcp.f32 %v670_v57  ;;  %vm638_vm12 = vweird.f32 %v3977_v58  ;;  %v682_v24 = vand.u32 2147483648, %v670_v57 }
 0x16f   :  { %v652_v62 = vmul.f32 %v3979_v60, %v650_v51  ;;  %3982 = vtanh.f32 %v626_v59  ;;  %vm657_vm13 = vweird.f32 %v3979_v60  ;;  %vm639_vm0 = vmor %vm637_vm14, %vm638_vm12  ;;  %vm676_vm5 = vweird.f32 %v670_v57 }
 0x170   :  { %v634_v63 = vsub.f32 1.0, %v633_v61  ;;  %vm658_vm1 = vmor %vm656_vm15, %vm657_vm13  ;;  %v680_v25 = vand.u32 2147483647, %v670_v57  ;;  %v683_v27 = vor.u32 1.1754944e-38, %v682_v24  ;;  %v3137_v50 = vor.u32 %v3809_v45, %v3134_v47  ;;  %v3124_v61 = vld [vmem:[#allocation7 + $0xa8] sm:$0xf] }
 0x171   :  { %v653_v0 = vsub.f32 1.0, %v652_v62  ;;  %v3141_v51 = vor.u32 %v3812_v49, %v3140_v48  ;;  %v3808_v62 = vld [vmem:[#allocation7 + $0xb4] sm:$0xf0]  ;;  %v3092_v24 = vld [vmem:[#allocation7 + $0x68] sm:$0xf]  ;;  %v3077_v45 = vor.u32 %v3796_v40, %v3076_v39 }
 0x172   :  { %v635_v3 = vmul.f32 %v3977_v58, %v634_v63  ;;  %vm681_vm7 = vcmp.eq.f32.partialorder %v680_v25, 8.507059e+37  ;;  %1223 = vmatpush.bf16.msrb.mxu1 %v3137_v50  ;;  %v3800_v25 = vld [vmem:[#allocation7 + $0x74] sm:$0xf0]  ;;  %v3078_v47 = vld [vmem:[#allocation7 + $0x58] sm:$0xf0] }
 0x173   :  { %v654_v5 = vmul.f32 %v3979_v60, %v653_v0  ;;  %1236 = vmatpush.bf16.msrb.mxu2 %v3141_v51  ;;  %v3125_v0 = vor.u32 %v3808_v62, %v3124_v61  ;;  %v3052_v48 = vld [vmem:[#allocation7 + $0x20] sm:$0xf]  ;;  %v3791_v49 = vld [vmem:[#allocation7 + $0x2c] sm:$0xf0] }
 0x174   :  { %v3981_v7 = vpop.eup %3980  ;;  %v636_v8 = vadd.f32 %v3977_v58, %v635_v3  ;;  %v3129_v3 = vor.u32 %v3806_v1, %v3126_v2  ;;  %v3053_v51 = vor.u32 %v3791_v49, %v3052_v48  ;;  %v3787_v1 = vld [vmem:[#allocation7 + $0xc] sm:$0xf0]  ;;  %v3785_v2 = vld [vmem:[#allocation7 + $0x4] sm:$0xf] }
 0x175   :  { %v655_v10 = vadd.f32 %v3979_v60, %v654_v5  ;;  %v672_v11 = vmul.f32 %v3981_v7, %v670_v57  ;;  %v3983_v14 = vpop.eup %3982  ;;  %vm677_vm4 = vweird.f32 %v3981_v7  ;;  %v3807_v57 = vld [vmem:[#allocation7 + $0xac] sm:$0xf0] }
 0x176   :  { %v640_v13 = vsel %vm639_vm0, %v3977_v58, %v636_v8  ;;  %vm678_vm6 = vmor %vm676_vm5, %vm677_vm4  ;;  %v3805_v58 = vld [vmem:[#allocation7 + $0xa4] sm:$0xf]  ;;  %v3117_v59 = vor.u32 %v3807_v57, %v3116_v56  ;;  %v3803_v5 = vld [vmem:[#allocation7 + $0x8c] sm:$0xf0]  ;;  %1250 = vmatpush.bf16.msrb.mxu3 %v3129_v3  ;;  %v3057_v56 = vor.u32 %v3789_v52, %v3054_v53 }
 0x177   :  { %v645_v15 = vsel %vm642_vm2, %v644_v9, %v640_v13  ;;  %v659_v16 = vsel %vm658_vm1, %v3979_v60, %v655_v10  ;;  %v673_v17 = vsub.f32 1.0, %v672_v11  ;;  %v3118_v60 = vld [vmem:[#allocation7 + $0xb0] sm:$0xf0]  ;;  %1237 = vmatpush.bf16.msrb.mxu2 %v3125_v0  ;;  %v3108_v9 = vld [vmem:[#allocation7 + $0x88] sm:$0xf] }
 0x178   :  { %v664_v18 = vsel %vm661_vm3, %v663_v12, %v659_v16  ;;  %v688_v19 = vmul.f32 %v3983_v14, %v645_v15  ;;  %v3121_v63 = vor.u32 %v3805_v58, %v3118_v60  ;;  %v3102_v8 = vld [vmem:[#allocation7 + $0x90] sm:$0xf0]  ;;  %v3804_v10 = vld [vmem:[#allocation7 + $0x94] sm:$0xf0]  ;;  %v3802_v13 = vld [vmem:[#allocation7 + $0x8c] sm:$0xf] }
 0x179   :  { %v687_v20 = vmul.f32 %v664_v18, %v4175_v54  ;;  %v674_v21 = vmul.f32 %v3981_v7, %v673_v17  ;;  %v3148_v54 = vld [vmem:[#allocation7 + $0xe0] sm:$0xf]  ;;  %v3105_v11 = vor.u32 %v3801_v6, %v3102_v8  ;;  %v3109_v12 = vor.u32 %v3804_v10, %v3108_v9  ;;  %v3110_v14 = vld [vmem:[#allocation7 + $0x98] sm:$0xf0]  ;;  %v942_v16 = vld [vmem:[#allocation5 + $0x48] sm:$0xff] }
 0x17a   :  { %v3149_v34 = vor.u32 %v3815_v32, %v3148_v54  ;;  %1224 = vmatpush.bf16.msrb.mxu1 %v3121_v63  ;;  %v941_v15 = vld [vmem:[#allocation5 + $0x40] sm:$0xff]  ;;  %v3113_v17 = vor.u32 %v3802_v13, %v3110_v14  ;;  %v3792_v57 = vld [vmem:[#allocation7 + $0x34] sm:$0xf0]  ;;  %v3790_v58 = vld [vmem:[#allocation7 + $0x2c] sm:$0xf] }
 0x17b   :  { %v4179_v22 = vadd.f32 %v688_v19, %v687_v20  ;;  %v675_v23 = vadd.f32 %v3981_v7, %v674_v21  ;;  %1238 = vmatpush.bf16.msrb.mxu2 %v3109_v12  ;;  %v3084_v18 = vld [vmem:[#allocation7 + $0x60] sm:$0xf]  ;;  %v3799_v19 = vld [vmem:[#allocation7 + $0x6c] sm:$0xf0]  ;;  %v3797_v20 = vld [vmem:[#allocation7 + $0x64] sm:$0xf]  ;;  %v3061_v62 = vor.u32 %v3792_v57, %v3060_v55 }
 0x17c   :  { %1209 = vmatpush.bf16.msrb.mxu0 %v3149_v34  ;;  %1251 = vmatpush.bf16.msrb.mxu3 %v3113_v17  ;;  %v3085_v21 = vor.u32 %v3799_v19, %v3084_v18  ;;  %v3068_v34 = vld [vmem:[#allocation7 + $0x40] sm:$0xf]  ;;  %v3044_v8 = vld [vmem:[#allocation7 + $0x8] sm:$0xf]  ;;  %v3788_v9 = vld [vmem:[#allocation7 + $0x14] sm:$0xf0] }
 0x17d   :  { %3984 = vtanh.f32 %v4179_v22  ;;  %v679_v26 = vsel %vm678_vm6, %v3981_v7, %v675_v23  ;;  %v3101_v7 = vor.u32 %v3803_v5, %v3100_v4  ;;  %v3086_v23 = vld [vmem:[#allocation7 + $0x70] sm:$0xf0]  ;;  %v3069_v37 = vor.u32 %v3795_v35, %v3068_v34  ;;  %v3036_v0 = vld [vmem:[#allocation7] sm:$0xf]  ;;  %v3786_v12 = vld [vmem:[#allocation7 + $0xc] sm:$0xf] }
 0x17e   :  { %v684_v29 = vsel %vm681_vm7, %v683_v27, %v679_v26  ;;  %1225 = vmatpush.bf16.msrb.mxu1 %v3105_v11  ;;  %v3089_v26 = vor.u32 %v3797_v20, %v3086_v23  ;;  %v3093_v27 = vor.u32 %v3800_v25, %v3092_v24  ;;  %v3037_v6 = vor.u32 %v3787_v1, %v3036_v0  ;;  %v3046_v13 = vld [vmem:[#allocation7 + $0x18] sm:$0xf0]  ;;  %v943_v23 = vld [vmem:[#allocation5 + $0x50] sm:$0xff]  ;;  %v3845_v1 = vld [vmem:[#allocation7 + $0xe4] sm:$0xf] }
 0x17f   :  { %v3045_v11 = vor.u32 %v3788_v9, %v3044_v8  ;;  %v3847_v0 = vld [vmem:[#allocation7 + $0xec] sm:$0xf0]  ;;  %v3846_v8 = vld [vmem:[#allocation7 + $0xec] sm:$0xf]  ;;  %v3289_v9 = vld [vmem:[#allocation7 + $0xf8] sm:$0xf0] }
 0x180   :  { %1210 = vmatpush.bf16.msrb.mxu0 %v3133_v46  ;;  %1239 = vmatpush.bf16.msrb.mxu2 %v3093_v27  ;;  %v3794_v46 = vld [vmem:[#allocation7 + $0x4c] sm:$0xf] }
 0x181   :  { %v3081_v50 = vor.u32 %v3794_v46, %v3078_v47 }
 0x182   :  { %1226 = vmatpush.bf16.msrb.mxu1 %v3089_v26 }
 0x183   :  { %v3985_v28 = vpop.eup %3984 }
 0x184   :  { %v692_v30 = vmul.f32 %v3985_v28, %v684_v29  ;;  %1211 = vmatpush.bf16.msrb.mxu0 %v3117_v59  ;;  %v3798_v28 = vld [vmem:[#allocation7 + $0x6c] sm:$0xf]  ;;  %v3094_v29 = vld [vmem:[#allocation7 + $0x78] sm:$0xf0]  ;;  %1240 = vmatpush.bf16.msrb.mxu2 %v3077_v45 }
 0x185   :  { %v3097_v54 = vor.u32 %v3798_v28, %v3094_v29  ;;  %v3062_v59 = vld [vmem:[#allocation7 + $0x38] sm:$0xf0] }
 0x186   :  { %v695_v31 = vpack.c.bf16 %v692_v30, %v692_v30  ;;  %1227 = vmatpush.bf16.msrb.mxu1 %v3073_v44  ;;  %v3065_v63 = vor.u32 %v3790_v58, %v3062_v59 }
 0x187   :  { %1252 = vmatpush.bf16.msrb.mxu3 %v3097_v54 }
 0x188   :  { %896 = vmatmul.bf16.vlgmr.msra.gmra.mxu0 %v695_v31  ;;  %909 = vmatmul.bf16.vlgmr.msra.gmra.mxu1 %v695_v31 }
 0x189   :  { %922 = vmatmul.bf16.vlgmr.msra.gmra.mxu2 %v695_v31  ;;  %935 = vmatmul.bf16.vlgmr.msra.gmra.mxu3 %v695_v31 }
 0x18a   :  { %1212 = vmatpush.bf16.msrb.mxu0 %v3101_v7  ;;  %v3038_v7 = vld [vmem:[#allocation7 + $0x10] sm:$0xf0]  ;;  %1228 = vmatpush.bf16.msrb.mxu1 %v3057_v56 }
 0x18b   :  { %1253 = vmatpush.bf16.msrb.mxu3 %v3081_v50  ;;  %1241 = vmatpush.bf16.msrb.mxu2 %v3061_v62  ;;  %v3041_v10 = vor.u32 %v3785_v2, %v3038_v7 }
 0x18e   :  { %1213 = vmatpush.bf16.msrb.mxu0 %v3085_v21  ;;  %1229 = vmatpush.bf16.msrb.mxu1 %v3041_v10  ;;  %v3292_v10 = vor.u32 %v3846_v8, %v3289_v9  ;;  %v3828_v8 = vld [vmem:[#allocation7 + $0x54] sm:$0xf0] }
 0x18f   :  { %1254 = vmatpush.bf16.msrb.mxu3 %v3065_v63  ;;  %1242 = vmatpush.bf16.msrb.mxu2 %v3045_v11  ;;  %v3263_v11 = vld [vmem:[#allocation7 + $0xc0] sm:$0xf] }
 0x192   :  { %1214 = vmatpush.bf16.msrb.mxu0 %v3069_v37 }
 0x196   :  { %1215 = vmatpush.bf16.msrb.mxu0 %v3053_v51 }
 0x19a   :  { %1216 = vmatpush.bf16.msrb.mxu0 %v3037_v6 }
 0x205   :  { %v897_v30 = vpop.f32.mrf.mxu0  ;;  %v910_v31 = vpop.f32.mrf.mxu1 }
 0x206   :  { %v945_v32 = vadd.f32 %v941_v15, %v897_v30  ;;  %v946_v33 = vadd.f32 %v942_v16, %v910_v31  ;;  %v3049_v16 = vor.u32 %v3786_v12, %v3046_v13  ;;  %v3843_v12 = vld [vmem:[#allocation7 + $0xcc] sm:$0xf0]  ;;  %v3841_v13 = vld [vmem:[#allocation7 + $0xc4] sm:$0xf] }
 0x208   :  { %v3031_v41 = vmul.f32 -1.442695, %v945_v32  ;;  %v3032_v42 = vmul.f32 -1.442695, %v946_v33  ;;  %1255 = vmatpush.bf16.msrb.mxu3 %v3049_v16  ;;  %v3271_v16 = vld [vmem:[#allocation7 + $0xc8] sm:$0xf] }
 0x20a   :  { %3986 = vpow2.f32 %v3031_v41 }
 0x20b   :  { %3988 = vpow2.f32 %v3032_v42 }
 0x20c   :  { %v923_v60 = vpop.f32.mrf.mxu2  ;;  %v936_v61 = vpop.f32.mrf.mxu3  ;;  %1569 = vmatpush.bf16.msra.mxu3 %v3292_v10 }
 0x20d   :  { %v948_v3 = vadd.f32 %v944_v43, %v936_v61  ;;  %v899_v4 = vpop.f32.mrf.mxu0  ;;  %v912_v5 = vpop.f32.mrf.mxu1  ;;  %v947_v27 = vadd.f32 %v943_v23, %v923_v60 }
 0x20e   :  { %v3287_v4 = vld [vmem:[#allocation7 + $0xe8] sm:$0xf]  ;;  %v3848_v5 = vld [vmem:[#allocation7 + $0xf4] sm:$0xf0] }
 0x20f   :  { %v3033_v14 = vmul.f32 -1.442695, %v948_v3  ;;  %v3281_v3 = vld [vmem:[#allocation7 + $0xf0] sm:$0xf0]  ;;  %v3288_v7 = vor.u32 %v3848_v5, %v3287_v4  ;;  %v3825_v4 = vld [vmem:[#allocation7 + $0x44] sm:$0xf] }
 0x210   :  { %v3987_v15 = vpop.eup %3986  ;;  %v3284_v6 = vor.u32 %v3845_v1, %v3281_v3  ;;  %v3827_v3 = vld [vmem:[#allocation7 + $0x4c] sm:$0xf0] }
 0x211   :  { %v3989_v17 = vpop.eup %3988  ;;  %v952_v18 = vadd.f32 1.0, %v3987_v15  ;;  %3990 = vpow2.f32 %v3033_v14  ;;  %1556 = vmatpush.bf16.msra.mxu2 %v3288_v7  ;;  %v3264_v14 = vor.u32 %v3843_v12, %v3263_v11  ;;  %v3265_v15 = vld [vmem:[#allocation7 + $0xd0] sm:$0xf0]  ;;  %v3207_v7 = vld [vmem:[#allocation7 + $0x48] sm:$0xf]  ;;  %v1265_v11 = vld [vmem:[#allocation5 + $0x78] sm:$0xff] }
 0x212   :  { %v971_v19 = vadd.f32 1.0, %v3989_v17  ;;  %1543 = vmatpush.bf16.msra.mxu1 %v3284_v6  ;;  %v3844_v17 = vld [vmem:[#allocation7 + $0xd4] sm:$0xf0]  ;;  %v3201_v6 = vld [vmem:[#allocation7 + $0x50] sm:$0xf0] }
 0x213   :  { %3992 = vrcp.f32 %v952_v18  ;;  %v964_v32 = vand.u32 2147483648, %v952_v18  ;;  %v962_v35 = vand.u32 2147483647, %v952_v18  ;;  %vm958_vm10 = vweird.f32 %v952_v18 }
 0x214   :  { %3994 = vrcp.f32 %v971_v19  ;;  %v925_v20 = vpop.f32.mrf.mxu2  ;;  %v938_v21 = vpop.f32.mrf.mxu3  ;;  %v983_v33 = vand.u32 2147483648, %v971_v19  ;;  %v981_v37 = vand.u32 2147483647, %v971_v19  ;;  %vm977_vm11 = vweird.f32 %v971_v19 }
 0x215   :  { %v965_v40 = vor.u32 1.1754944e-38, %v964_v32  ;;  %vm963_vm14 = vcmp.eq.f32.partialorder %v962_v35, 8.507059e+37  ;;  %v3842_v20 = vld [vmem:[#allocation7 + $0xcc] sm:$0xf]  ;;  %v3273_v21 = vld [vmem:[#allocation7 + $0xd8] sm:$0xf0]  ;;  %v3204_v12 = vor.u32 %v3825_v4, %v3201_v6 }
 0x216   :  { %v984_v43 = vor.u32 1.1754944e-38, %v983_v33  ;;  %vm982_vm15 = vcmp.eq.f32.partialorder %v981_v37, 8.507059e+37  ;;  %v3276_v23 = vor.u32 %v3842_v20, %v3273_v21  ;;  %v3838_v32 = vld [vmem:[#allocation7 + $0xac] sm:$0xf]  ;;  %v3257_v33 = vld [vmem:[#allocation7 + $0xb8] sm:$0xf0] }
 0x217   :  { %v3991_v24 = vpop.eup %3990  ;;  %v3231_v35 = vld [vmem:[#allocation7 + $0x80] sm:$0xf]  ;;  %v3833_v37 = vld [vmem:[#allocation7 + $0x84] sm:$0xf]  ;;  %v3185_v21 = vld [vmem:[#allocation7 + $0x30] sm:$0xf0] }
 0x218   :  { %v991_v25 = vadd.f32 1.0, %v3991_v24  ;;  %v3247_v24 = vld [vmem:[#allocation7 + $0xa0] sm:$0xf]  ;;  %1570 = vmatpush.bf16.msra.mxu3 %v3276_v23  ;;  %v3821_v20 = vld [vmem:[#allocation7 + $0x24] sm:$0xf] }
 0x219   :  { %v3993_v26 = vpop.eup %3992  ;;  %v3191_v23 = vld [vmem:[#allocation7 + $0x28] sm:$0xf] }
 0x21a   :  { %v3995_v28 = vpop.eup %3994  ;;  %v954_v29 = vmul.f32 %v3993_v26, %v952_v18  ;;  %3996 = vrcp.f32 %v991_v25  ;;  %vm959_vm8 = vweird.f32 %v3993_v26  ;;  %v1003_v56 = vand.u32 2147483648, %v991_v25 }
 0x21b   :  { %v973_v30 = vmul.f32 %v3995_v28, %v971_v19  ;;  %3998 = vtanh.f32 %v947_v27  ;;  %vm978_vm9 = vweird.f32 %v3995_v28  ;;  %vm960_vm12 = vmor %vm958_vm10, %vm959_vm8  ;;  %vm997_vm1 = vweird.f32 %v991_v25 }
 0x21c   :  { %v955_v31 = vsub.f32 1.0, %v954_v29  ;;  %vm979_vm13 = vmor %vm977_vm11, %vm978_vm9  ;;  %v1001_v57 = vand.u32 2147483647, %v991_v25  ;;  %v1004_v59 = vor.u32 1.1754944e-38, %v1003_v56  ;;  %v3268_v18 = vor.u32 %v3841_v13, %v3265_v15  ;;  %v3255_v29 = vld [vmem:[#allocation7 + $0xa8] sm:$0xf] }
 0x21d   :  { %v974_v54 = vsub.f32 1.0, %v973_v30  ;;  %v3272_v19 = vor.u32 %v3844_v17, %v3271_v16  ;;  %v3840_v30 = vld [vmem:[#allocation7 + $0xb4] sm:$0xf0]  ;;  %v3223_v56 = vld [vmem:[#allocation7 + $0x68] sm:$0xf]  ;;  %v3208_v13 = vor.u32 %v3828_v8, %v3207_v7 }
 0x21e   :  { %v956_v34 = vmul.f32 %v3993_v26, %v955_v31  ;;  %vm1002_vm3 = vcmp.eq.f32.partialorder %v1001_v57, 8.507059e+37  ;;  %1544 = vmatpush.bf16.msra.mxu1 %v3268_v18  ;;  %v3832_v57 = vld [vmem:[#allocation7 + $0x74] sm:$0xf0]  ;;  %v3209_v15 = vld [vmem:[#allocation7 + $0x58] sm:$0xf0] }
 0x21f   :  { %v975_v36 = vmul.f32 %v3995_v28, %v974_v54  ;;  %1557 = vmatpush.bf16.msra.mxu2 %v3272_v19  ;;  %v3256_v54 = vor.u32 %v3840_v30, %v3255_v29  ;;  %v3183_v16 = vld [vmem:[#allocation7 + $0x20] sm:$0xf]  ;;  %v3823_v17 = vld [vmem:[#allocation7 + $0x2c] sm:$0xf0] }
 0x220   :  { %v3997_v38 = vpop.eup %3996  ;;  %v957_v39 = vadd.f32 %v3993_v26, %v956_v34  ;;  %v3260_v34 = vor.u32 %v3838_v32, %v3257_v33  ;;  %v3184_v19 = vor.u32 %v3823_v17, %v3183_v16  ;;  %v3819_v32 = vld [vmem:[#allocation7 + $0xc] sm:$0xf0]  ;;  %v3817_v33 = vld [vmem:[#allocation7 + $0x4] sm:$0xf] }
 0x221   :  { %v976_v41 = vadd.f32 %v3995_v28, %v975_v36  ;;  %v993_v42 = vmul.f32 %v3997_v38, %v991_v25  ;;  %v3999_v45 = vpop.eup %3998  ;;  %vm998_vm0 = vweird.f32 %v3997_v38  ;;  %v3839_v25 = vld [vmem:[#allocation7 + $0xac] sm:$0xf0] }
 0x222   :  { %v961_v44 = vsel %vm960_vm12, %v3993_v26, %v957_v39  ;;  %vm999_vm2 = vmor %vm997_vm1, %vm998_vm0  ;;  %v3837_v26 = vld [vmem:[#allocation7 + $0xa4] sm:$0xf]  ;;  %v3248_v27 = vor.u32 %v3839_v25, %v3247_v24  ;;  %v3835_v36 = vld [vmem:[#allocation7 + $0x8c] sm:$0xf0]  ;;  %1571 = vmatpush.bf16.msra.mxu3 %v3260_v34  ;;  %v3188_v24 = vor.u32 %v3821_v20, %v3185_v21 }
 0x223   :  { %v966_v46 = vsel %vm963_vm14, %v965_v40, %v961_v44  ;;  %v980_v47 = vsel %vm979_vm13, %v3995_v28, %v976_v41  ;;  %v994_v48 = vsub.f32 1.0, %v993_v42  ;;  %v3249_v28 = vld [vmem:[#allocation7 + $0xb0] sm:$0xf0]  ;;  %1558 = vmatpush.bf16.msra.mxu2 %v3256_v54  ;;  %v3239_v40 = vld [vmem:[#allocation7 + $0x88] sm:$0xf] }
 0x224   :  { %v985_v49 = vsel %vm982_vm15, %v984_v43, %v980_v47  ;;  %v1009_v50 = vmul.f32 %v3999_v45, %v966_v46  ;;  %v3252_v31 = vor.u32 %v3837_v26, %v3249_v28  ;;  %v3233_v39 = vld [vmem:[#allocation7 + $0x90] sm:$0xf0]  ;;  %v3836_v41 = vld [vmem:[#allocation7 + $0x94] sm:$0xf0]  ;;  %v3834_v44 = vld [vmem:[#allocation7 + $0x8c] sm:$0xf] }
 0x225   :  { %v1008_v51 = vmul.f32 %v985_v49, %v4179_v22  ;;  %v995_v52 = vmul.f32 %v3997_v38, %v994_v48  ;;  %v3279_v22 = vld [vmem:[#allocation7 + $0xe0] sm:$0xf]  ;;  %v3236_v42 = vor.u32 %v3833_v37, %v3233_v39  ;;  %v3240_v43 = vor.u32 %v3836_v41, %v3239_v40  ;;  %v3241_v45 = vld [vmem:[#allocation7 + $0x98] sm:$0xf0]  ;;  %v1263_v47 = vld [vmem:[#allocation5 + $0x68] sm:$0xff] }
 0x226   :  { %v3280_v2 = vor.u32 %v3847_v0, %v3279_v22  ;;  %1545 = vmatpush.bf16.msra.mxu1 %v3252_v31  ;;  %v1262_v46 = vld [vmem:[#allocation5 + $0x60] sm:$0xff]  ;;  %v3244_v48 = vor.u32 %v3834_v44, %v3241_v45  ;;  %v3824_v25 = vld [vmem:[#allocation7 + $0x34] sm:$0xf0]  ;;  %v3822_v26 = vld [vmem:[#allocation7 + $0x2c] sm:$0xf] }
 0x227   :  { %v4183_v53 = vadd.f32 %v1009_v50, %v1008_v51  ;;  %v996_v55 = vadd.f32 %v3997_v38, %v995_v52  ;;  %1559 = vmatpush.bf16.msra.mxu2 %v3240_v43  ;;  %v3215_v49 = vld [vmem:[#allocation7 + $0x60] sm:$0xf]  ;;  %v3831_v50 = vld [vmem:[#allocation7 + $0x6c] sm:$0xf0]  ;;  %v3829_v51 = vld [vmem:[#allocation7 + $0x64] sm:$0xf]  ;;  %v3192_v30 = vor.u32 %v3824_v25, %v3191_v23 }
 0x228   :  { %1530 = vmatpush.bf16.msra.mxu0 %v3280_v2  ;;  %1572 = vmatpush.bf16.msra.mxu3 %v3244_v48  ;;  %v3216_v52 = vor.u32 %v3831_v50, %v3215_v49  ;;  %v3199_v2 = vld [vmem:[#allocation7 + $0x40] sm:$0xf]  ;;  %v3175_v39 = vld [vmem:[#allocation7 + $0x8] sm:$0xf]  ;;  %v3820_v40 = vld [vmem:[#allocation7 + $0x14] sm:$0xf0] }
 0x229   :  { %4000 = vtanh.f32 %v4183_v53  ;;  %v1000_v58 = vsel %vm999_vm2, %v3997_v38, %v996_v55  ;;  %v3232_v38 = vor.u32 %v3835_v36, %v3231_v35  ;;  %v3217_v55 = vld [vmem:[#allocation7 + $0x70] sm:$0xf0]  ;;  %v3200_v5 = vor.u32 %v3827_v3, %v3199_v2  ;;  %v3167_v54 = vld [vmem:[#allocation7] sm:$0xf]  ;;  %v3818_v43 = vld [vmem:[#allocation7 + $0xc] sm:$0xf] }
 0x22a   :  { %v1005_v61 = vsel %vm1002_vm3, %v1004_v59, %v1000_v58  ;;  %1546 = vmatpush.bf16.msra.mxu1 %v3236_v42  ;;  %v3220_v58 = vor.u32 %v3829_v51, %v3217_v55  ;;  %v3224_v59 = vor.u32 %v3832_v57, %v3223_v56  ;;  %v3168_v37 = vor.u32 %v3819_v32, %v3167_v54  ;;  %v3177_v44 = vld [vmem:[#allocation7 + $0x18] sm:$0xf0]  ;;  %v1264_v55 = vld [vmem:[#allocation5 + $0x70] sm:$0xff]  ;;  %v3877_v32 = vld [vmem:[#allocation7 + $0xe4] sm:$0xf] }
 0x22b   :  { %v3176_v42 = vor.u32 %v3820_v40, %v3175_v39  ;;  %v3879_v54 = vld [vmem:[#allocation7 + $0xec] sm:$0xf0]  ;;  %v3878_v39 = vld [vmem:[#allocation7 + $0xec] sm:$0xf]  ;;  %v3420_v40 = vld [vmem:[#allocation7 + $0xf8] sm:$0xf0] }
 0x22c   :  { %1531 = vmatpush.bf16.msra.mxu0 %v3264_v14  ;;  %1560 = vmatpush.bf16.msra.mxu2 %v3224_v59  ;;  %v3826_v14 = vld [vmem:[#allocation7 + $0x4c] sm:$0xf] }
 0x22d   :  { %v3212_v18 = vor.u32 %v3826_v14, %v3209_v15 }
 0x22e   :  { %1547 = vmatpush.bf16.msra.mxu1 %v3220_v58 }
 0x22f   :  { %v4001_v60 = vpop.eup %4000 }
 0x230   :  { %v1013_v62 = vmul.f32 %v4001_v60, %v1005_v61  ;;  %1532 = vmatpush.bf16.msra.mxu0 %v3248_v27  ;;  %v3830_v60 = vld [vmem:[#allocation7 + $0x6c] sm:$0xf]  ;;  %v3225_v61 = vld [vmem:[#allocation7 + $0x78] sm:$0xf0]  ;;  %1561 = vmatpush.bf16.msra.mxu2 %v3208_v13 }
 0x231   :  { %v3228_v22 = vor.u32 %v3830_v60, %v3225_v61  ;;  %v3193_v27 = vld [vmem:[#allocation7 + $0x38] sm:$0xf0] }
 0x232   :  { %v1016_v63 = vpack.c.bf16 %v1013_v62, %v1013_v62  ;;  %1548 = vmatpush.bf16.msra.mxu1 %v3204_v12  ;;  %v3196_v31 = vor.u32 %v3822_v26, %v3193_v27 }
 0x233   :  { %1573 = vmatpush.bf16.msra.mxu3 %v3228_v22 }
 0x234   :  { %1217 = vmatmul.bf16.vlgmr.msrb.gmra.mxu0 %v1016_v63  ;;  %1230 = vmatmul.bf16.vlgmr.msrb.gmra.mxu1 %v1016_v63 }
 0x235   :  { %1243 = vmatmul.bf16.vlgmr.msrb.gmra.mxu2 %v1016_v63  ;;  %1256 = vmatmul.bf16.vlgmr.msrb.gmra.mxu3 %v1016_v63 }
 0x236   :  { %1533 = vmatpush.bf16.msra.mxu0 %v3232_v38  ;;  %v3169_v38 = vld [vmem:[#allocation7 + $0x10] sm:$0xf0]  ;;  %1549 = vmatpush.bf16.msra.mxu1 %v3188_v24 }
 0x237   :  { %1574 = vmatpush.bf16.msra.mxu3 %v3212_v18  ;;  %1562 = vmatpush.bf16.msra.mxu2 %v3192_v30  ;;  %v3172_v41 = vor.u32 %v3817_v33, %v3169_v38 }
 0x23a   :  { %1534 = vmatpush.bf16.msra.mxu0 %v3216_v52  ;;  %1550 = vmatpush.bf16.msra.mxu1 %v3172_v41  ;;  %v3423_v41 = vor.u32 %v3878_v39, %v3420_v40  ;;  %v3860_v39 = vld [vmem:[#allocation7 + $0x54] sm:$0xf0] }
 0x23b   :  { %1575 = vmatpush.bf16.msra.mxu3 %v3196_v31  ;;  %1563 = vmatpush.bf16.msra.mxu2 %v3176_v42  ;;  %v3394_v42 = vld [vmem:[#allocation7 + $0xc0] sm:$0xf] }
 0x23e   :  { %1535 = vmatpush.bf16.msra.mxu0 %v3200_v5 }
 0x242   :  { %1536 = vmatpush.bf16.msra.mxu0 %v3184_v19 }
 0x246   :  { %1537 = vmatpush.bf16.msra.mxu0 %v3168_v37 }
 0x2b1   :  { %v1218_v62 = vpop.f32.mrf.mxu0  ;;  %v1231_v63 = vpop.f32.mrf.mxu1 }
 0x2b2   :  { %v1266_v0 = vadd.f32 %v1262_v46, %v1218_v62  ;;  %v1267_v1 = vadd.f32 %v1263_v47, %v1231_v63  ;;  %v3180_v47 = vor.u32 %v3818_v43, %v3177_v44  ;;  %v3875_v43 = vld [vmem:[#allocation7 + $0xcc] sm:$0xf0]  ;;  %v3873_v44 = vld [vmem:[#allocation7 + $0xc4] sm:$0xf] }
 0x2b4   :  { %v3162_v9 = vmul.f32 -1.442695, %v1266_v0  ;;  %v3163_v10 = vmul.f32 -1.442695, %v1267_v1  ;;  %1576 = vmatpush.bf16.msra.mxu3 %v3180_v47  ;;  %v3402_v47 = vld [vmem:[#allocation7 + $0xc8] sm:$0xf] }
 0x2b6   :  { %4002 = vpow2.f32 %v3162_v9 }
 0x2b7   :  { %4004 = vpow2.f32 %v3163_v10 }
 0x2b8   :  { %v1244_v28 = vpop.f32.mrf.mxu2  ;;  %v1257_v29 = vpop.f32.mrf.mxu3  ;;  %1890 = vmatpush.bf16.msrb.mxu3 %v3423_v41 }
 0x2b9   :  { %v1269_v34 = vadd.f32 %v1265_v11, %v1257_v29  ;;  %v1220_v35 = vpop.f32.mrf.mxu0  ;;  %v1233_v36 = vpop.f32.mrf.mxu1  ;;  %v1268_v59 = vadd.f32 %v1264_v55, %v1244_v28 }
 0x2ba   :  { %v3418_v35 = vld [vmem:[#allocation7 + $0xe8] sm:$0xf]  ;;  %v3880_v36 = vld [vmem:[#allocation7 + $0xf4] sm:$0xf0] }
 0x2bb   :  { %v3164_v45 = vmul.f32 -1.442695, %v1269_v34  ;;  %v3412_v34 = vld [vmem:[#allocation7 + $0xf0] sm:$0xf0]  ;;  %v3419_v38 = vor.u32 %v3880_v36, %v3418_v35  ;;  %v3857_v35 = vld [vmem:[#allocation7 + $0x44] sm:$0xf] }
 0x2bc   :  { %v4003_v46 = vpop.eup %4002  ;;  %v3415_v37 = vor.u32 %v3877_v32, %v3412_v34  ;;  %v3859_v34 = vld [vmem:[#allocation7 + $0x4c] sm:$0xf0] }
 0x2bd   :  { %v4005_v48 = vpop.eup %4004  ;;  %v1273_v49 = vadd.f32 1.0, %v4003_v46  ;;  %4006 = vpow2.f32 %v3164_v45  ;;  %1877 = vmatpush.bf16.msrb.mxu2 %v3419_v38  ;;  %v3395_v45 = vor.u32 %v3875_v43, %v3394_v42  ;;  %v3396_v46 = vld [vmem:[#allocation7 + $0xd0] sm:$0xf0]  ;;  %v3338_v38 = vld [vmem:[#allocation7 + $0x48] sm:$0xf]  ;;  %v1586_v42 = vld [vmem:[#allocation5 + $0x98] sm:$0xff] }
 0x2be   :  { %v1292_v50 = vadd.f32 1.0, %v4005_v48  ;;  %1864 = vmatpush.bf16.msrb.mxu1 %v3415_v37  ;;  %v3876_v48 = vld [vmem:[#allocation7 + $0xd4] sm:$0xf0]  ;;  %v3332_v37 = vld [vmem:[#allocation7 + $0x50] sm:$0xf0] }
 0x2bf   :  { %4008 = vrcp.f32 %v1273_v49  ;;  %v1285_v0 = vand.u32 2147483648, %v1273_v49  ;;  %v1283_v3 = vand.u32 2147483647, %v1273_v49  ;;  %vm1279_vm6 = vweird.f32 %v1273_v49 }
 0x2c0   :  { %4010 = vrcp.f32 %v1292_v50  ;;  %v1246_v51 = vpop.f32.mrf.mxu2  ;;  %v1259_v52 = vpop.f32.mrf.mxu3  ;;  %v1304_v1 = vand.u32 2147483648, %v1292_v50  ;;  %v1302_v5 = vand.u32 2147483647, %v1292_v50  ;;  %vm1298_vm7 = vweird.f32 %v1292_v50 }
 0x2c1   :  { %v1286_v8 = vor.u32 1.1754944e-38, %v1285_v0  ;;  %vm1284_vm10 = vcmp.eq.f32.partialorder %v1283_v3, 8.507059e+37  ;;  %v3874_v51 = vld [vmem:[#allocation7 + $0xcc] sm:$0xf]  ;;  %v3404_v52 = vld [vmem:[#allocation7 + $0xd8] sm:$0xf0]  ;;  %v3335_v43 = vor.u32 %v3857_v35, %v3332_v37 }
 0x2c2   :  { %v1305_v11 = vor.u32 1.1754944e-38, %v1304_v1  ;;  %vm1303_vm11 = vcmp.eq.f32.partialorder %v1302_v5, 8.507059e+37  ;;  %v3407_v55 = vor.u32 %v3874_v51, %v3404_v52  ;;  %v3870_v0 = vld [vmem:[#allocation7 + $0xac] sm:$0xf]  ;;  %v3388_v1 = vld [vmem:[#allocation7 + $0xb8] sm:$0xf0] }
 0x2c3   :  { %v4007_v56 = vpop.eup %4006  ;;  %v3362_v3 = vld [vmem:[#allocation7 + $0x80] sm:$0xf]  ;;  %v3865_v5 = vld [vmem:[#allocation7 + $0x84] sm:$0xf]  ;;  %v3316_v52 = vld [vmem:[#allocation7 + $0x30] sm:$0xf0] }
 0x2c4   :  { %v1312_v57 = vadd.f32 1.0, %v4007_v56  ;;  %v3378_v56 = vld [vmem:[#allocation7 + $0xa0] sm:$0xf]  ;;  %1891 = vmatpush.bf16.msrb.mxu3 %v3407_v55  ;;  %v3853_v51 = vld [vmem:[#allocation7 + $0x24] sm:$0xf] }
 0x2c5   :  { %v4009_v58 = vpop.eup %4008  ;;  %v3322_v55 = vld [vmem:[#allocation7 + $0x28] sm:$0xf] }
 0x2c6   :  { %v4011_v60 = vpop.eup %4010  ;;  %v1275_v61 = vmul.f32 %v4009_v58, %v1273_v49  ;;  %4012 = vrcp.f32 %v1312_v57  ;;  %vm1280_vm4 = vweird.f32 %v4009_v58  ;;  %v1324_v24 = vand.u32 2147483648, %v1312_v57 }
 0x2c7   :  { %v1294_v62 = vmul.f32 %v4011_v60, %v1292_v50  ;;  %4014 = vtanh.f32 %v1268_v59  ;;  %vm1299_vm5 = vweird.f32 %v4011_v60  ;;  %vm1281_vm8 = vmor %vm1279_vm6, %vm1280_vm4  ;;  %vm1318_vm13 = vweird.f32 %v1312_v57 }
 0x2c8   :  { %v1276_v63 = vsub.f32 1.0, %v1275_v61  ;;  %vm1300_vm9 = vmor %vm1298_vm7, %vm1299_vm5  ;;  %v1322_v25 = vand.u32 2147483647, %v1312_v57  ;;  %v1325_v27 = vor.u32 1.1754944e-38, %v1324_v24  ;;  %v3399_v49 = vor.u32 %v3873_v44, %v3396_v46  ;;  %v3386_v61 = vld [vmem:[#allocation7 + $0xa8] sm:$0xf] }
 0x2c9   :  { %v1295_v22 = vsub.f32 1.0, %v1294_v62  ;;  %v3403_v50 = vor.u32 %v3876_v48, %v3402_v47  ;;  %v3872_v62 = vld [vmem:[#allocation7 + $0xb4] sm:$0xf0]  ;;  %v3354_v24 = vld [vmem:[#allocation7 + $0x68] sm:$0xf]  ;;  %v3339_v44 = vor.u32 %v3860_v39, %v3338_v38 }
 0x2ca   :  { %v1277_v2 = vmul.f32 %v4009_v58, %v1276_v63  ;;  %vm1323_vm15 = vcmp.eq.f32.partialorder %v1322_v25, 8.507059e+37  ;;  %1865 = vmatpush.bf16.msrb.mxu1 %v3399_v49  ;;  %v3864_v25 = vld [vmem:[#allocation7 + $0x74] sm:$0xf0]  ;;  %v3340_v46 = vld [vmem:[#allocation7 + $0x58] sm:$0xf0] }
 0x2cb   :  { %v1296_v4 = vmul.f32 %v4011_v60, %v1295_v22  ;;  %1878 = vmatpush.bf16.msrb.mxu2 %v3403_v50  ;;  %v3387_v22 = vor.u32 %v3872_v62, %v3386_v61  ;;  %v3314_v47 = vld [vmem:[#allocation7 + $0x20] sm:$0xf]  ;;  %v3855_v48 = vld [vmem:[#allocation7 + $0x2c] sm:$0xf0] }
 0x2cc   :  { %v4013_v6 = vpop.eup %4012  ;;  %v1278_v7 = vadd.f32 %v4009_v58, %v1277_v2  ;;  %v3391_v2 = vor.u32 %v3870_v0, %v3388_v1  ;;  %v3315_v50 = vor.u32 %v3855_v48, %v3314_v47  ;;  %v3851_v0 = vld [vmem:[#allocation7 + $0xc] sm:$0xf0]  ;;  %v3849_v1 = vld [vmem:[#allocation7 + $0x4] sm:$0xf] }
 0x2cd   :  { %v1297_v9 = vadd.f32 %v4011_v60, %v1296_v4  ;;  %v1314_v10 = vmul.f32 %v4013_v6, %v1312_v57  ;;  %v4015_v13 = vpop.eup %4014  ;;  %vm1319_vm12 = vweird.f32 %v4013_v6  ;;  %v3871_v57 = vld [vmem:[#allocation7 + $0xac] sm:$0xf0] }
 0x2ce   :  { %v1282_v12 = vsel %vm1281_vm8, %v4009_v58, %v1278_v7  ;;  %vm1320_vm14 = vmor %vm1318_vm13, %vm1319_vm12  ;;  %v3869_v58 = vld [vmem:[#allocation7 + $0xa4] sm:$0xf]  ;;  %v3379_v59 = vor.u32 %v3871_v57, %v3378_v56  ;;  %v3867_v4 = vld [vmem:[#allocation7 + $0x8c] sm:$0xf0]  ;;  %1892 = vmatpush.bf16.msrb.mxu3 %v3391_v2  ;;  %v3319_v56 = vor.u32 %v3853_v51, %v3316_v52 }
 0x2cf   :  { %v1287_v14 = vsel %vm1284_vm10, %v1286_v8, %v1282_v12  ;;  %v1301_v15 = vsel %vm1300_vm9, %v4011_v60, %v1297_v9  ;;  %v1315_v16 = vsub.f32 1.0, %v1314_v10  ;;  %v3380_v60 = vld [vmem:[#allocation7 + $0xb0] sm:$0xf0]  ;;  %1879 = vmatpush.bf16.msrb.mxu2 %v3387_v22  ;;  %v3370_v8 = vld [vmem:[#allocation7 + $0x88] sm:$0xf] }
 0x2d0   :  { %v1306_v17 = vsel %vm1303_vm11, %v1305_v11, %v1301_v15  ;;  %v1330_v18 = vmul.f32 %v4015_v13, %v1287_v14  ;;  %v3383_v63 = vor.u32 %v3869_v58, %v3380_v60  ;;  %v3364_v7 = vld [vmem:[#allocation7 + $0x90] sm:$0xf0]  ;;  %v3868_v9 = vld [vmem:[#allocation7 + $0x94] sm:$0xf0]  ;;  %v3866_v12 = vld [vmem:[#allocation7 + $0x8c] sm:$0xf] }
 0x2d1   :  { %v1329_v19 = vmul.f32 %v1306_v17, %v4183_v53  ;;  %v1316_v20 = vmul.f32 %v4013_v6, %v1315_v16  ;;  %v3410_v53 = vld [vmem:[#allocation7 + $0xe0] sm:$0xf]  ;;  %v3367_v10 = vor.u32 %v3865_v5, %v3364_v7  ;;  %v3371_v11 = vor.u32 %v3868_v9, %v3370_v8  ;;  %v3372_v13 = vld [vmem:[#allocation7 + $0x98] sm:$0xf0]  ;;  %v1584_v15 = vld [vmem:[#allocation5 + $0x88] sm:$0xff] }
 0x2d2   :  { %v3411_v33 = vor.u32 %v3879_v54, %v3410_v53  ;;  %1866 = vmatpush.bf16.msrb.mxu1 %v3383_v63  ;;  %v1583_v14 = vld [vmem:[#allocation5 + $0x80] sm:$0xff]  ;;  %v3375_v16 = vor.u32 %v3866_v12, %v3372_v13  ;;  %v3856_v57 = vld [vmem:[#allocation7 + $0x34] sm:$0xf0]  ;;  %v3854_v58 = vld [vmem:[#allocation7 + $0x2c] sm:$0xf] }
 0x2d3   :  { %v4187_v21 = vadd.f32 %v1330_v18, %v1329_v19  ;;  %v1317_v23 = vadd.f32 %v4013_v6, %v1316_v20  ;;  %1880 = vmatpush.bf16.msrb.mxu2 %v3371_v11  ;;  %v3346_v17 = vld [vmem:[#allocation7 + $0x60] sm:$0xf]  ;;  %v3863_v18 = vld [vmem:[#allocation7 + $0x6c] sm:$0xf0]  ;;  %v3861_v19 = vld [vmem:[#allocation7 + $0x64] sm:$0xf]  ;;  %v3323_v62 = vor.u32 %v3856_v57, %v3322_v55 }
 0x2d4   :  { %1851 = vmatpush.bf16.msrb.mxu0 %v3411_v33  ;;  %1893 = vmatpush.bf16.msrb.mxu3 %v3375_v16  ;;  %v3347_v20 = vor.u32 %v3863_v18, %v3346_v17  ;;  %v3330_v33 = vld [vmem:[#allocation7 + $0x40] sm:$0xf]  ;;  %v3306_v7 = vld [vmem:[#allocation7 + $0x8] sm:$0xf]  ;;  %v3852_v8 = vld [vmem:[#allocation7 + $0x14] sm:$0xf0] }
 0x2d5   :  { %4016 = vtanh.f32 %v4187_v21  ;;  %v1321_v26 = vsel %vm1320_vm14, %v4013_v6, %v1317_v23  ;;  %v3363_v6 = vor.u32 %v3867_v4, %v3362_v3  ;;  %v3348_v23 = vld [vmem:[#allocation7 + $0x70] sm:$0xf0]  ;;  %v3331_v36 = vor.u32 %v3859_v34, %v3330_v33  ;;  %v3298_v22 = vld [vmem:[#allocation7] sm:$0xf]  ;;  %v3850_v11 = vld [vmem:[#allocation7 + $0xc] sm:$0xf] }
 0x2d6   :  { %v1326_v29 = vsel %vm1323_vm15, %v1325_v27, %v1321_v26  ;;  %1867 = vmatpush.bf16.msrb.mxu1 %v3367_v10  ;;  %v3351_v26 = vor.u32 %v3861_v19, %v3348_v23  ;;  %v3355_v27 = vor.u32 %v3864_v25, %v3354_v24  ;;  %v3299_v5 = vor.u32 %v3851_v0, %v3298_v22  ;;  %v3308_v12 = vld [vmem:[#allocation7 + $0x18] sm:$0xf0]  ;;  %v1585_v23 = vld [vmem:[#allocation5 + $0x90] sm:$0xff]  ;;  %v3909_v0 = vld [vmem:[#allocation7 + $0xe4] sm:$0xf] }
 0x2d7   :  { %v3307_v10 = vor.u32 %v3852_v8, %v3306_v7  ;;  %v3911_v22 = vld [vmem:[#allocation7 + $0xec] sm:$0xf0]  ;;  %v3910_v7 = vld [vmem:[#allocation7 + $0xec] sm:$0xf]  ;;  %v3551_v8 = vld [vmem:[#allocation7 + $0xf8] sm:$0xf0] }
 0x2d8   :  { %1852 = vmatpush.bf16.msrb.mxu0 %v3395_v45  ;;  %1881 = vmatpush.bf16.msrb.mxu2 %v3355_v27  ;;  %v3858_v45 = vld [vmem:[#allocation7 + $0x4c] sm:$0xf] }
 0x2d9   :  { %v3343_v49 = vor.u32 %v3858_v45, %v3340_v46 }
 0x2da   :  { %1868 = vmatpush.bf16.msrb.mxu1 %v3351_v26 }
 0x2db   :  { %v4017_v28 = vpop.eup %4016 }
 0x2dc   :  { %v1334_v30 = vmul.f32 %v4017_v28, %v1326_v29  ;;  %1853 = vmatpush.bf16.msrb.mxu0 %v3379_v59  ;;  %v3862_v28 = vld [vmem:[#allocation7 + $0x6c] sm:$0xf]  ;;  %v3356_v29 = vld [vmem:[#allocation7 + $0x78] sm:$0xf0]  ;;  %1882 = vmatpush.bf16.msrb.mxu2 %v3339_v44 }
 0x2dd   :  { %v3359_v53 = vor.u32 %v3862_v28, %v3356_v29  ;;  %v3324_v59 = vld [vmem:[#allocation7 + $0x38] sm:$0xf0] }
 0x2de   :  { %v1337_v31 = vpack.c.bf16 %v1334_v30, %v1334_v30  ;;  %1869 = vmatpush.bf16.msrb.mxu1 %v3335_v43  ;;  %v3327_v63 = vor.u32 %v3854_v58, %v3324_v59 }
 0x2df   :  { %1894 = vmatpush.bf16.msrb.mxu3 %v3359_v53 }
 0x2e0   :  { %1538 = vmatmul.bf16.vlgmr.msra.gmra.mxu0 %v1337_v31  ;;  %1551 = vmatmul.bf16.vlgmr.msra.gmra.mxu1 %v1337_v31 }
 0x2e1   :  { %1564 = vmatmul.bf16.vlgmr.msra.gmra.mxu2 %v1337_v31  ;;  %1577 = vmatmul.bf16.vlgmr.msra.gmra.mxu3 %v1337_v31 }
 0x2e2   :  { %1854 = vmatpush.bf16.msrb.mxu0 %v3363_v6  ;;  %v3300_v6 = vld [vmem:[#allocation7 + $0x10] sm:$0xf0]  ;;  %1870 = vmatpush.bf16.msrb.mxu1 %v3319_v56 }
 0x2e3   :  { %1895 = vmatpush.bf16.msrb.mxu3 %v3343_v49  ;;  %1883 = vmatpush.bf16.msrb.mxu2 %v3323_v62  ;;  %v3303_v9 = vor.u32 %v3849_v1, %v3300_v6 }
 0x2e6   :  { %1855 = vmatpush.bf16.msrb.mxu0 %v3347_v20  ;;  %1871 = vmatpush.bf16.msrb.mxu1 %v3303_v9  ;;  %v3554_v9 = vor.u32 %v3910_v7, %v3551_v8  ;;  %v3892_v7 = vld [vmem:[#allocation7 + $0x54] sm:$0xf0] }
 0x2e7   :  { %1896 = vmatpush.bf16.msrb.mxu3 %v3327_v63  ;;  %1884 = vmatpush.bf16.msrb.mxu2 %v3307_v10  ;;  %v3525_v10 = vld [vmem:[#allocation7 + $0xc0] sm:$0xf] }
 0x2ea   :  { %1856 = vmatpush.bf16.msrb.mxu0 %v3331_v36 }
 0x2ee   :  { %1857 = vmatpush.bf16.msrb.mxu0 %v3315_v50 }
 0x2f2   :  { %1858 = vmatpush.bf16.msrb.mxu0 %v3299_v5 }
 0x35d   :  { %v1539_v30 = vpop.f32.mrf.mxu0  ;;  %v1552_v31 = vpop.f32.mrf.mxu1 }
 0x35e   :  { %v1587_v54 = vadd.f32 %v1583_v14, %v1539_v30  ;;  %v1588_v32 = vadd.f32 %v1584_v15, %v1552_v31  ;;  %v3311_v15 = vor.u32 %v3850_v11, %v3308_v12  ;;  %v3907_v11 = vld [vmem:[#allocation7 + $0xcc] sm:$0xf0]  ;;  %v3905_v12 = vld [vmem:[#allocation7 + $0xc4] sm:$0xf] }
 0x360   :  { %v3293_v40 = vmul.f32 -1.442695, %v1587_v54  ;;  %v3294_v41 = vmul.f32 -1.442695, %v1588_v32  ;;  %1897 = vmatpush.bf16.msrb.mxu3 %v3311_v15  ;;  %v3533_v15 = vld [vmem:[#allocation7 + $0xc8] sm:$0xf] }
 0x362   :  { %4018 = vpow2.f32 %v3293_v40 }
 0x363   :  { %4020 = vpow2.f32 %v3294_v41 }
 0x364   :  { %v1565_v60 = vpop.f32.mrf.mxu2  ;;  %v1578_v61 = vpop.f32.mrf.mxu3  ;;  %2211 = vmatpush.bf16.msra.mxu3 %v3554_v9 }
 0x365   :  { %v1590_v2 = vadd.f32 %v1586_v42, %v1578_v61  ;;  %v1541_v3 = vpop.f32.mrf.mxu0  ;;  %v1554_v4 = vpop.f32.mrf.mxu1  ;;  %v1589_v27 = vadd.f32 %v1585_v23, %v1565_v60 }
 0x366   :  { %v3549_v3 = vld [vmem:[#allocation7 + $0xe8] sm:$0xf]  ;;  %v3912_v4 = vld [vmem:[#allocation7 + $0xf4] sm:$0xf0] }
 0x367   :  { %v3295_v13 = vmul.f32 -1.442695, %v1590_v2  ;;  %v3543_v2 = vld [vmem:[#allocation7 + $0xf0] sm:$0xf0]  ;;  %v3550_v6 = vor.u32 %v3912_v4, %v3549_v3  ;;  %v3889_v3 = vld [vmem:[#allocation7 + $0x44] sm:$0xf] }
 0x368   :  { %v4019_v14 = vpop.eup %4018  ;;  %v3546_v5 = vor.u32 %v3909_v0, %v3543_v2  ;;  %v3891_v2 = vld [vmem:[#allocation7 + $0x4c] sm:$0xf0] }
 0x369   :  { %v4021_v16 = vpop.eup %4020  ;;  %v1594_v17 = vadd.f32 1.0, %v4019_v14  ;;  %4022 = vpow2.f32 %v3295_v13  ;;  %2198 = vmatpush.bf16.msra.mxu2 %v3550_v6  ;;  %v3526_v13 = vor.u32 %v3907_v11, %v3525_v10  ;;  %v3527_v14 = vld [vmem:[#allocation7 + $0xd0] sm:$0xf0]  ;;  %v3469_v6 = vld [vmem:[#allocation7 + $0x48] sm:$0xf]  ;;  %v1907_v10 = vld [vmem:[#allocation5 + $0xb8] sm:$0xff] }
 0x36a   :  { %v1613_v18 = vadd.f32 1.0, %v4021_v16  ;;  %2185 = vmatpush.bf16.msra.mxu1 %v3546_v5  ;;  %v3908_v16 = vld [vmem:[#allocation7 + $0xd4] sm:$0xf0]  ;;  %v3463_v5 = vld [vmem:[#allocation7 + $0x50] sm:$0xf0] }
 0x36b   :  { %4024 = vrcp.f32 %v1594_v17  ;;  %v1606_v54 = vand.u32 2147483648, %v1594_v17  ;;  %v1604_v34 = vand.u32 2147483647, %v1594_v17  ;;  %vm1600_vm2 = vweird.f32 %v1594_v17 }
 0x36c   :  { %4026 = vrcp.f32 %v1613_v18  ;;  %v1567_v19 = vpop.f32.mrf.mxu2  ;;  %v1580_v20 = vpop.f32.mrf.mxu3  ;;  %v1625_v32 = vand.u32 2147483648, %v1613_v18  ;;  %v1623_v36 = vand.u32 2147483647, %v1613_v18  ;;  %vm1619_vm3 = vweird.f32 %v1613_v18 }
 0x36d   :  { %v1607_v39 = vor.u32 1.1754944e-38, %v1606_v54  ;;  %vm1605_vm6 = vcmp.eq.f32.partialorder %v1604_v34, 8.507059e+37  ;;  %v3906_v19 = vld [vmem:[#allocation7 + $0xcc] sm:$0xf]  ;;  %v3535_v20 = vld [vmem:[#allocation7 + $0xd8] sm:$0xf0]  ;;  %v3466_v11 = vor.u32 %v3889_v3, %v3463_v5 }
 0x36e   :  { %v1626_v42 = vor.u32 1.1754944e-38, %v1625_v32  ;;  %vm1624_vm7 = vcmp.eq.f32.partialorder %v1623_v36, 8.507059e+37  ;;  %v3538_v23 = vor.u32 %v3906_v19, %v3535_v20  ;;  %v3902_v54 = vld [vmem:[#allocation7 + $0xac] sm:$0xf]  ;;  %v3519_v32 = vld [vmem:[#allocation7 + $0xb8] sm:$0xf0] }
 0x36f   :  { %v4023_v24 = vpop.eup %4022  ;;  %v3493_v34 = vld [vmem:[#allocation7 + $0x80] sm:$0xf]  ;;  %v3897_v36 = vld [vmem:[#allocation7 + $0x84] sm:$0xf]  ;;  %v3447_v20 = vld [vmem:[#allocation7 + $0x30] sm:$0xf0] }
 0x370   :  { %v1633_v25 = vadd.f32 1.0, %v4023_v24  ;;  %v3509_v24 = vld [vmem:[#allocation7 + $0xa0] sm:$0xf]  ;;  %2212 = vmatpush.bf16.msra.mxu3 %v3538_v23  ;;  %v3885_v19 = vld [vmem:[#allocation7 + $0x24] sm:$0xf] }
 0x371   :  { %v4025_v26 = vpop.eup %4024  ;;  %v3453_v23 = vld [vmem:[#allocation7 + $0x28] sm:$0xf] }
 0x372   :  { %v4027_v28 = vpop.eup %4026  ;;  %v1596_v29 = vmul.f32 %v4025_v26, %v1594_v17  ;;  %4028 = vrcp.f32 %v1633_v25  ;;  %vm1601_vm0 = vweird.f32 %v4025_v26  ;;  %v1645_v56 = vand.u32 2147483648, %v1633_v25 }
 0x373   :  { %v1615_v30 = vmul.f32 %v4027_v28, %v1613_v18  ;;  %4030 = vtanh.f32 %v1589_v27  ;;  %vm1620_vm1 = vweird.f32 %v4027_v28  ;;  %vm1602_vm4 = vmor %vm1600_vm2, %vm1601_vm0  ;;  %vm1639_vm9 = vweird.f32 %v1633_v25 }
 0x374   :  { %v1597_v31 = vsub.f32 1.0, %v1596_v29  ;;  %vm1621_vm5 = vmor %vm1619_vm3, %vm1620_vm1  ;;  %v1643_v57 = vand.u32 2147483647, %v1633_v25  ;;  %v1646_v59 = vor.u32 1.1754944e-38, %v1645_v56  ;;  %v3530_v17 = vor.u32 %v3905_v12, %v3527_v14  ;;  %v3517_v29 = vld [vmem:[#allocation7 + $0xa8] sm:$0xf] }
 0x375   :  { %v1616_v53 = vsub.f32 1.0, %v1615_v30  ;;  %v3534_v18 = vor.u32 %v3908_v16, %v3533_v15  ;;  %v3904_v30 = vld [vmem:[#allocation7 + $0xb4] sm:$0xf0]  ;;  %v3485_v56 = vld [vmem:[#allocation7 + $0x68] sm:$0xf]  ;;  %v3470_v12 = vor.u32 %v3892_v7, %v3469_v6 }
 0x376   :  { %v1598_v33 = vmul.f32 %v4025_v26, %v1597_v31  ;;  %vm1644_vm11 = vcmp.eq.f32.partialorder %v1643_v57, 8.507059e+37  ;;  %2186 = vmatpush.bf16.msra.mxu1 %v3530_v17  ;;  %v3896_v57 = vld [vmem:[#allocation7 + $0x74] sm:$0xf0]  ;;  %v3471_v14 = vld [vmem:[#allocation7 + $0x58] sm:$0xf0] }
 0x377   :  { %v1617_v35 = vmul.f32 %v4027_v28, %v1616_v53  ;;  %2199 = vmatpush.bf16.msra.mxu2 %v3534_v18  ;;  %v3518_v53 = vor.u32 %v3904_v30, %v3517_v29  ;;  %v3445_v15 = vld [vmem:[#allocation7 + $0x20] sm:$0xf]  ;;  %v3887_v16 = vld [vmem:[#allocation7 + $0x2c] sm:$0xf0] }
 0x378   :  { %v4029_v37 = vpop.eup %4028  ;;  %v1599_v38 = vadd.f32 %v4025_v26, %v1598_v33  ;;  %v3522_v33 = vor.u32 %v3902_v54, %v3519_v32  ;;  %v3446_v18 = vor.u32 %v3887_v16, %v3445_v15  ;;  %v3883_v54 = vld [vmem:[#allocation7 + $0xc] sm:$0xf0]  ;;  %v3881_v32 = vld [vmem:[#allocation7 + $0x4] sm:$0xf] }
 0x379   :  { %v1618_v40 = vadd.f32 %v4027_v28, %v1617_v35  ;;  %v1635_v41 = vmul.f32 %v4029_v37, %v1633_v25  ;;  %v4031_v44 = vpop.eup %4030  ;;  %vm1640_vm8 = vweird.f32 %v4029_v37  ;;  %v3903_v25 = vld [vmem:[#allocation7 + $0xac] sm:$0xf0] }
 0x37a   :  { %v1603_v43 = vsel %vm1602_vm4, %v4025_v26, %v1599_v38  ;;  %vm1641_vm10 = vmor %vm1639_vm9, %vm1640_vm8  ;;  %v3901_v26 = vld [vmem:[#allocation7 + $0xa4] sm:$0xf]  ;;  %v3510_v27 = vor.u32 %v3903_v25, %v3509_v24  ;;  %v3899_v35 = vld [vmem:[#allocation7 + $0x8c] sm:$0xf0]  ;;  %2213 = vmatpush.bf16.msra.mxu3 %v3522_v33  ;;  %v3450_v24 = vor.u32 %v3885_v19, %v3447_v20 }
 0x37b   :  { %v1608_v45 = vsel %vm1605_vm6, %v1607_v39, %v1603_v43  ;;  %v1622_v46 = vsel %vm1621_vm5, %v4027_v28, %v1618_v40  ;;  %v1636_v47 = vsub.f32 1.0, %v1635_v41  ;;  %v3511_v28 = vld [vmem:[#allocation7 + $0xb0] sm:$0xf0]  ;;  %2200 = vmatpush.bf16.msra.mxu2 %v3518_v53  ;;  %v3501_v39 = vld [vmem:[#allocation7 + $0x88] sm:$0xf] }
 0x37c   :  { %v1627_v48 = vsel %vm1624_vm7, %v1626_v42, %v1622_v46  ;;  %v1651_v49 = vmul.f32 %v4031_v44, %v1608_v45  ;;  %v3514_v31 = vor.u32 %v3901_v26, %v3511_v28  ;;  %v3495_v38 = vld [vmem:[#allocation7 + $0x90] sm:$0xf0]  ;;  %v3900_v40 = vld [vmem:[#allocation7 + $0x94] sm:$0xf0]  ;;  %v3898_v43 = vld [vmem:[#allocation7 + $0x8c] sm:$0xf] }
 0x37d   :  { %v1650_v50 = vmul.f32 %v1627_v48, %v4187_v21  ;;  %v1637_v51 = vmul.f32 %v4029_v37, %v1636_v47  ;;  %v3541_v21 = vld [vmem:[#allocation7 + $0xe0] sm:$0xf]  ;;  %v3498_v41 = vor.u32 %v3897_v36, %v3495_v38  ;;  %v3502_v42 = vor.u32 %v3900_v40, %v3501_v39  ;;  %v3503_v44 = vld [vmem:[#allocation7 + $0x98] sm:$0xf0]  ;;  %v1905_v46 = vld [vmem:[#allocation5 + $0xa8] sm:$0xff] }
 0x37e   :  { %v3542_v1 = vor.u32 %v3911_v22, %v3541_v21  ;;  %2187 = vmatpush.bf16.msra.mxu1 %v3514_v31  ;;  %v1904_v45 = vld [vmem:[#allocation5 + $0xa0] sm:$0xff]  ;;  %v3506_v47 = vor.u32 %v3898_v43, %v3503_v44  ;;  %v3888_v25 = vld [vmem:[#allocation7 + $0x34] sm:$0xf0]  ;;  %v3886_v26 = vld [vmem:[#allocation7 + $0x2c] sm:$0xf] }
 0x37f   :  { %v4191_v52 = vadd.f32 %v1651_v49, %v1650_v50  ;;  %v1638_v55 = vadd.f32 %v4029_v37, %v1637_v51  ;;  %2201 = vmatpush.bf16.msra.mxu2 %v3502_v42  ;;  %v3477_v48 = vld [vmem:[#allocation7 + $0x60] sm:$0xf]  ;;  %v3895_v49 = vld [vmem:[#allocation7 + $0x6c] sm:$0xf0]  ;;  %v3893_v50 = vld [vmem:[#allocation7 + $0x64] sm:$0xf]  ;;  %v3454_v30 = vor.u32 %v3888_v25, %v3453_v23 }
 0x380   :  { %2172 = vmatpush.bf16.msra.mxu0 %v3542_v1  ;;  %2214 = vmatpush.bf16.msra.mxu3 %v3506_v47  ;;  %v3478_v51 = vor.u32 %v3895_v49, %v3477_v48  ;;  %v3461_v1 = vld [vmem:[#allocation7 + $0x40] sm:$0xf]  ;;  %v3437_v38 = vld [vmem:[#allocation7 + $0x8] sm:$0xf]  ;;  %v3884_v39 = vld [vmem:[#allocation7 + $0x14] sm:$0xf0] }
 0x381   :  { %4032 = vtanh.f32 %v4191_v52  ;;  %v1642_v58 = vsel %vm1641_vm10, %v4029_v37, %v1638_v55  ;;  %v3494_v37 = vor.u32 %v3899_v35, %v3493_v34  ;;  %v3479_v55 = vld [vmem:[#allocation7 + $0x70] sm:$0xf0]  ;;  %v3462_v4 = vor.u32 %v3891_v2, %v3461_v1  ;;  %v3429_v53 = vld [vmem:[#allocation7] sm:$0xf]  ;;  %v3882_v42 = vld [vmem:[#allocation7 + $0xc] sm:$0xf] }
 0x382   :  { %v1647_v61 = vsel %vm1644_vm11, %v1646_v59, %v1642_v58  ;;  %2188 = vmatpush.bf16.msra.mxu1 %v3498_v41  ;;  %v3482_v58 = vor.u32 %v3893_v50, %v3479_v55  ;;  %v3486_v59 = vor.u32 %v3896_v57, %v3485_v56  ;;  %v3430_v36 = vor.u32 %v3883_v54, %v3429_v53  ;;  %v3439_v43 = vld [vmem:[#allocation7 + $0x18] sm:$0xf0]  ;;  %v1906_v55 = vld [vmem:[#allocation5 + $0xb0] sm:$0xff]  ;;  %v3941_v54 = vld [vmem:[#allocation7 + $0xe4] sm:$0xf] }
 0x383   :  { %v3438_v41 = vor.u32 %v3884_v39, %v3437_v38  ;;  %v3943_v53 = vld [vmem:[#allocation7 + $0xec] sm:$0xf0]  ;;  %v3942_v38 = vld [vmem:[#allocation7 + $0xec] sm:$0xf]  ;;  %v3682_v39 = vld [vmem:[#allocation7 + $0xf8] sm:$0xf0] }
 0x384   :  { %2173 = vmatpush.bf16.msra.mxu0 %v3526_v13  ;;  %2202 = vmatpush.bf16.msra.mxu2 %v3486_v59  ;;  %v3890_v13 = vld [vmem:[#allocation7 + $0x4c] sm:$0xf] }
 0x385   :  { %v3474_v17 = vor.u32 %v3890_v13, %v3471_v14 }
 0x386   :  { %2189 = vmatpush.bf16.msra.mxu1 %v3482_v58 }
 0x387   :  { %v4033_v60 = vpop.eup %4032 }
 0x388   :  { %v1655_v62 = vmul.f32 %v4033_v60, %v1647_v61  ;;  %2174 = vmatpush.bf16.msra.mxu0 %v3510_v27  ;;  %v3894_v60 = vld [vmem:[#allocation7 + $0x6c] sm:$0xf]  ;;  %v3487_v61 = vld [vmem:[#allocation7 + $0x78] sm:$0xf0]  ;;  %2203 = vmatpush.bf16.msra.mxu2 %v3470_v12 }
 0x389   :  { %v3490_v21 = vor.u32 %v3894_v60, %v3487_v61  ;;  %v3455_v27 = vld [vmem:[#allocation7 + $0x38] sm:$0xf0] }
 0x38a   :  { %v1658_v63 = vpack.c.bf16 %v1655_v62, %v1655_v62  ;;  %2190 = vmatpush.bf16.msra.mxu1 %v3466_v11  ;;  %v3458_v31 = vor.u32 %v3886_v26, %v3455_v27 }
 0x38b   :  { %2215 = vmatpush.bf16.msra.mxu3 %v3490_v21 }
 0x38c   :  { %1859 = vmatmul.bf16.vlgmr.msrb.gmra.mxu0 %v1658_v63  ;;  %1872 = vmatmul.bf16.vlgmr.msrb.gmra.mxu1 %v1658_v63 }
 0x38d   :  { %1885 = vmatmul.bf16.vlgmr.msrb.gmra.mxu2 %v1658_v63  ;;  %1898 = vmatmul.bf16.vlgmr.msrb.gmra.mxu3 %v1658_v63 }
 0x38e   :  { %2175 = vmatpush.bf16.msra.mxu0 %v3494_v37  ;;  %v3431_v37 = vld [vmem:[#allocation7 + $0x10] sm:$0xf0]  ;;  %2191 = vmatpush.bf16.msra.mxu1 %v3450_v24 }
 0x38f   :  { %2216 = vmatpush.bf16.msra.mxu3 %v3474_v17  ;;  %2204 = vmatpush.bf16.msra.mxu2 %v3454_v30  ;;  %v3434_v40 = vor.u32 %v3881_v32, %v3431_v37 }
 0x392   :  { %2176 = vmatpush.bf16.msra.mxu0 %v3478_v51  ;;  %2192 = vmatpush.bf16.msra.mxu1 %v3434_v40  ;;  %v3685_v40 = vor.u32 %v3942_v38, %v3682_v39  ;;  %v3924_v38 = vld [vmem:[#allocation7 + $0x54] sm:$0xf0] }
 0x393   :  { %2217 = vmatpush.bf16.msra.mxu3 %v3458_v31  ;;  %2205 = vmatpush.bf16.msra.mxu2 %v3438_v41  ;;  %v3656_v41 = vld [vmem:[#allocation7 + $0xc0] sm:$0xf] }
 0x396   :  { %2177 = vmatpush.bf16.msra.mxu0 %v3462_v4 }
 0x39a   :  { %2178 = vmatpush.bf16.msra.mxu0 %v3446_v18 }
 0x39e   :  { %2179 = vmatpush.bf16.msra.mxu0 %v3430_v36 }
 0x409   :  { %v1860_v62 = vpop.f32.mrf.mxu0  ;;  %v1873_v63 = vpop.f32.mrf.mxu1 }
 0x40a   :  { %v1908_v22 = vadd.f32 %v1904_v45, %v1860_v62  ;;  %v1909_v0 = vadd.f32 %v1905_v46, %v1873_v63  ;;  %v3442_v46 = vor.u32 %v3882_v42, %v3439_v43  ;;  %v3939_v42 = vld [vmem:[#allocation7 + $0xcc] sm:$0xf0]  ;;  %v3937_v43 = vld [vmem:[#allocation7 + $0xc4] sm:$0xf] }
 0x40c   :  { %v3424_v8 = vmul.f32 -1.442695, %v1908_v22  ;;  %v3425_v9 = vmul.f32 -1.442695, %v1909_v0  ;;  %2218 = vmatpush.bf16.msra.mxu3 %v3442_v46  ;;  %v3664_v46 = vld [vmem:[#allocation7 + $0xc8] sm:$0xf] }
 0x40e   :  { %4034 = vpow2.f32 %v3424_v8 }
 0x40f   :  { %4036 = vpow2.f32 %v3425_v9 }
 0x410   :  { %v1886_v28 = vpop.f32.mrf.mxu2  ;;  %v1899_v29 = vpop.f32.mrf.mxu3  ;;  %2532 = vmatpush.bf16.msrb.mxu3 %v3685_v40 }
 0x411   :  { %v1911_v33 = vadd.f32 %v1907_v10, %v1899_v29  ;;  %v1862_v34 = vpop.f32.mrf.mxu0  ;;  %v1875_v35 = vpop.f32.mrf.mxu1  ;;  %v1910_v59 = vadd.f32 %v1906_v55, %v1886_v28 }
 0x412   :  { %v3680_v34 = vld [vmem:[#allocation7 + $0xe8] sm:$0xf]  ;;  %v3944_v35 = vld [vmem:[#allocation7 + $0xf4] sm:$0xf0] }
 0x413   :  { %v3426_v44 = vmul.f32 -1.442695, %v1911_v33  ;;  %v3674_v33 = vld [vmem:[#allocation7 + $0xf0] sm:$0xf0]  ;;  %v3681_v37 = vor.u32 %v3944_v35, %v3680_v34  ;;  %v3921_v34 = vld [vmem:[#allocation7 + $0x44] sm:$0xf] }
 0x414   :  { %v4035_v45 = vpop.eup %4034  ;;  %v3677_v36 = vor.u32 %v3941_v54, %v3674_v33  ;;  %v3923_v33 = vld [vmem:[#allocation7 + $0x4c] sm:$0xf0] }
 0x415   :  { %v4037_v47 = vpop.eup %4036  ;;  %v1915_v48 = vadd.f32 1.0, %v4035_v45  ;;  %4038 = vpow2.f32 %v3426_v44  ;;  %2519 = vmatpush.bf16.msrb.mxu2 %v3681_v37  ;;  %v3657_v44 = vor.u32 %v3939_v42, %v3656_v41  ;;  %v3658_v45 = vld [vmem:[#allocation7 + $0xd0] sm:$0xf0]  ;;  %v3600_v37 = vld [vmem:[#allocation7 + $0x48] sm:$0xf]  ;;  %v2228_v41 = vld [vmem:[#allocation5 + $0xd8] sm:$0xff] }
 0x416   :  { %v1934_v49 = vadd.f32 1.0, %v4037_v47  ;;  %2506 = vmatpush.bf16.msrb.mxu1 %v3677_v36  ;;  %v3940_v47 = vld [vmem:[#allocation7 + $0xd4] sm:$0xf0]  ;;  %v3594_v36 = vld [vmem:[#allocation7 + $0x50] sm:$0xf0] }
 0x417   :  { %4040 = vrcp.f32 %v1915_v48  ;;  %v1927_v22 = vand.u32 2147483648, %v1915_v48  ;;  %v1925_v2 = vand.u32 2147483647, %v1915_v48  ;;  %vm1921_vm14 = vweird.f32 %v1915_v48 }
 0x418   :  { %4042 = vrcp.f32 %v1934_v49  ;;  %v1888_v50 = vpop.f32.mrf.mxu2  ;;  %v1901_v51 = vpop.f32.mrf.mxu3  ;;  %v1946_v0 = vand.u32 2147483648, %v1934_v49  ;;  %v1944_v4 = vand.u32 2147483647, %v1934_v49  ;;  %vm1940_vm15 = vweird.f32 %v1934_v49 }
 0x419   :  { %v1928_v7 = vor.u32 1.1754944e-38, %v1927_v22  ;;  %vm1926_vm2 = vcmp.eq.f32.partialorder %v1925_v2, 8.507059e+37  ;;  %v3938_v50 = vld [vmem:[#allocation7 + $0xcc] sm:$0xf]  ;;  %v3666_v51 = vld [vmem:[#allocation7 + $0xd8] sm:$0xf0]  ;;  %v3597_v42 = vor.u32 %v3921_v34, %v3594_v36 }
 0x41a   :  { %v1947_v10 = vor.u32 1.1754944e-38, %v1946_v0  ;;  %vm1945_vm3 = vcmp.eq.f32.partialorder %v1944_v4, 8.507059e+37  ;;  %v3669_v55 = vor.u32 %v3938_v50, %v3666_v51  ;;  %v3934_v22 = vld [vmem:[#allocation7 + $0xac] sm:$0xf]  ;;  %v3650_v0 = vld [vmem:[#allocation7 + $0xb8] sm:$0xf0] }
 0x41b   :  { %v4039_v56 = vpop.eup %4038  ;;  %v3624_v2 = vld [vmem:[#allocation7 + $0x80] sm:$0xf]  ;;  %v3929_v4 = vld [vmem:[#allocation7 + $0x84] sm:$0xf]  ;;  %v3578_v51 = vld [vmem:[#allocation7 + $0x30] sm:$0xf0] }
 0x41c   :  { %v1954_v57 = vadd.f32 1.0, %v4039_v56  ;;  %v3640_v56 = vld [vmem:[#allocation7 + $0xa0] sm:$0xf]  ;;  %2533 = vmatpush.bf16.msrb.mxu3 %v3669_v55  ;;  %v3917_v50 = vld [vmem:[#allocation7 + $0x24] sm:$0xf] }
 0x41d   :  { %v4041_v58 = vpop.eup %4040  ;;  %v3584_v55 = vld [vmem:[#allocation7 + $0x28] sm:$0xf] }
 0x41e   :  { %v4043_v60 = vpop.eup %4042  ;;  %v1917_v61 = vmul.f32 %v4041_v58, %v1915_v48  ;;  %4044 = vrcp.f32 %v1954_v57  ;;  %vm1922_vm12 = vweird.f32 %v4041_v58  ;;  %v1966_v24 = vand.u32 2147483648, %v1954_v57 }
 0x41f   :  { %v1936_v62 = vmul.f32 %v4043_v60, %v1934_v49  ;;  %4046 = vtanh.f32 %v1910_v59  ;;  %vm1941_vm13 = vweird.f32 %v4043_v60  ;;  %vm1923_vm0 = vmor %vm1921_vm14, %vm1922_vm12  ;;  %vm1960_vm5 = vweird.f32 %v1954_v57 }
 0x420   :  { %v1918_v63 = vsub.f32 1.0, %v1917_v61  ;;  %vm1942_vm1 = vmor %vm1940_vm15, %vm1941_vm13  ;;  %v1964_v25 = vand.u32 2147483647, %v1954_v57  ;;  %v1967_v27 = vor.u32 1.1754944e-38, %v1966_v24  ;;  %v3661_v48 = vor.u32 %v3937_v43, %v3658_v45  ;;  %v3648_v61 = vld [vmem:[#allocation7 + $0xa8] sm:$0xf] }
 0x421   :  { %v1937_v21 = vsub.f32 1.0, %v1936_v62  ;;  %v3665_v49 = vor.u32 %v3940_v47, %v3664_v46  ;;  %v3936_v62 = vld [vmem:[#allocation7 + $0xb4] sm:$0xf0]  ;;  %v3616_v24 = vld [vmem:[#allocation7 + $0x68] sm:$0xf]  ;;  %v3601_v43 = vor.u32 %v3924_v38, %v3600_v37 }
 0x422   :  { %v1919_v1 = vmul.f32 %v4041_v58, %v1918_v63  ;;  %vm1965_vm7 = vcmp.eq.f32.partialorder %v1964_v25, 8.507059e+37  ;;  %2507 = vmatpush.bf16.msrb.mxu1 %v3661_v48  ;;  %v3928_v25 = vld [vmem:[#allocation7 + $0x74] sm:$0xf0]  ;;  %v3602_v45 = vld [vmem:[#allocation7 + $0x58] sm:$0xf0] }
 0x423   :  { %v1938_v3 = vmul.f32 %v4043_v60, %v1937_v21  ;;  %2520 = vmatpush.bf16.msrb.mxu2 %v3665_v49  ;;  %v3649_v21 = vor.u32 %v3936_v62, %v3648_v61  ;;  %v3576_v46 = vld [vmem:[#allocation7 + $0x20] sm:$0xf]  ;;  %v3919_v47 = vld [vmem:[#allocation7 + $0x2c] sm:$0xf0] }
 0x424   :  { %v4045_v5 = vpop.eup %4044  ;;  %v1920_v6 = vadd.f32 %v4041_v58, %v1919_v1  ;;  %v3653_v1 = vor.u32 %v3934_v22, %v3650_v0  ;;  %v3577_v49 = vor.u32 %v3919_v47, %v3576_v46  ;;  %v3915_v22 = vld [vmem:[#allocation7 + $0xc] sm:$0xf0]  ;;  %v3913_v0 = vld [vmem:[#allocation7 + $0x4] sm:$0xf] }
 0x425   :  { %v1939_v8 = vadd.f32 %v4043_v60, %v1938_v3  ;;  %v1956_v9 = vmul.f32 %v4045_v5, %v1954_v57  ;;  %v4047_v12 = vpop.eup %4046  ;;  %vm1961_vm4 = vweird.f32 %v4045_v5  ;;  %v3935_v57 = vld [vmem:[#allocation7 + $0xac] sm:$0xf0] }
 0x426   :  { %v1924_v11 = vsel %vm1923_vm0, %v4041_v58, %v1920_v6  ;;  %vm1962_vm6 = vmor %vm1960_vm5, %vm1961_vm4  ;;  %v3933_v58 = vld [vmem:[#allocation7 + $0xa4] sm:$0xf]  ;;  %v3641_v59 = vor.u32 %v3935_v57, %v3640_v56  ;;  %v3931_v3 = vld [vmem:[#allocation7 + $0x8c] sm:$0xf0]  ;;  %2534 = vmatpush.bf16.msrb.mxu3 %v3653_v1  ;;  %v3581_v56 = vor.u32 %v3917_v50, %v3578_v51 }
 0x427   :  { %v1929_v13 = vsel %vm1926_vm2, %v1928_v7, %v1924_v11  ;;  %v1943_v14 = vsel %vm1942_vm1, %v4043_v60, %v1939_v8  ;;  %v1957_v15 = vsub.f32 1.0, %v1956_v9  ;;  %v3642_v60 = vld [vmem:[#allocation7 + $0xb0] sm:$0xf0]  ;;  %2521 = vmatpush.bf16.msrb.mxu2 %v3649_v21  ;;  %v3632_v7 = vld [vmem:[#allocation7 + $0x88] sm:$0xf] }
 0x428   :  { %v1948_v16 = vsel %vm1945_vm3, %v1947_v10, %v1943_v14  ;;  %v1972_v17 = vmul.f32 %v4047_v12, %v1929_v13  ;;  %v3645_v63 = vor.u32 %v3933_v58, %v3642_v60  ;;  %v3626_v6 = vld [vmem:[#allocation7 + $0x90] sm:$0xf0]  ;;  %v3932_v8 = vld [vmem:[#allocation7 + $0x94] sm:$0xf0]  ;;  %v3930_v11 = vld [vmem:[#allocation7 + $0x8c] sm:$0xf] }
 0x429   :  { %v1971_v18 = vmul.f32 %v1948_v16, %v4191_v52  ;;  %v1958_v19 = vmul.f32 %v4045_v5, %v1957_v15  ;;  %v3672_v52 = vld [vmem:[#allocation7 + $0xe0] sm:$0xf]  ;;  %v3629_v9 = vor.u32 %v3929_v4, %v3626_v6  ;;  %v3633_v10 = vor.u32 %v3932_v8, %v3632_v7  ;;  %v3634_v12 = vld [vmem:[#allocation7 + $0x98] sm:$0xf0]  ;;  %v2226_v14 = vld [vmem:[#allocation5 + $0xc8] sm:$0xff] }
 0x42a   :  { %v3673_v32 = vor.u32 %v3943_v53, %v3672_v52  ;;  %2508 = vmatpush.bf16.msrb.mxu1 %v3645_v63  ;;  %v2225_v13 = vld [vmem:[#allocation5 + $0xc0] sm:$0xff]  ;;  %v3637_v15 = vor.u32 %v3930_v11, %v3634_v12  ;;  %v3920_v57 = vld [vmem:[#allocation7 + $0x34] sm:$0xf0]  ;;  %v3918_v58 = vld [vmem:[#allocation7 + $0x2c] sm:$0xf] }
 0x42b   :  { %v4195_v20 = vadd.f32 %v1972_v17, %v1971_v18  ;;  %v1959_v23 = vadd.f32 %v4045_v5, %v1958_v19  ;;  %2522 = vmatpush.bf16.msrb.mxu2 %v3633_v10  ;;  %v3608_v16 = vld [vmem:[#allocation7 + $0x60] sm:$0xf]  ;;  %v3927_v17 = vld [vmem:[#allocation7 + $0x6c] sm:$0xf0]  ;;  %v3925_v18 = vld [vmem:[#allocation7 + $0x64] sm:$0xf]  ;;  %v3585_v62 = vor.u32 %v3920_v57, %v3584_v55 }
 0x42c   :  { %2493 = vmatpush.bf16.msrb.mxu0 %v3673_v32  ;;  %2535 = vmatpush.bf16.msrb.mxu3 %v3637_v15  ;;  %v3609_v19 = vor.u32 %v3927_v17, %v3608_v16  ;;  %v3592_v32 = vld [vmem:[#allocation7 + $0x40] sm:$0xf]  ;;  %v3568_v6 = vld [vmem:[#allocation7 + $0x8] sm:$0xf]  ;;  %v3916_v7 = vld [vmem:[#allocation7 + $0x14] sm:$0xf0] }
 0x42d   :  { %4048 = vtanh.f32 %v4195_v20  ;;  %v1963_v26 = vsel %vm1962_vm6, %v4045_v5, %v1959_v23  ;;  %v3625_v5 = vor.u32 %v3931_v3, %v3624_v2  ;;  %v3610_v23 = vld [vmem:[#allocation7 + $0x70] sm:$0xf0]  ;;  %v3593_v35 = vor.u32 %v3923_v33, %v3592_v32  ;;  %v3560_v21 = vld [vmem:[#allocation7] sm:$0xf]  ;;  %v3914_v10 = vld [vmem:[#allocation7 + $0xc] sm:$0xf] }
 0x42e   :  { %v1968_v29 = vsel %vm1965_vm7, %v1967_v27, %v1963_v26  ;;  %2509 = vmatpush.bf16.msrb.mxu1 %v3629_v9  ;;  %v3613_v26 = vor.u32 %v3925_v18, %v3610_v23  ;;  %v3617_v27 = vor.u32 %v3928_v25, %v3616_v24  ;;  %v3561_v4 = vor.u32 %v3915_v22, %v3560_v21  ;;  %v3570_v11 = vld [vmem:[#allocation7 + $0x18] sm:$0xf0]  ;;  %v2227_v23 = vld [vmem:[#allocation5 + $0xd0] sm:$0xff]  ;;  %v2547_v21 = vld [vmem:[#allocation5 + $0xe8] sm:$0xff] }
 0x42f   :  { %v3569_v9 = vor.u32 %v3916_v7, %v3568_v6 }
 0x430   :  { %2494 = vmatpush.bf16.msrb.mxu0 %v3657_v44  ;;  %2523 = vmatpush.bf16.msrb.mxu2 %v3617_v27  ;;  %v3922_v44 = vld [vmem:[#allocation7 + $0x4c] sm:$0xf] }
 0x431   :  { %v3605_v48 = vor.u32 %v3922_v44, %v3602_v45 }
 0x432   :  { %2510 = vmatpush.bf16.msrb.mxu1 %v3613_v26 }
 0x433   :  { %v4049_v28 = vpop.eup %4048 }
 0x434   :  { %v1976_v30 = vmul.f32 %v4049_v28, %v1968_v29  ;;  %2495 = vmatpush.bf16.msrb.mxu0 %v3641_v59  ;;  %v3926_v28 = vld [vmem:[#allocation7 + $0x6c] sm:$0xf]  ;;  %v3618_v29 = vld [vmem:[#allocation7 + $0x78] sm:$0xf0]  ;;  %2524 = vmatpush.bf16.msrb.mxu2 %v3601_v43 }
 0x435   :  { %v3621_v52 = vor.u32 %v3926_v28, %v3618_v29  ;;  %v3586_v59 = vld [vmem:[#allocation7 + $0x38] sm:$0xf0] }
 0x436   :  { %v1979_v31 = vpack.c.bf16 %v1976_v30, %v1976_v30  ;;  %2511 = vmatpush.bf16.msrb.mxu1 %v3597_v42  ;;  %v3589_v63 = vor.u32 %v3918_v58, %v3586_v59 }
 0x437   :  { %2536 = vmatpush.bf16.msrb.mxu3 %v3621_v52 }
 0x438   :  { %2180 = vmatmul.bf16.vlgmr.msra.gmra.mxu0 %v1979_v31  ;;  %2193 = vmatmul.bf16.vlgmr.msra.gmra.mxu1 %v1979_v31 }
 0x439   :  { %2206 = vmatmul.bf16.vlgmr.msra.gmra.mxu2 %v1979_v31  ;;  %2219 = vmatmul.bf16.vlgmr.msra.gmra.mxu3 %v1979_v31 }
 0x43a   :  { %2496 = vmatpush.bf16.msrb.mxu0 %v3625_v5  ;;  %v3562_v5 = vld [vmem:[#allocation7 + $0x10] sm:$0xf0]  ;;  %2512 = vmatpush.bf16.msrb.mxu1 %v3581_v56 }
 0x43b   :  { %2537 = vmatpush.bf16.msrb.mxu3 %v3605_v48  ;;  %2525 = vmatpush.bf16.msrb.mxu2 %v3585_v62  ;;  %v3565_v8 = vor.u32 %v3913_v0, %v3562_v5  ;;  %v2549_v5 = vld [vmem:[#allocation5 + $0xf8] sm:$0xff] }
 0x43e   :  { %2497 = vmatpush.bf16.msrb.mxu0 %v3609_v19  ;;  %2513 = vmatpush.bf16.msrb.mxu1 %v3565_v8 }
 0x43f   :  { %2538 = vmatpush.bf16.msrb.mxu3 %v3589_v63  ;;  %2526 = vmatpush.bf16.msrb.mxu2 %v3569_v9 }
 0x442   :  { %2498 = vmatpush.bf16.msrb.mxu0 %v3593_v35 }
 0x446   :  { %2499 = vmatpush.bf16.msrb.mxu0 %v3577_v49 }
 0x44a   :  { %2500 = vmatpush.bf16.msrb.mxu0 %v3561_v4 }
 0x4b5   :  { %v2181_v30 = vpop.f32.mrf.mxu0  ;;  %v2194_v31 = vpop.f32.mrf.mxu1 }
 0x4b6   :  { %v2229_v53 = vadd.f32 %v2225_v13, %v2181_v30  ;;  %v2230_v54 = vadd.f32 %v2226_v14, %v2194_v31  ;;  %v3573_v14 = vor.u32 %v3914_v10, %v3570_v11 }
 0x4b8   :  { %v3555_v39 = vmul.f32 -1.442695, %v2229_v53  ;;  %v3556_v40 = vmul.f32 -1.442695, %v2230_v54  ;;  %2539 = vmatpush.bf16.msrb.mxu3 %v3573_v14 }
 0x4ba   :  { %4050 = vpow2.f32 %v3555_v39 }
 0x4bb   :  { %4052 = vpow2.f32 %v3556_v40 }
 0x4bc   :  { %v2207_v60 = vpop.f32.mrf.mxu2  ;;  %v2220_v61 = vpop.f32.mrf.mxu3 }
 0x4bd   :  { %v2232_v1 = vadd.f32 %v2228_v41, %v2220_v61  ;;  %v2183_v2 = vpop.f32.mrf.mxu0  ;;  %v2196_v3 = vpop.f32.mrf.mxu1  ;;  %v2231_v27 = vadd.f32 %v2227_v23, %v2207_v60 }
 0x4bf   :  { %v3557_v12 = vmul.f32 -1.442695, %v2232_v1 }
 0x4c0   :  { %v4051_v13 = vpop.eup %4050 }
 0x4c1   :  { %v4053_v15 = vpop.eup %4052  ;;  %v2236_v16 = vadd.f32 1.0, %v4051_v13  ;;  %4054 = vpow2.f32 %v3557_v12 }
 0x4c2   :  { %v2255_v17 = vadd.f32 1.0, %v4053_v15 }
 0x4c3   :  { %4056 = vrcp.f32 %v2236_v16  ;;  %v2248_v53 = vand.u32 2147483648, %v2236_v16  ;;  %v2246_v33 = vand.u32 2147483647, %v2236_v16  ;;  %vm2242_vm10 = vweird.f32 %v2236_v16 }
 0x4c4   :  { %4058 = vrcp.f32 %v2255_v17  ;;  %v2209_v18 = vpop.f32.mrf.mxu2  ;;  %v2222_v19 = vpop.f32.mrf.mxu3  ;;  %v2267_v54 = vand.u32 2147483648, %v2255_v17  ;;  %v2265_v35 = vand.u32 2147483647, %v2255_v17  ;;  %vm2261_vm11 = vweird.f32 %v2255_v17 }
 0x4c5   :  { %v2249_v38 = vor.u32 1.1754944e-38, %v2248_v53  ;;  %vm2247_vm14 = vcmp.eq.f32.partialorder %v2246_v33, 8.507059e+37  ;;  %v2548_v18 = vld [vmem:[#allocation5 + $0xf0] sm:$0xff] }
 0x4c6   :  { %v2268_v41 = vor.u32 1.1754944e-38, %v2267_v54  ;;  %vm2266_vm15 = vcmp.eq.f32.partialorder %v2265_v35, 8.507059e+37 }
 0x4c7   :  { %v4055_v24 = vpop.eup %4054 }
 0x4c8   :  { %v2275_v25 = vadd.f32 1.0, %v4055_v24 }
 0x4c9   :  { %v4057_v26 = vpop.eup %4056 }
 0x4ca   :  { %v4059_v28 = vpop.eup %4058  ;;  %v2238_v29 = vmul.f32 %v4057_v26, %v2236_v16  ;;  %4060 = vrcp.f32 %v2275_v25  ;;  %vm2243_vm8 = vweird.f32 %v4057_v26  ;;  %v2287_v56 = vand.u32 2147483648, %v2275_v25 }
 0x4cb   :  { %v2257_v30 = vmul.f32 %v4059_v28, %v2255_v17  ;;  %4062 = vtanh.f32 %v2231_v27  ;;  %vm2262_vm9 = vweird.f32 %v4059_v28  ;;  %vm2244_vm12 = vmor %vm2242_vm10, %vm2243_vm8  ;;  %vm2281_vm1 = vweird.f32 %v2275_v25 }
 0x4cc   :  { %v2239_v31 = vsub.f32 1.0, %v2238_v29  ;;  %vm2263_vm13 = vmor %vm2261_vm11, %vm2262_vm9  ;;  %v2285_v57 = vand.u32 2147483647, %v2275_v25  ;;  %v2288_v59 = vor.u32 1.1754944e-38, %v2287_v56 }
 0x4cd   :  { %v2258_v52 = vsub.f32 1.0, %v2257_v30 }
 0x4ce   :  { %v2240_v32 = vmul.f32 %v4057_v26, %v2239_v31  ;;  %vm2286_vm3 = vcmp.eq.f32.partialorder %v2285_v57, 8.507059e+37 }
 0x4cf   :  { %v2259_v34 = vmul.f32 %v4059_v28, %v2258_v52 }
 0x4d0   :  { %v4061_v36 = vpop.eup %4060  ;;  %v2241_v37 = vadd.f32 %v4057_v26, %v2240_v32 }
 0x4d1   :  { %v2260_v39 = vadd.f32 %v4059_v28, %v2259_v34  ;;  %v2277_v40 = vmul.f32 %v4061_v36, %v2275_v25  ;;  %v4063_v43 = vpop.eup %4062  ;;  %vm2282_vm0 = vweird.f32 %v4061_v36 }
 0x4d2   :  { %v2245_v42 = vsel %vm2244_vm12, %v4057_v26, %v2241_v37  ;;  %vm2283_vm2 = vmor %vm2281_vm1, %vm2282_vm0  ;;  %vm2633_vm0 = vcmask 7168  }
 0x4d3   :  { %v2250_v44 = vsel %vm2247_vm14, %v2249_v38, %v2245_v42  ;;  %v2264_v45 = vsel %vm2263_vm13, %v4059_v28, %v2260_v39  ;;  %v2278_v46 = vsub.f32 1.0, %v2277_v40 }
 0x4d4   :  { %v2269_v47 = vsel %vm2266_vm15, %v2268_v41, %v2264_v45  ;;  %v2293_v48 = vmul.f32 %v4063_v43, %v2250_v44 }
 0x4d5   :  { %v2292_v49 = vmul.f32 %v2269_v47, %v4195_v20  ;;  %v2279_v50 = vmul.f32 %v4061_v36, %v2278_v46  ;;  %v2546_v20 = vld [vmem:[#allocation5 + $0xe0] sm:$0xff] }
 0x4d7   :  { %v4199_v51 = vadd.f32 %v2293_v48, %v2292_v49  ;;  %v2280_v55 = vadd.f32 %v4061_v36, %v2279_v50 }
 0x4d9   :  { %4064 = vtanh.f32 %v4199_v51  ;;  %v2284_v58 = vsel %vm2283_vm2, %v4061_v36, %v2280_v55 }
 0x4da   :  { %v2289_v61 = vsel %vm2286_vm3, %v2288_v59, %v2284_v58  ;;  %v3952_v59 = vld [vmem:[%s4211_s2] ss:$0 sm:$0xff] }
 0x4df   :  { %v4065_v60 = vpop.eup %4064 }
 0x4e0   :  { %v2297_v62 = vmul.f32 %v4065_v60, %v2289_v61 }
 0x4e2   :  { %v2300_v63 = vpack.c.bf16 %v2297_v62, %v2297_v62 }
 0x4e4   :  { %2501 = vmatmul.bf16.vlgmr.msrb.gmra.mxu0 %v2300_v63  ;;  %2514 = vmatmul.bf16.vlgmr.msrb.gmra.mxu1 %v2300_v63 }
 0x4e5   :  { %2527 = vmatmul.bf16.vlgmr.msrb.gmra.mxu2 %v2300_v63  ;;  %2540 = vmatmul.bf16.vlgmr.msrb.gmra.mxu3 %v2300_v63 }
 0x561   :  { %v2502_v22 = vpop.f32.mrf.mxu0  ;;  %v2515_v0 = vpop.f32.mrf.mxu1 }
 0x562   :  { %v2550_v1 = vadd.f32 %v2546_v20, %v2502_v22  ;;  %v2551_v2 = vadd.f32 %v2547_v21, %v2515_v0 }
 0x564   :  { %v3686_v3 = vmul.f32 -1.442695, %v2550_v1  ;;  %v3687_v4 = vmul.f32 -1.442695, %v2551_v2 }
 0x566   :  { %4066 = vpow2.f32 %v3686_v3 }
 0x567   :  { %4068 = vpow2.f32 %v3687_v4 }
 0x568   :  { %v2528_v6 = vpop.f32.mrf.mxu2  ;;  %v2541_v7 = vpop.f32.mrf.mxu3 }
 0x569   :  { %v2553_v8 = vadd.f32 %v2549_v5, %v2541_v7  ;;  %v2504_v9 = vpop.f32.mrf.mxu0  ;;  %v2517_v10 = vpop.f32.mrf.mxu1  ;;  %v2552_v25 = vadd.f32 %v2548_v18, %v2528_v6 }
 0x56b   :  { %v3688_v11 = vmul.f32 -1.442695, %v2553_v8 }
 0x56c   :  { %v4067_v12 = vpop.eup %4066 }
 0x56d   :  { %v4069_v13 = vpop.eup %4068  ;;  %v2557_v14 = vadd.f32 1.0, %v4067_v12  ;;  %4070 = vpow2.f32 %v3688_v11 }
 0x56e   :  { %v2576_v15 = vadd.f32 1.0, %v4069_v13 }
 0x56f   :  { %4072 = vrcp.f32 %v2557_v14  ;;  %v2569_v31 = vand.u32 2147483648, %v2557_v14  ;;  %v2567_v54 = vand.u32 2147483647, %v2557_v14  ;;  %vm2563_vm6 = vweird.f32 %v2557_v14 }
 0x570   :  { %4074 = vrcp.f32 %v2576_v15  ;;  %v2530_v16 = vpop.f32.mrf.mxu2  ;;  %v2543_v17 = vpop.f32.mrf.mxu3  ;;  %v2588_v52 = vand.u32 2147483648, %v2576_v15  ;;  %v2586_v33 = vand.u32 2147483647, %v2576_v15  ;;  %vm2582_vm7 = vweird.f32 %v2576_v15 }
 0x571   :  { %v2570_v36 = vor.u32 1.1754944e-38, %v2569_v31  ;;  %vm2568_vm10 = vcmp.eq.f32.partialorder %v2567_v54, 8.507059e+37 }
 0x572   :  { %v2589_v39 = vor.u32 1.1754944e-38, %v2588_v52  ;;  %vm2587_vm11 = vcmp.eq.f32.partialorder %v2586_v33, 8.507059e+37 }
 0x573   :  { %v4071_v19 = vpop.eup %4070 }
 0x574   :  { %v2596_v23 = vadd.f32 1.0, %v4071_v19 }
 0x575   :  { %v4073_v24 = vpop.eup %4072 }
 0x576   :  { %v4075_v26 = vpop.eup %4074  ;;  %v2559_v27 = vmul.f32 %v4073_v24, %v2557_v14  ;;  %4076 = vrcp.f32 %v2596_v23  ;;  %vm2564_vm4 = vweird.f32 %v4073_v24  ;;  %v2608_v55 = vand.u32 2147483648, %v2596_v23 }
 0x577   :  { %v2578_v28 = vmul.f32 %v4075_v26, %v2576_v15  ;;  %4078 = vtanh.f32 %v2552_v25  ;;  %vm2583_vm5 = vweird.f32 %v4075_v26  ;;  %vm2565_vm8 = vmor %vm2563_vm6, %vm2564_vm4  ;;  %vm2602_vm13 = vweird.f32 %v2596_v23 }
 0x578   :  { %v2560_v29 = vsub.f32 1.0, %v2559_v27  ;;  %vm2584_vm9 = vmor %vm2582_vm7, %vm2583_vm5  ;;  %v2606_v56 = vand.u32 2147483647, %v2596_v23  ;;  %v2609_v58 = vor.u32 1.1754944e-38, %v2608_v55 }
 0x579   :  { %v2579_v30 = vsub.f32 1.0, %v2578_v28 }
 0x57a   :  { %v2561_v53 = vmul.f32 %v4073_v24, %v2560_v29  ;;  %vm2607_vm15 = vcmp.eq.f32.partialorder %v2606_v56, 8.507059e+37 }
 0x57b   :  { %v2580_v32 = vmul.f32 %v4075_v26, %v2579_v30 }
 0x57c   :  { %v4077_v34 = vpop.eup %4076  ;;  %v2562_v35 = vadd.f32 %v4073_v24, %v2561_v53 }
 0x57d   :  { %v2581_v37 = vadd.f32 %v4075_v26, %v2580_v32  ;;  %v2598_v38 = vmul.f32 %v4077_v34, %v2596_v23  ;;  %v4079_v41 = vpop.eup %4078  ;;  %vm2603_vm12 = vweird.f32 %v4077_v34 }
 0x57e   :  { %v2566_v40 = vsel %vm2565_vm8, %v4073_v24, %v2562_v35  ;;  %vm2604_vm14 = vmor %vm2602_vm13, %vm2603_vm12 }
 0x57f   :  { %v2571_v42 = vsel %vm2568_vm10, %v2570_v36, %v2566_v40  ;;  %v2585_v43 = vsel %vm2584_vm9, %v4075_v26, %v2581_v37  ;;  %v2599_v44 = vsub.f32 1.0, %v2598_v38 }
 0x580   :  { %v2614_v45 = vmul.f32 %v4079_v41, %v2571_v42  ;;  %v2590_v46 = vsel %vm2587_vm11, %v2589_v39, %v2585_v43 }
 0x581   :  { %v2600_v47 = vmul.f32 %v4077_v34, %v2599_v44  ;;  %v2613_v48 = vmul.f32 %v2590_v46, %v4199_v51  ;;  %v3953_v51 = vld [vmem:[#allocation4] ss:$0 sm:$0xff] }
 0x583   :  { %v2615_v49 = vadd.f32 %v2614_v45, %v2613_v48  ;;  %v2601_v50 = vadd.f32 %v4077_v34, %v2600_v47 }
 0x585   :  { %4080 = vtanh.f32 %v2615_v49  ;;  %v2605_v57 = vsel %vm2604_vm14, %v4077_v34, %v2601_v50 }
 0x586   :  { %v2610_v61 = vsel %vm2607_vm15, %v2609_v58, %v2605_v57 }
 0x58b   :  { %v4081_v60 = vpop.eup %4080 }
 0x58c   :  { %v2618_v62 = vmul.f32 %v4081_v60, %v2610_v61 }
 0x58e   :  { %v2625_v63 = vmul.f32 %v3952_v59, %v2618_v62 }
 0x590   :  { %2626 = vadd.xlane.f32.xlu0 %v2625_v63 }
 0x603   :  { %v2627_v20 = vpop.xlane.xlu0 %2626 }
 0x604   :  { %v2632_v21 = vadd.f32 %v3953_v51, %v2627_v20 }
 0x606   :  { %2634 = vst.msk [vmem:[%s4213_s4] sm:$0xff] %vm2633_vm0, %v2632_v21 }
 0x607   :  { %2639 = vsyncpa [#allocation6], 1 }
 0x608   :  { %2640 = vsyncpa [#allocation8], 1 }

</bundles_post_ra>
